<compile_context>
chip_gen: v5e
topology: v5e:2x2
jax: 0.10.0
libtpu: 0.0.40
codegen_flags: <defaults>
</compile_context>

<pallas_src>
import numpy as np
import jax
import jax.numpy as jnp
from jax.experimental import pallas as pl
from jax.experimental.pallas import tpu as pltpu

# Problem sizes (small, consistent with the module's forward).
B, CIN, H, W = 2, 4, 16, 16
COUT = 32
NUM_CLASSES = 10
KH = KW = 3
PATCH = KH * KW * CIN          # 36  (im2col K dimension)
NPOS = H * W                   # 256 true output positions per batch element
M = B * NPOS                   # 512 im2col rows (multiple of 8 -> clean sublane tiling)


# ------------------------------ Pallas kernel ------------------------------ #

def fused_kernel(f2_ref, w_ref, cb_ref, pool_ref, fw_ref, fb_ref, o_ref):
    """Fused encoder + classifier.

    f2_ref:   (M, PATCH)           im2col of the SAME-padded input, tap order (kh, kw, cin)
    w_ref:    (PATCH, COUT)        conv weights (row order (kh, kw, cin) -> matches f2)
    cb_ref:   (1, COUT)            conv bias
    pool_ref: (B, M)               constant mean matrix: 1/(H*W) on each batch's row block
    fw_ref:   (COUT, NUM_CLASSES)  classifier weights
    fb_ref:   (1, NUM_CLASSES)     classifier bias
    o_ref:    (B, NUM_CLASSES)     softmax probabilities
    """
    hi = jax.lax.Precision.HIGHEST

    # 3x3 conv as a single (M, 36) x (36, COUT) MXU matmul (taps folded into K).
    acc = jnp.dot(f2_ref[...], w_ref[...],
                  preferred_element_type=jnp.float32, precision=hi)

    # Bias + ReLU.
    acc = jnp.maximum(acc + cb_ref[...], 0.0)

    # Global average pool as a matmul with a constant per-batch mean matrix -> (B, COUT).
    h = jnp.dot(pool_ref[...], acc,
                preferred_element_type=jnp.float32, precision=hi)

    # Classifier: Linear + Softmax(dim=1).
    logits = jnp.dot(h, fw_ref[...],
                     preferred_element_type=jnp.float32, precision=hi) + fb_ref[...]
    m = jnp.max(logits, axis=1, keepdims=True)
    e = jnp.exp(logits - m)
    s = jnp.sum(e, axis=1, keepdims=True)
    o_ref[...] = e * pl.reciprocal(s, approx=False)   # approx=False: keep 1e-5 accuracy gate


# ------------------------------- glue / wrapper ----------------------------- #

def _build_pool_matrix():
    """(B, M) constant: 1/(H*W) on batch b's row block, 0 elsewhere."""
    p = np.zeros((B, M), np.float32)
    for b in range(B):
        p[b, b * NPOS:(b + 1) * NPOS] = 1.0 / NPOS
    return jnp.asarray(p)


_POOL = _build_pool_matrix()


def finetune_encoder_forward(x_nchw, params):
    conv_w, conv_b, fc_w, fc_b = params

    # Layout glue only (one small XLA fusion): NCHW -> NHWC, SAME zero-pad, im2col with
    # tap order (kh, kw, cin) so rows of conv_w line up with the K axis.
    x_nhwc = jnp.transpose(x_nchw, (0, 2, 3, 1)).astype(jnp.float32)     # (B, H, W, CIN)
    xp = jnp.pad(x_nhwc, ((0, 0), (1, 1), (1, 1), (0, 0)))               # (B, H+2, W+2, CIN)
    patches = jnp.concatenate(
        [xp[:, dy:dy + H, dx:dx + W, :] for dy in range(KH) for dx in range(KW)],
        axis=-1)                                                         # (B, H, W, PATCH)
    f2 = patches.reshape(M, PATCH)                                       # (512, 36)

    vmem = pl.BlockSpec(memory_space=pltpu.MemorySpace.VMEM)
    out = pl.pallas_call(
        fused_kernel,
        out_shape=jax.ShapeDtypeStruct((B, NUM_CLASSES), jnp.float32),
        in_specs=[vmem] * 6,
        out_specs=vmem,
    )(f2, conv_w, conv_b, _POOL, fc_w, fc_b)
    return out


def reference_forward(x_nchw, params):
    """Pure-JAX reference mirroring the PyTorch forward semantics."""
    conv_w, conv_b, fc_w, fc_b = params
    x = jnp.transpose(x_nchw, (0, 2, 3, 1)).astype(jnp.float32)
    w_hwio = conv_w.reshape(KH, KW, CIN, COUT)
    y = jax.lax.conv_general_dilated(
        x, w_hwio, window_strides=(1, 1), padding="SAME",
        dimension_numbers=("NHWC", "HWIO", "NHWC"))
    y = jax.nn.relu(y + conv_b[0])
    h = jnp.mean(y, axis=(1, 2))                        # (B, COUT)
    logits = h @ fc_w + fc_b
    return jax.nn.softmax(logits, axis=1)


def init_params(key):
    k1, k2, k3, k4 = jax.random.split(key, 4)
    conv_w = 0.1 * jax.random.normal(k1, (PATCH, COUT), jnp.float32)
    conv_b = 0.1 * jax.random.normal(k2, (1, COUT), jnp.float32)
    fc_w = 0.1 * jax.random.normal(k3, (COUT, NUM_CLASSES), jnp.float32)
    fc_b = 0.1 * jax.random.normal(k4, (1, NUM_CLASSES), jnp.float32)
    return conv_w, conv_b, fc_w, fc_b


if __name__ == "__main__":
    key = jax.random.PRNGKey(0)
    kx, kp = jax.random.split(key)
    x = jax.random.normal(kx, (B, CIN, H, W), jnp.float32)
    params = init_params(kp)

    out = jax.jit(finetune_encoder_forward)(x, params)
    out = jax.block_until_ready(out)

    assert out.shape == (B, NUM_CLASSES)
    assert jnp.allclose(jnp.sum(out, axis=1), 1.0, atol=1e-5)   # softmax rows sum to 1

    ref = reference_forward(x, params)
    assert jnp.allclose(out, ref, atol=1e-5, rtol=1e-5)

    print("KERNEL_OK")
</pallas_src>

<mosaic_0001>
module attributes {stable_mosaic.version = 11 : i64} {
  func.func @fused_kernel(%arg0: memref<512x36xf32, #tpu.memory_space<vmem>>, %arg1: memref<36x32xf32, #tpu.memory_space<vmem>>, %arg2: memref<1x32xf32, #tpu.memory_space<vmem>>, %arg3: memref<2x512xf32, #tpu.memory_space<vmem>>, %arg4: memref<32x10xf32, #tpu.memory_space<vmem>>, %arg5: memref<1x10xf32, #tpu.memory_space<vmem>>, %arg6: memref<2x10xf32, #tpu.memory_space<vmem>>) attributes {dimension_semantics = [], scalar_prefetch = 0 : i64, scratch_operands = 0 : i64, tpu.core_type = #tpu.core_type<tc>} {
    %c0 = arith.constant 0 : index
    %c0_0 = arith.constant 0 : index
    %0 = vector.load %arg0[%c0, %c0_0] : memref<512x36xf32, #tpu.memory_space<vmem>>, vector<512x36xf32>
    %c0_1 = arith.constant 0 : index
    %c0_2 = arith.constant 0 : index
    %1 = vector.load %arg1[%c0_1, %c0_2] : memref<36x32xf32, #tpu.memory_space<vmem>>, vector<36x32xf32>
    %cst = arith.constant dense<0.000000e+00> : vector<512x32xf32>
    %2 = tpu.matmul %0, %1, %cst {dimension_numbers = #tpu.dot_dimension_numbers<[1], [0], [0], [1], [0, 0, 1, 1], [], []>, precision = #tpu.contract_precision<fp32>} : vector<512x36xf32>, vector<36x32xf32>, vector<512x32xf32> -> vector<512x32xf32>
    %c0_3 = arith.constant 0 : index
    %c0_4 = arith.constant 0 : index
    %3 = vector.load %arg2[%c0_3, %c0_4] : memref<1x32xf32, #tpu.memory_space<vmem>>, vector<1x32xf32>
    %4 = vector.broadcast %3 : vector<1x32xf32> to vector<512x32xf32>
    %5 = arith.addf %2, %4 : vector<512x32xf32>
    %cst_5 = arith.constant 0.000000e+00 : f32
    %6 = vector.broadcast %cst_5 : f32 to vector<512x32xf32>
    %7 = arith.maximumf %5, %6 : vector<512x32xf32>
    %c0_6 = arith.constant 0 : index
    %c0_7 = arith.constant 0 : index
    %8 = vector.load %arg3[%c0_6, %c0_7] : memref<2x512xf32, #tpu.memory_space<vmem>>, vector<2x512xf32>
    %cst_8 = arith.constant dense<0.000000e+00> : vector<2x32xf32>
    %9 = tpu.matmul %8, %7, %cst_8 {dimension_numbers = #tpu.dot_dimension_numbers<[1], [0], [0], [1], [0, 0, 1, 1], [], []>, precision = #tpu.contract_precision<fp32>} : vector<2x512xf32>, vector<512x32xf32>, vector<2x32xf32> -> vector<2x32xf32>
    %c0_9 = arith.constant 0 : index
    %c0_10 = arith.constant 0 : index
    %10 = vector.load %arg4[%c0_9, %c0_10] : memref<32x10xf32, #tpu.memory_space<vmem>>, vector<32x10xf32>
    %cst_11 = arith.constant dense<0.000000e+00> : vector<2x10xf32>
    %11 = tpu.matmul %9, %10, %cst_11 {dimension_numbers = #tpu.dot_dimension_numbers<[1], [0], [0], [1], [0, 0, 1, 1], [], []>, precision = #tpu.contract_precision<fp32>} : vector<2x32xf32>, vector<32x10xf32>, vector<2x10xf32> -> vector<2x10xf32>
    %c0_12 = arith.constant 0 : index
    %c0_13 = arith.constant 0 : index
    %12 = vector.load %arg5[%c0_12, %c0_13] : memref<1x10xf32, #tpu.memory_space<vmem>>, vector<1x10xf32>
    %13 = vector.broadcast %12 : vector<1x10xf32> to vector<2x10xf32>
    %14 = arith.addf %11, %13 : vector<2x10xf32>
    %cst_14 = arith.constant dense<0xFF800000> : vector<2xf32>
    %15 = vector.multi_reduction <maximumf>, %14, %cst_14 [1] : vector<2x10xf32> to vector<2xf32>
    %16 = vector.shape_cast %15 : vector<2xf32> to vector<2x1xf32>
    %17 = vector.broadcast %16 : vector<2x1xf32> to vector<2x10xf32>
    %18 = arith.subf %14, %17 : vector<2x10xf32>
    %19 = math.exp %18 : vector<2x10xf32>
    %cst_15 = arith.constant dense<0.000000e+00> : vector<2xf32>
    %20 = vector.multi_reduction <add>, %19, %cst_15 [1] : vector<2x10xf32> to vector<2xf32>
    %21 = vector.shape_cast %20 : vector<2xf32> to vector<2x1xf32>
    %22 = tpu.reciprocal %21 : vector<2x1xf32> -> vector<2x1xf32>
    %23 = vector.broadcast %22 : vector<2x1xf32> to vector<2x10xf32>
    %24 = arith.mulf %19, %23 : vector<2x10xf32>
    %c0_16 = arith.constant 0 : index
    %c0_17 = arith.constant 0 : index
    %25 = vector.load %arg6[%c0_16, %c0_17] : memref<2x10xf32, #tpu.memory_space<vmem>>, vector<2x10xf32>
    tpu.vector_store %arg6[%c0_16, %c0_17], %24 {strides = array<i32>} : memref<2x10xf32, #tpu.memory_space<vmem>>, vector<2x10xf32>,
    return
  }
}

</mosaic_0001>

<bundles_post_ra>
// kernel: finetune_encoder_forward.1
= control target key start
LH: loop header
LB: loop body
LE: loop exit
PB: predicated region body
PF: predicated region fallthrough
CT: control target
= control target key end

     0   :  { %vm290_vm0 = vcmask 1043456   ;;  %vm97_vm1 = vcmask 293888   ;;  %s7529_s0 = inlined_call_operand.vmem [shape: f32[512,36], index: 0, kind: input, shape index: {}]   ;;  %s7530_s1 = inlined_call_operand.vmem [shape: f32[36,32], index: 1, kind: input, shape index: {}]   ;;  %s7531_s2 = inlined_call_operand.vmem [shape: f32[1,32], index: 2, kind: input, shape index: {}]   ;;  %s7532_s3 = inlined_call_operand.vmem [shape: f32[2,512], index: 3, kind: input, shape index: {}]   ;;  %s7533_s4 = inlined_call_operand.vmem [shape: f32[32,10], index: 4, kind: input, shape index: {}]   ;;  %s7534_s5 = inlined_call_operand.vmem [shape: f32[1,10], index: 5, kind: input, shape index: {}]   ;;  %s7535_s6 = inlined_call_operand.hbm [shape: f32[2,10], index: 6, kind: output, shape index: {}]  }
   0x1   :  { %v92_v0 = vld [vmem:[%s7530_s1 + $0x20] sm:$0xf]  ;;  %v91_v1 = vld [vmem:[%s7530_s1 + $0x18] sm:$0xff]  ;;  %v90_v2 = vld [vmem:[%s7530_s1 + $0x10] sm:$0xff] }
   0x2   :  { %v292_v3 = vsel %vm290_vm0, %v92_v0, 0  ;;  %v4213_v4 = vand.u32 4294901760, %v91_v1  ;;  %v4215_v5 = vand.u32 4294901760, %v90_v2  ;;  %v89_v6 = vld [vmem:[%s7530_s1 + $0x8] sm:$0xff]  ;;  %v88_v7 = vld [vmem:[%s7530_s1] sm:$0xff] }
   0x3   :  { %v24_v8 = vld [vmem:[%s7529_s0] sm:$0xff]  ;;  %v4226_v9 = vand.u32 4294901760, %v292_v3  ;;  %v4228_v10 = vand.u32 4294901760, %v89_v6  ;;  %v4230_v11 = vand.u32 4294901760, %v88_v7  ;;  %v25_v14 = vld [vmem:[%s7529_s0 + $0x8] sm:$0xff] }
   0x4   :  { %v99_v12 = vsel %vm97_vm1, %v24_v8, 0  ;;  %v80_v13 = vld [vmem:[%s7529_s0 + $0x1c0] sm:$0xff]  ;;  %v4243_v17 = vsub.f32 %v91_v1, %v4213_v4  ;;  %v4246_v18 = vsub.f32 %v90_v2, %v4215_v5  ;;  %v102_v26 = vsel %vm97_vm1, %v25_v14, 0 }
   0x5   :  { %v4239_v15 = vand.u32 4294901760, %v99_v12  ;;  %v267_v16 = vsel %vm97_vm1, %v80_v13, 0  ;;  %306 = vmatpush.msra.mxu0 %v4226_v9  ;;  %4123 = vmatpush.msra.mxu2 %v4226_v9  ;;  %v4251_v19 = vsub.f32 %v292_v3, %v4226_v9  ;;  %v4256_v21 = vsub.f32 %v89_v6, %v4228_v10 }
   0x6   :  { %v4253_v20 = vand.u32 4294901760, %v267_v16  ;;  %v4259_v22 = vsub.f32 %v88_v7, %v4230_v11  ;;  %v847_v24 = vand.u32 4294901760, %v4243_v17  ;;  %v853_v25 = vand.u32 4294901760, %v4246_v18 }
   0x7   :  { %v4262_v23 = vsub.f32 %v99_v12, %v4239_v15  ;;  %308 = vmatpush.msra.mxu0 %v4213_v4  ;;  %4124 = vmatpush.msra.mxu2 %v4213_v4  ;;  %v841_v27 = vand.u32 4294901760, %v4251_v19  ;;  %v859_v29 = vand.u32 4294901760, %v4256_v21  ;;  %v4278_v32 = vand.u32 4294901760, %v102_v26 }
   0x8   :  { %7739 = vst [vmem:[#allocation5_spill] sm:$0xff] %v4253_v20  ;;  %v4271_v28 = vsub.f32 %v267_v16, %v4253_v20  ;;  %v848_v31 = vsub.f32 %v4243_v17, %v847_v24 }
   0x9   :  { %v317_v30 = vand.u32 4294901760, %v4262_v23 }
   0xa   :  { %11 = vsyncpa [#allocation3], 0  ;;  %310 = vmatpush.msra.mxu0 %v4215_v5  ;;  %4125 = vmatpush.msra.mxu2 %v4215_v5  ;;  %v842_v33 = vsub.f32 %v4251_v19, %v841_v27  ;;  %v7543_v34 = vand.u32 4294901760, %v4271_v28  ;;  %v81_v35 = vld [vmem:[%s7529_s0 + $0x1c8] sm:$0xff]  ;;  %v26_v36 = vld [vmem:[%s7529_s0 + $0x10] sm:$0xff]  ;;  %v854_v38 = vsub.f32 %v4246_v18, %v853_v25  ;;  %v865_v39 = vand.u32 4294901760, %v4259_v22 }
   0xb   :  { %v318_v37 = vsub.f32 %v4262_v23, %v317_v30  ;;  %v4298_v40 = vsub.f32 %v102_v26, %v4278_v32  ;;  %v82_v41 = vld [vmem:[%s7529_s0 + $0x1d0] sm:$0xff]  ;;  %v849_v44 = vand.u32 4294901760, %v848_v31  ;;  %v860_v45 = vsub.f32 %v4256_v21, %v859_v29  ;;  %v27_v50 = vld [vmem:[%s7529_s0 + $0x18] sm:$0xff]  ;;  %v28_v16 = vld [vmem:[%s7529_s0 + $0x20] sm:$0xff]  ;;  %s4114_s26 = sshll.u32 %s7535_s6, 4  ;;  %s4115_s26 = int_to_ptr.hbm [resolvable:$true] %s4114_s26 }
   0xc   :  { %312 = vmatpush.msra.mxu0 %v4228_v10  ;;  %4126 = vmatpush.msra.mxu2 %v4228_v10  ;;  %v843_v42 = vand.u32 4294901760, %v842_v33  ;;  %v766_v43 = vsub.f32 %v4271_v28, %v7543_v34  ;;  %v270_v48 = vsel %vm97_vm1, %v81_v35, 0  ;;  %v105_v49 = vsel %vm97_vm1, %v26_v36, 0  ;;  %v83_v51 = vld [vmem:[%s7529_s0 + $0x1d8] sm:$0xff]  ;;  %v42_v34 = vld [vmem:[%s7529_s0 + $0x90] sm:$0xff] }
   0xd   :  { %v319_v46 = vand.u32 4294901760, %v318_v37  ;;  %v325_v47 = vand.u32 4294901760, %v4298_v40  ;;  %v4322_v53 = vand.u32 4294901760, %v270_v48  ;;  %v4324_v54 = vand.u32 4294901760, %v105_v49 }
   0xe   :  { %314 = vmatpush.msra.mxu0 %v4230_v11  ;;  %4127 = vmatpush.msra.mxu2 %v4230_v11  ;;  %v767_v52 = vand.u32 4294901760, %v766_v43  ;;  %v273_v55 = vsel %vm97_vm1, %v82_v41, 0  ;;  %v855_v56 = vand.u32 4294901760, %v854_v38  ;;  %v866_v57 = vsub.f32 %v4259_v22, %v865_v39 }
   0xf   :  { %7740 = vst [vmem:[#allocation6_spill] sm:$0xff] %v4322_v53  ;;  %844 = vmatpush.msra.mxu1 %v843_v42  ;;  %4128 = vmatpush.msra.mxu3 %v843_v42  ;;  %v326_v58 = vsub.f32 %v4298_v40, %v325_v47  ;;  %v4333_v59 = vand.u32 4294901760, %v273_v55  ;;  %v4336_v60 = vsub.f32 %v270_v48, %v4322_v53  ;;  %v108_v62 = vsel %vm97_vm1, %v27_v50, 0  ;;  %v29_v42 = vld [vmem:[%s7529_s0 + $0x28] sm:$0xff]  ;;  %v30_v50 = vld [vmem:[%s7529_s0 + $0x30] sm:$0xff] }
  0x10   :  { %320 = vmatmul.f32.vlgmr.msra.gmra.mxu0 %v319_v46  ;;  %768 = vmatmul.f32.vlgmr.msra.gmra.mxu2 %v767_v52  ;;  %v4339_v61 = vsub.f32 %v105_v49, %v4324_v54  ;;  %v276_v63 = vsel %vm97_vm1, %v83_v51, 0  ;;  %v861_v0 = vand.u32 4294901760, %v860_v45  ;;  %v867_v3 = vand.u32 4294901760, %v866_v57 }
  0x11   :  { %7741 = vst [vmem:[#allocation7_spill] sm:$0xff] %v4333_v59  ;;  %850 = vmatpush.msra.mxu1 %v849_v44  ;;  %4129 = vmatpush.msra.mxu3 %v849_v44  ;;  %v4344_v1 = vsub.f32 %v273_v55, %v4333_v59  ;;  %v7542_v2 = vand.u32 4294901760, %v4336_v60  ;;  %v4348_v6 = vand.u32 4294901760, %v108_v62  ;;  %v4350_v7 = vand.u32 4294901760, %v276_v63 }
  0x12   :  { %1139 = vmatpush.msrb.mxu2 %v4251_v19  ;;  %1893 = vmatpush.msrb.mxu0 %v841_v27  ;;  %v327_v8 = vand.u32 4294901760, %v326_v58  ;;  %v333_v13 = vand.u32 4294901760, %v4339_v61  ;;  %v84_v19 = vld [vmem:[%s7529_s0 + $0x1e0] sm:$0xff]  ;;  %vm3892_vm2 = vcmask 261120   ;;  %vm4081_vm3 = vcmask 74752  }
  0x13   :  { %856 = vmatpush.msra.mxu1 %v855_v56  ;;  %4130 = vmatpush.msra.mxu3 %v855_v56  ;;  %7742 = vst [vmem:[#allocation8_spill] sm:$0xff] %v4350_v7  ;;  %v774_v12 = vsub.f32 %v4336_v60, %v7542_v2  ;;  %v7541_v14 = vand.u32 4294901760, %v4344_v1  ;;  %v4370_v27 = vsub.f32 %v108_v62, %v4348_v6  ;;  %v117_v56 = vsel %vm97_vm1, %v30_v50, 0  ;;  %v41_v2 = vld [vmem:[%s7529_s0 + $0x88] sm:$0xff] }
  0x14   :  { %1142 = vmatpush.msrb.mxu2 %v4243_v17  ;;  %1897 = vmatpush.msrb.mxu0 %v847_v24  ;;  %v111_v17 = vsel %vm97_vm1, %v28_v16, 0  ;;  %v334_v24 = vsub.f32 %v4339_v61, %v333_v13  ;;  %v4458_v62 = vand.u32 4294901760, %v117_v56  ;;  %v87_v16 = vld [vmem:[%s7529_s0 + $0x1f8] sm:$0xff] }
  0x15   :  { %862 = vmatpush.msra.mxu1 %v861_v0  ;;  %4131 = vmatpush.msra.mxu3 %v861_v0  ;;  %v775_v26 = vand.u32 4294901760, %v774_v12  ;;  %v782_v31 = vsub.f32 %v4344_v1, %v7541_v14  ;;  %v4387_v33 = vand.u32 4294901760, %v111_v17  ;;  %v341_v38 = vand.u32 4294901760, %v4370_v27  ;;  %v31_v12 = vld [vmem:[%s7529_s0 + $0x38] sm:$0xff]  ;;  %v40_v14 = vld [vmem:[%s7529_s0 + $0x80] sm:$0xff] }
  0x16   :  { %1145 = vmatpush.msrb.mxu2 %v4246_v18  ;;  %1901 = vmatpush.msrb.mxu0 %v853_v25  ;;  %v4380_v18 = vsub.f32 %v276_v63, %v4350_v7  ;;  %v279_v25 = vsel %vm97_vm1, %v84_v19, 0  ;;  %v335_v36 = vand.u32 4294901760, %v334_v24 }
  0x17   :  { %868 = vmatpush.msra.mxu1 %v867_v3  ;;  %4132 = vmatpush.msra.mxu3 %v867_v3  ;;  %v4389_v35 = vand.u32 4294901760, %v279_v25  ;;  %v783_v37 = vand.u32 4294901760, %v782_v31  ;;  %v120_v31 = vsel %vm97_vm1, %v31_v12, 0 }
  0x18   :  { %328 = vmatmul.f32.gmra.mxu0 %v327_v8  ;;  %776 = vmatmul.f32.gmra.mxu2 %v775_v26  ;;  %7743 = vst [vmem:[#allocation9_spill] sm:$0xff] %v4380_v18  ;;  %v7540_v41 = vand.u32 4294901760, %v4380_v18  ;;  %v4473_v26 = vsub.f32 %v117_v56, %v4458_v62 }
  0x19   :  { %870 = vmatmul.f32.vlgmr.msra.gmra.mxu1 %v4239_v15  ;;  %1094 = vmatmul.f32.vlgmr.msra.gmra.mxu3 %v4253_v20  ;;  %7744 = vst [vmem:[#allocation10_spill] sm:$0xff] %v4389_v35 }
  0x1a   :  { %1148 = vmatpush.msrb.mxu2 %v4256_v21  ;;  %1485 = vmatpush.msrb.mxu3 %v4226_v9  ;;  %v4409_v21 = vsub.f32 %v111_v17, %v4387_v33 }
  0x1b   :  { %2179 = vmatpush.msrb.mxu1 %v4226_v9  ;;  %1905 = vmatpush.msrb.mxu0 %v859_v29  ;;  %v85_v9 = vld [vmem:[%s7529_s0 + $0x1e8] sm:$0xff]  ;;  %v4419_v29 = vsub.f32 %v279_v25, %v4389_v35  ;;  %v288_v25 = vsel %vm97_vm1, %v87_v16, 0 }
  0x1c   :  { %1151 = vmatpush.msrb.mxu2 %v4259_v22  ;;  %1487 = vmatpush.msrb.mxu3 %v4213_v4  ;;  %v790_v22 = vsub.f32 %v4380_v18, %v7540_v41  ;;  %v349_v43 = vand.u32 4294901760, %v4409_v21  ;;  %v39_v41 = vld [vmem:[%s7529_s0 + $0x78] sm:$0xff] }
  0x1d   :  { %2181 = vmatpush.msrb.mxu1 %v4213_v4  ;;  %1909 = vmatpush.msrb.mxu0 %v865_v39  ;;  %v342_v4 = vsub.f32 %v4370_v27, %v341_v38  ;;  %7745 = vst [vmem:[#allocation11_spill] sm:$0xff] %v4419_v29  ;;  %v114_v39 = vsel %vm97_vm1, %v29_v42, 0  ;;  %v7539_v48 = vand.u32 4294901760, %v4419_v29 }
  0x1e   :  { %1489 = vmatpush.msrb.mxu3 %v4215_v5  ;;  %v4428_v44 = vand.u32 4294901760, %v114_v39  ;;  %v791_v46 = vand.u32 4294901760, %v790_v22  ;;  %v350_v52 = vsub.f32 %v4409_v21, %v349_v43  ;;  %v4489_v22 = vand.u32 4294901760, %v288_v25 }
  0x1f   :  { %2183 = vmatpush.msrb.mxu1 %v4215_v5  ;;  %v282_v5 = vsel %vm97_vm1, %v85_v9, 0  ;;  %v343_v45 = vand.u32 4294901760, %v342_v4  ;;  %v4487_v4 = vand.u32 4294901760, %v120_v31 }
  0x20   :  { %336 = vmatmul.f32.gmra.mxu0 %v335_v36  ;;  %784 = vmatmul.f32.gmra.mxu2 %v783_v37  ;;  %v4431_v49 = vand.u32 4294901760, %v282_v5  ;;  %v4442_v51 = vsub.f32 %v114_v39, %v4428_v44  ;;  %v351_v63 = vand.u32 4294901760, %v350_v52  ;;  %v365_v37 = vand.u32 4294901760, %v4473_v26  ;;  %7750 = vst [vmem:[#allocation16_spill] sm:$0xff] %v4489_v22  ;;  %v32_v39 = vld [vmem:[%s7529_s0 + $0x40] sm:$0xff] }
  0x21   :  { %874 = vmatmul.f32.gmra.mxu1 %v4278_v32  ;;  %1098 = vmatmul.f32.gmra.mxu3 %v4322_v53  ;;  %v4504_v50 = vsub.f32 %v288_v25, %v4489_v22 }
  0x22   :  { %1491 = vmatpush.msrb.mxu3 %v4228_v10  ;;  %2185 = vmatpush.msrb.mxu1 %v4228_v10  ;;  %7746 = vst [vmem:[#allocation12_spill] sm:$0xff] %v4431_v49  ;;  %v86_v10 = vld [vmem:[%s7529_s0 + $0x1f0] sm:$0xff]  ;;  %v4451_v55 = vsub.f32 %v282_v5, %v4431_v49  ;;  %v357_v58 = vand.u32 4294901760, %v4442_v51  ;;  %v366_v5 = vsub.f32 %v4473_v26, %v365_v37 }
  0x23   :  { %v285_v57 = vsel %vm97_vm1, %v86_v10, 0  ;;  %7751 = vst [vmem:[#allocation17_spill] sm:$0xff] %v4504_v50  ;;  %v123_v10 = vsel %vm97_vm1, %v32_v39, 0  ;;  %v34_v39 = vld [vmem:[%s7529_s0 + $0x50] sm:$0xff] }
  0x24   :  { %1493 = vmatpush.msrb.mxu3 %v4230_v11  ;;  %2187 = vmatpush.msrb.mxu1 %v4230_v11  ;;  %v798_v11 = vsub.f32 %v4419_v29, %v7539_v48  ;;  %7747 = vst [vmem:[#allocation13_spill] sm:$0xff] %v4451_v55  ;;  %v7538_v3 = vand.u32 4294901760, %v4451_v55  ;;  %v4461_v8 = vand.u32 4294901760, %v285_v57  ;;  %v358_v19 = vsub.f32 %v4442_v51, %v357_v58  ;;  %v38_v48 = vld [vmem:[%s7529_s0 + $0x70] sm:$0xff] }
  0x25   :  { %v367_v52 = vand.u32 4294901760, %v366_v5 }
  0x26   :  { %v799_v0 = vand.u32 4294901760, %v798_v11  ;;  %7748 = vst [vmem:[#allocation14_spill] sm:$0xff] %v4461_v8  ;;  %v806_v17 = vsub.f32 %v4451_v55, %v7538_v3  ;;  %v4479_v24 = vsub.f32 %v285_v57, %v4461_v8  ;;  %v359_v36 = vand.u32 4294901760, %v358_v19  ;;  %v37_v3 = vld [vmem:[%s7529_s0 + $0x68] sm:$0xff] }
  0x27   :  { %v7536_v57 = vand.u32 4294901760, %v4504_v50 }
  0x28   :  { %344 = vmatmul.f32.gmra.mxu0 %v343_v45  ;;  %792 = vmatmul.f32.gmra.mxu2 %v791_v46  ;;  %7749 = vst [vmem:[#allocation15_spill] sm:$0xff] %v4479_v24  ;;  %v807_v42 = vand.u32 4294901760, %v806_v17  ;;  %v7537_v9 = vand.u32 4294901760, %v4479_v24  ;;  %v4501_v46 = vsub.f32 %v120_v31, %v4487_v4 }
  0x29   :  { %878 = vmatmul.f32.gmra.mxu1 %v4324_v54  ;;  %1102 = vmatmul.f32.gmra.mxu3 %v4333_v59  ;;  %v822_v16 = vsub.f32 %v4504_v50, %v7536_v57 }
  0x2a   :  { %v814_v45 = vsub.f32 %v4479_v24, %v7537_v9  ;;  %v373_v56 = vand.u32 4294901760, %v4501_v46 }
  0x2b   :  { %v823_v25 = vand.u32 4294901760, %v822_v16 }
  0x2c   :  { %v815_v11 = vand.u32 4294901760, %v814_v45  ;;  %v374_v12 = vsub.f32 %v4501_v46, %v373_v56 }
  0x2e   :  { %v375_v31 = vand.u32 4294901760, %v374_v12  ;;  %v35_v12 = vld [vmem:[%s7529_s0 + $0x58] sm:$0xff] }
  0x30   :  { %352 = vmatmul.f32.gmra.mxu0 %v351_v63  ;;  %800 = vmatmul.f32.gmra.mxu2 %v799_v0  ;;  %v4511_v63 = vand.u32 4294901760, %v123_v10  ;;  %v33_v0 = vld [vmem:[%s7529_s0 + $0x48] sm:$0xff] }
  0x31   :  { %882 = vmatmul.f32.gmra.mxu1 %v4348_v6  ;;  %1106 = vmatmul.f32.gmra.mxu3 %v4350_v7  ;;  %v126_v17 = vsel %vm97_vm1, %v33_v0, 0 }
  0x32   :  { %v4523_v19 = vsub.f32 %v123_v10, %v4511_v63  ;;  %v129_v10 = vsel %vm97_vm1, %v34_v39, 0 }
  0x33   :  { %v4544_v0 = vand.u32 4294901760, %v129_v10 }
  0x38   :  { %360 = vmatmul.f32.gmra.mxu0 %v359_v36  ;;  %808 = vmatmul.f32.gmra.mxu2 %v807_v42  ;;  %v381_v36 = vand.u32 4294901760, %v4523_v19  ;;  %v4529_v42 = vand.u32 4294901760, %v126_v17 }
  0x39   :  { %886 = vmatmul.f32.gmra.mxu1 %v4387_v33  ;;  %1110 = vmatmul.f32.gmra.mxu3 %v4389_v35 }
  0x3a   :  { %v382_v5 = vsub.f32 %v4523_v19, %v381_v36  ;;  %v4538_v45 = vsub.f32 %v126_v17, %v4529_v42  ;;  %v4554_v17 = vsub.f32 %v129_v10, %v4544_v0 }
  0x3c   :  { %v7551_v39 = vand.u32 4294901760, %v4554_v17 }
  0x3e   :  { %v398_v10 = vsub.f32 %v4554_v17, %v7551_v39 }
  0x40   :  { %368 = vmatmul.f32.gmra.mxu0 %v367_v52  ;;  %816 = vmatmul.f32.gmra.mxu2 %v815_v11  ;;  %v383_v52 = vand.u32 4294901760, %v382_v5  ;;  %v7552_v11 = vand.u32 4294901760, %v4538_v45 }
  0x41   :  { %890 = vmatmul.f32.gmra.mxu1 %v4428_v44  ;;  %1114 = vmatmul.f32.gmra.mxu3 %v4431_v49 }
  0x42   :  { %v390_v16 = vsub.f32 %v4538_v45, %v7552_v11 }
  0x48   :  { %376 = vmatmul.f32.gmra.mxu0 %v375_v31  ;;  %824 = vmatmul.f32.gmra.mxu2 %v823_v25  ;;  %v132_v31 = vsel %vm97_vm1, %v35_v12, 0  ;;  %v391_v25 = vand.u32 4294901760, %v390_v16  ;;  %v399_v16 = vand.u32 4294901760, %v398_v10 }
  0x49   :  { %894 = vmatmul.f32.gmra.mxu1 %v4458_v62  ;;  %1118 = vmatmul.f32.gmra.mxu3 %v4461_v8  ;;  %v4560_v5 = vand.u32 4294901760, %v132_v31 }
  0x4b   :  { %7752 = vst [vmem:[#allocation18_spill] sm:$0xff] %v4560_v5  ;;  %v4570_v57 = vsub.f32 %v132_v31, %v4560_v5 }
  0x4d   :  { %v7550_v9 = vand.u32 4294901760, %v4570_v57 }
  0x4f   :  { %v406_v31 = vsub.f32 %v4570_v57, %v7550_v9 }
  0x50   :  { %384 = vmatmul.f32.gmra.mxu0 %v383_v52  ;;  %1154 = vmatmul.f32.vlgmr.msrb.gmra.mxu2 %v4262_v23  ;;  %v36_v52 = vld [vmem:[%s7529_s0 + $0x60] sm:$0xff] }
  0x51   :  { %898 = vmatmul.f32.gmra.mxu1 %v4487_v4  ;;  %1122 = vmatmul.f32.gmra.mxu3 %v4489_v22  ;;  %v135_v12 = vsel %vm97_vm1, %v36_v52, 0  ;;  %v407_v52 = vand.u32 4294901760, %v406_v31 }
  0x58   :  { %392 = vmatmul.f32.gmra.mxu0 %v391_v25  ;;  %1159 = vmatmul.f32.gmra.mxu2 %v4298_v40  ;;  %v4577_v25 = vand.u32 4294901760, %v135_v12 }
  0x59   :  { %902 = vmatmul.f32.gmra.mxu1 %v4511_v63  ;;  %1497 = vmatmul.f32.vlgmr.msrb.gmra.mxu3 %v317_v30  ;;  %v138_v30 = vsel %vm97_vm1, %v37_v3, 0 }
  0x5a   :  { %7753 = vst [vmem:[#allocation19_spill] sm:$0xff] %v4577_v25  ;;  %v4587_v23 = vsub.f32 %v135_v12, %v4577_v25 }
  0x5c   :  { %v7548_v10 = vand.u32 4294901760, %v4587_v23 }
  0x5e   :  { %v414_v12 = vsub.f32 %v4587_v23, %v7548_v10 }
  0x60   :  { %400 = vmatmul.f32.gmra.mxu0 %v399_v16  ;;  %1164 = vmatmul.f32.gmra.mxu2 %v4339_v61  ;;  %v4594_v16 = vand.u32 4294901760, %v138_v30  ;;  %v415_v3 = vand.u32 4294901760, %v414_v12 }
  0x61   :  { %906 = vmatmul.f32.gmra.mxu1 %v4529_v42  ;;  %1503 = vmatmul.f32.gmra.mxu3 %v325_v47  ;;  %v141_v47 = vsel %vm97_vm1, %v38_v48, 0 }
  0x62   :  { %7754 = vst [vmem:[#allocation20_spill] sm:$0xff] %v4594_v16  ;;  %v4604_v40 = vsub.f32 %v138_v30, %v4594_v16 }
  0x64   :  { %v7547_v31 = vand.u32 4294901760, %v4604_v40 }
  0x66   :  { %v422_v30 = vsub.f32 %v4604_v40, %v7547_v31 }
  0x68   :  { %408 = vmatmul.f32.gmra.mxu0 %v407_v52  ;;  %1169 = vmatmul.f32.gmra.mxu2 %v4370_v27  ;;  %v4611_v52 = vand.u32 4294901760, %v141_v47  ;;  %v423_v48 = vand.u32 4294901760, %v422_v30 }
  0x69   :  { %910 = vmatmul.f32.gmra.mxu1 %v4544_v0  ;;  %1509 = vmatmul.f32.gmra.mxu3 %v333_v13  ;;  %v144_v13 = vsel %vm97_vm1, %v39_v41, 0 }
  0x6a   :  { %7755 = vst [vmem:[#allocation21_spill] sm:$0xff] %v4611_v52  ;;  %v4621_v61 = vsub.f32 %v141_v47, %v4611_v52 }
  0x6c   :  { %v7546_v12 = vand.u32 4294901760, %v4621_v61 }
  0x6e   :  { %v430_v47 = vsub.f32 %v4621_v61, %v7546_v12 }
  0x70   :  { %416 = vmatmul.f32.gmra.mxu0 %v415_v3  ;;  %1174 = vmatmul.f32.gmra.mxu2 %v4409_v21  ;;  %v4628_v3 = vand.u32 4294901760, %v144_v13  ;;  %v431_v41 = vand.u32 4294901760, %v430_v47 }
  0x71   :  { %914 = vmatmul.f32.gmra.mxu1 %v4560_v5  ;;  %1515 = vmatmul.f32.gmra.mxu3 %v341_v38  ;;  %v147_v38 = vsel %vm97_vm1, %v40_v14, 0  ;;  %v150_v14 = vsel %vm97_vm1, %v41_v2, 0  ;;  %v153_v2 = vsel %vm97_vm1, %v42_v34, 0 }
  0x72   :  { %7756 = vst [vmem:[#allocation22_spill] sm:$0xff] %v4628_v3  ;;  %v4638_v27 = vsub.f32 %v144_v13, %v4628_v3 }
  0x74   :  { %v7544_v30 = vand.u32 4294901760, %v4638_v27 }
  0x76   :  { %v438_v13 = vsub.f32 %v4638_v27, %v7544_v30 }
  0x78   :  { %424 = vmatmul.f32.gmra.mxu0 %v423_v48  ;;  %1179 = vmatmul.f32.gmra.mxu2 %v4442_v51  ;;  %v4645_v48 = vand.u32 4294901760, %v147_v38 }
  0x79   :  { %918 = vmatmul.f32.gmra.mxu1 %v4577_v25  ;;  %1521 = vmatmul.f32.gmra.mxu3 %v349_v43  ;;  %v439_v43 = vand.u32 4294901760, %v438_v13 }
  0x7a   :  { %7757 = vst [vmem:[#allocation23_spill] sm:$0xff] %v4645_v48  ;;  %v4655_v21 = vsub.f32 %v147_v38, %v4645_v48 }
  0x7c   :  { %v7545_v47 = vand.u32 4294901760, %v4655_v21 }
  0x7e   :  { %v446_v38 = vsub.f32 %v4655_v21, %v7545_v47  ;;  %v43_v47 = vld [vmem:[%s7529_s0 + $0x98] sm:$0xff] }
  0x80   :  { %432 = vmatmul.f32.gmra.mxu0 %v431_v41  ;;  %1184 = vmatmul.f32.gmra.mxu2 %v4473_v26  ;;  %v4662_v41 = vand.u32 4294901760, %v150_v14 }
  0x81   :  { %922 = vmatmul.f32.gmra.mxu1 %v4594_v16  ;;  %1527 = vmatmul.f32.gmra.mxu3 %v357_v58  ;;  %v447_v58 = vand.u32 4294901760, %v446_v38 }
  0x82   :  { %7758 = vst [vmem:[#allocation24_spill] sm:$0xff] %v4662_v41  ;;  %v4672_v51 = vsub.f32 %v150_v14, %v4662_v41 }
  0x84   :  { %v7549_v13 = vand.u32 4294901760, %v4672_v51 }
  0x86   :  { %v454_v26 = vsub.f32 %v4672_v51, %v7549_v13 }
  0x88   :  { %440 = vmatmul.f32.gmra.mxu0 %v439_v43  ;;  %1189 = vmatmul.f32.gmra.mxu2 %v4501_v46  ;;  %v4679_v43 = vand.u32 4294901760, %v153_v2  ;;  %v455_v38 = vand.u32 4294901760, %v454_v26  ;;  %v4710_v46 = vld [vmem:[%s7531_s2] ss:$0 sm:$0xff] }
  0x89   :  { %926 = vmatmul.f32.gmra.mxu1 %v4611_v52  ;;  %1533 = vmatmul.f32.gmra.mxu3 %v365_v37  ;;  %v156_v37 = vsel %vm97_vm1, %v43_v47, 0 }
  0x8a   :  { %7759 = vst [vmem:[#allocation25_spill] sm:$0xff] %v4679_v43  ;;  %v4691_v34 = vsub.f32 %v153_v2, %v4679_v43  ;;  %v4698_v12 = vand.u32 4294901760, %v156_v37  ;;  %v44_v2 = vld [vmem:[%s7529_s0 + $0xa0] sm:$0xff] }
  0x8b   :  { %v159_v13 = vsel %vm97_vm1, %v44_v2, 0 }
  0x8c   :  { %7760 = vst [vmem:[#allocation26_spill] sm:$0xff] %v4698_v12  ;;  %v4717_v47 = vsub.f32 %v156_v37, %v4698_v12  ;;  %v4725_v22 = vand.u32 4294901760, %v159_v13 }
  0x8d   :  { %v4681_v30 = vpop.f32.mrf.mxu0 }
  0x8e   :  { %v7564_v11 = vand.u32 4294901760, %v4717_v47  ;;  %7761 = vst [vmem:[#allocation27_spill] sm:$0xff] %v4725_v22 }
  0x90   :  { %448 = vmatmul.f32.gmra.mxu0 %v447_v58  ;;  %1194 = vmatmul.f32.gmra.mxu2 %v4523_v19  ;;  %v7555_v58 = vand.u32 4294901760, %v4691_v34  ;;  %v45_v19 = vld [vmem:[%s7529_s0 + $0xa8] sm:$0xff] }
  0x91   :  { %930 = vmatmul.f32.gmra.mxu1 %v4628_v3  ;;  %1539 = vmatmul.f32.gmra.mxu3 %v373_v56 }
  0x92   :  { %v462_v56 = vsub.f32 %v4691_v34, %v7555_v58 }
  0x93   :  { %v769_v14 = vpop.f32.mrf.mxu2 }
  0x94   :  { %v770_v26 = vadd.f32 %v4710_v46, %v769_v14  ;;  %v463_v39 = vand.u32 4294901760, %v462_v56  ;;  %v4741_v14 = vsub.f32 %v159_v13, %v4725_v22  ;;  %v7763_v56 = vand.u32 4294901760, %v4538_v45 }
  0x95   :  { %v4700_v31 = vpop.f32.mrf.mxu0 }
  0x96   :  { %v4702_v10 = vpop.f32.mrf.mxu1  ;;  %v7571_v35 = vand.u32 4294901760, %v4741_v14 }
  0x98   :  { %456 = vmatmul.f32.gmra.mxu0 %v455_v38  ;;  %1199 = vmatmul.f32.gmra.mxu2 %v4538_v45  ;;  %v478_v45 = vsub.f32 %v4741_v14, %v7571_v35 }
  0x99   :  { %934 = vmatmul.f32.gmra.mxu1 %v4645_v48  ;;  %1545 = vmatmul.f32.gmra.mxu3 %v381_v36  ;;  %v470_v36 = vsub.f32 %v4717_v47, %v7564_v11 }
  0x9b   :  { %v777_v9 = vpop.f32.mrf.mxu2  ;;  %v471_v49 = vand.u32 4294901760, %v470_v36 }
  0x9c   :  { %v1095_v38 = vpop.f32.mrf.mxu3  ;;  %v778_v2 = vadd.f32 %v4710_v46, %v777_v9  ;;  %v46_v9 = vld [vmem:[%s7529_s0 + $0xb0] sm:$0xff] }
  0x9d   :  { %v4727_v58 = vadd.f32 %v1095_v38, %v770_v26  ;;  %v4729_v37 = vpop.f32.mrf.mxu0  ;;  %v162_v26 = vsel %vm97_vm1, %v45_v19, 0 }
  0x9e   :  { %v4731_v8 = vpop.f32.mrf.mxu1  ;;  %v4749_v7 = vand.u32 4294901760, %v162_v26 }
  0x9f   :  { %7762 = vst [vmem:[#allocation28_spill] sm:$0xff] %v4727_v58 }
  0xa0   :  { %464 = vmatmul.f32.gmra.mxu0 %v463_v39  ;;  %1204 = vmatmul.f32.gmra.mxu2 %v4554_v17  ;;  %7764 = vst [vmem:[#allocation29_spill] sm:$0xff] %v4749_v7  ;;  %v4765_v19 = vsub.f32 %v162_v26, %v4749_v7 }
  0xa1   :  { %938 = vmatmul.f32.gmra.mxu1 %v4662_v41  ;;  %1551 = vmatmul.f32.gmra.mxu3 %v7763_v56  ;;  %v165_v56 = vsel %vm97_vm1, %v46_v9, 0 }
  0xa2   :  { %v7576_v53 = vand.u32 4294901760, %v4765_v19  ;;  %v4773_v20 = vand.u32 4294901760, %v165_v56 }
  0xa3   :  { %v785_v38 = vpop.f32.mrf.mxu2 }
  0xa4   :  { %v1099_v39 = vpop.f32.mrf.mxu3  ;;  %v786_v36 = vadd.f32 %v4710_v46, %v785_v38  ;;  %7767 = vst [vmem:[#allocation31_spill] sm:$0xff] %v4773_v20  ;;  %v486_v38 = vsub.f32 %v4765_v19, %v7576_v53  ;;  %v4789_v9 = vsub.f32 %v165_v56, %v4773_v20 }
  0xa5   :  { %v4751_v11 = vadd.f32 %v1099_v39, %v778_v2  ;;  %v4753_v13 = vpop.f32.mrf.mxu0  ;;  %v7766_v2 = vand.u32 4294901760, %v4554_v17  ;;  %v47_v17 = vld [vmem:[%s7529_s0 + $0xb8] sm:$0xff] }
  0xa6   :  { %v4755_v59 = vpop.f32.mrf.mxu1 }
  0xa7   :  { %7765 = vst [vmem:[#allocation30_spill] sm:$0xff] %v4751_v11  ;;  %v479_v11 = vand.u32 4294901760, %v478_v45 }
  0xa8   :  { %472 = vmatmul.f32.gmra.mxu0 %v471_v49  ;;  %1209 = vmatmul.f32.gmra.mxu2 %v4570_v57 }
  0xa9   :  { %942 = vmatmul.f32.gmra.mxu1 %v4679_v43  ;;  %1557 = vmatmul.f32.gmra.mxu3 %v7766_v2  ;;  %v168_v2 = vsel %vm97_vm1, %v47_v17, 0  ;;  %v7583_v43 = vand.u32 4294901760, %v4789_v9 }
  0xaa   :  { %v4797_v41 = vand.u32 4294901760, %v168_v2 }
  0xab   :  { %v793_v39 = vpop.f32.mrf.mxu2 }
  0xac   :  { %v1103_v49 = vpop.f32.mrf.mxu3  ;;  %v794_v45 = vadd.f32 %v4710_v46, %v793_v39  ;;  %7770 = vst [vmem:[#allocation33_spill] sm:$0xff] %v4797_v41  ;;  %v494_v39 = vsub.f32 %v4789_v9, %v7583_v43  ;;  %v4813_v17 = vsub.f32 %v168_v2, %v4797_v41 }
  0xad   :  { %v4775_v35 = vadd.f32 %v1103_v49, %v786_v36  ;;  %v4777_v26 = vpop.f32.mrf.mxu0  ;;  %v7769_v36 = vand.u32 4294901760, %v4570_v57  ;;  %v48_v57 = vld [vmem:[%s7529_s0 + $0xc0] sm:$0xff] }
  0xae   :  { %v4779_v58 = vpop.f32.mrf.mxu1 }
  0xaf   :  { %7768 = vst [vmem:[#allocation32_spill] sm:$0xff] %v4775_v35  ;;  %v487_v35 = vand.u32 4294901760, %v486_v38 }
  0xb0   :  { %480 = vmatmul.f32.gmra.mxu0 %v479_v11  ;;  %1214 = vmatmul.f32.gmra.mxu2 %v4587_v23 }
  0xb1   :  { %946 = vmatmul.f32.gmra.mxu1 %v4698_v12  ;;  %1563 = vmatmul.f32.gmra.mxu3 %v7769_v36  ;;  %v171_v36 = vsel %vm97_vm1, %v48_v57, 0  ;;  %v7590_v12 = vand.u32 4294901760, %v4813_v17 }
  0xb2   :  { %v4821_v3 = vand.u32 4294901760, %v171_v36 }
  0xb3   :  { %v801_v49 = vpop.f32.mrf.mxu2 }
  0xb4   :  { %v1107_v11 = vpop.f32.mrf.mxu3  ;;  %v802_v38 = vadd.f32 %v4710_v46, %v801_v49  ;;  %7773 = vst [vmem:[#allocation35_spill] sm:$0xff] %v4821_v3  ;;  %v502_v49 = vsub.f32 %v4813_v17, %v7590_v12  ;;  %v4837_v57 = vsub.f32 %v171_v36, %v4821_v3 }
  0xb5   :  { %v4799_v53 = vadd.f32 %v1107_v11, %v794_v45  ;;  %v4801_v56 = vpop.f32.mrf.mxu0  ;;  %v7772_v45 = vand.u32 4294901760, %v4587_v23  ;;  %v49_v23 = vld [vmem:[%s7529_s0 + $0xc8] sm:$0xff] }
  0xb6   :  { %v4803_v48 = vpop.f32.mrf.mxu1 }
  0xb7   :  { %7771 = vst [vmem:[#allocation34_spill] sm:$0xff] %v4799_v53  ;;  %v495_v53 = vand.u32 4294901760, %v494_v39 }
  0xb8   :  { %488 = vmatmul.f32.gmra.mxu0 %v487_v35  ;;  %1219 = vmatmul.f32.gmra.mxu2 %v4604_v40 }
  0xb9   :  { %950 = vmatmul.f32.gmra.mxu1 %v4725_v22  ;;  %1569 = vmatmul.f32.gmra.mxu3 %v7772_v45  ;;  %v174_v45 = vsel %vm97_vm1, %v49_v23, 0  ;;  %v7597_v22 = vand.u32 4294901760, %v4837_v57 }
  0xba   :  { %v4845_v52 = vand.u32 4294901760, %v174_v45 }
  0xbb   :  { %v809_v11 = vpop.f32.mrf.mxu2 }
  0xbc   :  { %v1111_v35 = vpop.f32.mrf.mxu3  ;;  %v810_v39 = vadd.f32 %v4710_v46, %v809_v11  ;;  %7776 = vst [vmem:[#allocation37_spill] sm:$0xff] %v4845_v52  ;;  %v510_v11 = vsub.f32 %v4837_v57, %v7597_v22  ;;  %v4861_v23 = vsub.f32 %v174_v45, %v4845_v52 }
  0xbd   :  { %v4823_v43 = vadd.f32 %v1111_v35, %v802_v38  ;;  %v4825_v2 = vpop.f32.mrf.mxu0  ;;  %v7775_v38 = vand.u32 4294901760, %v4604_v40  ;;  %v50_v40 = vld [vmem:[%s7529_s0 + $0xd0] sm:$0xff] }
  0xbe   :  { %v4827_v50 = vpop.f32.mrf.mxu1 }
  0xbf   :  { %7774 = vst [vmem:[#allocation36_spill] sm:$0xff] %v4823_v43  ;;  %v503_v43 = vand.u32 4294901760, %v502_v49 }
  0xc0   :  { %496 = vmatmul.f32.gmra.mxu0 %v495_v53  ;;  %1224 = vmatmul.f32.gmra.mxu2 %v4621_v61 }
  0xc1   :  { %954 = vmatmul.f32.gmra.mxu1 %v4749_v7  ;;  %1575 = vmatmul.f32.gmra.mxu3 %v7775_v38  ;;  %v177_v38 = vsel %vm97_vm1, %v50_v40, 0  ;;  %v7604_v7 = vand.u32 4294901760, %v4861_v23 }
  0xc2   :  { %v4869_v16 = vand.u32 4294901760, %v177_v38 }
  0xc3   :  { %v817_v35 = vpop.f32.mrf.mxu2 }
  0xc4   :  { %v1115_v53 = vpop.f32.mrf.mxu3  ;;  %v818_v49 = vadd.f32 %v4710_v46, %v817_v35  ;;  %7779 = vst [vmem:[#allocation39_spill] sm:$0xff] %v4869_v16  ;;  %v518_v35 = vsub.f32 %v4861_v23, %v7604_v7  ;;  %v4885_v40 = vsub.f32 %v177_v38, %v4869_v16  ;;  %v322_v38 = vadd.f32 %v4710_v46, %v4681_v30 }
  0xc5   :  { %v4847_v12 = vadd.f32 %v1115_v53, %v810_v39  ;;  %v4849_v36 = vpop.f32.mrf.mxu0  ;;  %v7778_v39 = vand.u32 4294901760, %v4621_v61  ;;  %v51_v61 = vld [vmem:[%s7529_s0 + $0xd8] sm:$0xff] }
  0xc6   :  { %v4851_v24 = vpop.f32.mrf.mxu1  ;;  %v872_v30 = vadd.f32 %v4702_v10, %v322_v38 }
  0xc7   :  { %7777 = vst [vmem:[#allocation38_spill] sm:$0xff] %v4847_v12  ;;  %v511_v12 = vand.u32 4294901760, %v510_v11 }
  0xc8   :  { %504 = vmatmul.f32.gmra.mxu0 %v503_v43  ;;  %1229 = vmatmul.f32.gmra.mxu2 %v4638_v27 }
  0xc9   :  { %958 = vmatmul.f32.gmra.mxu1 %v4773_v20  ;;  %1581 = vmatmul.f32.gmra.mxu3 %v7778_v39  ;;  %v180_v39 = vsel %vm97_vm1, %v51_v61, 0  ;;  %v7613_v20 = vand.u32 4294901760, %v4885_v40 }
  0xca   :  { %v4893_v25 = vand.u32 4294901760, %v180_v39 }
  0xcb   :  { %v825_v53 = vpop.f32.mrf.mxu2  ;;  %v526_v61 = vsub.f32 %v4885_v40, %v7613_v20 }
  0xcc   :  { %v1119_v43 = vpop.f32.mrf.mxu3  ;;  %v826_v11 = vadd.f32 %v4710_v46, %v825_v53  ;;  %7782 = vst [vmem:[#allocation41_spill] sm:$0xff] %v4893_v25 }
  0xcd   :  { %v4871_v22 = vadd.f32 %v1119_v43, %v818_v49  ;;  %v4873_v45 = vpop.f32.mrf.mxu0  ;;  %v7781_v49 = vand.u32 4294901760, %v4638_v27  ;;  %v52_v27 = vld [vmem:[%s7529_s0 + $0xe0] sm:$0xff]  ;;  %v527_v29 = vand.u32 4294901760, %v526_v61 }
  0xce   :  { %v4875_v55 = vpop.f32.mrf.mxu1 }
  0xcf   :  { %7780 = vst [vmem:[#allocation40_spill] sm:$0xff] %v4871_v22  ;;  %v519_v22 = vand.u32 4294901760, %v518_v35  ;;  %v4911_v35 = vsub.f32 %v180_v39, %v4893_v25  ;;  %v330_v39 = vadd.f32 %v4710_v46, %v4700_v31  ;;  %v7787_v31 = vand.u32 4294901760, %v4672_v51 }
  0xd0   :  { %512 = vmatmul.f32.gmra.mxu0 %v511_v12  ;;  %1234 = vmatmul.f32.gmra.mxu2 %v4655_v21 }
  0xd1   :  { %962 = vmatmul.f32.gmra.mxu1 %v4797_v41  ;;  %1587 = vmatmul.f32.gmra.mxu3 %v7781_v49  ;;  %v183_v49 = vsel %vm97_vm1, %v52_v27, 0  ;;  %v7616_v5 = vand.u32 4294901760, %v4911_v35 }
  0xd2   :  { %v4919_v18 = vand.u32 4294901760, %v183_v49 }
  0xd3   :  { %v1155_v43 = vpop.f32.mrf.mxu2 }
  0xd4   :  { %v1123_v12 = vpop.f32.mrf.mxu3  ;;  %7785 = vst [vmem:[#allocation43_spill] sm:$0xff] %v4919_v18  ;;  %v4937_v27 = vsub.f32 %v183_v49, %v4919_v18  ;;  %v338_v49 = vadd.f32 %v4710_v46, %v4729_v37 }
  0xd5   :  { %v4897_v7 = vadd.f32 %v1123_v12, %v826_v11  ;;  %v4899_v53 = vpop.f32.mrf.mxu0  ;;  %v7784_v11 = vand.u32 4294901760, %v4655_v21  ;;  %v1156_v12 = vadd.f32 %v1155_v43, %v872_v30  ;;  %v53_v21 = vld [vmem:[%s7529_s0 + $0xe8] sm:$0xff]  ;;  %v534_v43 = vsub.f32 %v4911_v35, %v7616_v5 }
  0xd6   :  { %v4901_v41 = vpop.f32.mrf.mxu1  ;;  %v186_v61 = vsel %vm97_vm1, %v53_v21, 0  ;;  %v880_v37 = vadd.f32 %v4755_v59, %v338_v49 }
  0xd7   :  { %7783 = vst [vmem:[#allocation42_spill] sm:$0xff] %v4897_v7 }
  0xd8   :  { %520 = vmatmul.f32.gmra.mxu0 %v519_v22  ;;  %1239 = vmatmul.f32.gmra.mxu2 %v4672_v51  ;;  %v54_v51 = vld [vmem:[%s7529_s0 + $0xf0] sm:$0xff] }
  0xd9   :  { %966 = vmatmul.f32.gmra.mxu1 %v4821_v3  ;;  %1593 = vmatmul.f32.gmra.mxu3 %v7784_v11  ;;  %v4945_v3 = vand.u32 4294901760, %v186_v61 }
  0xdb   :  { %v1160_v22 = vpop.f32.mrf.mxu2  ;;  %7788 = vst [vmem:[#allocation45_spill] sm:$0xff] %v4945_v3  ;;  %v4963_v21 = vsub.f32 %v186_v61, %v4945_v3  ;;  %v346_v61 = vadd.f32 %v4710_v46, %v4753_v13 }
  0xdc   :  { %v1498_v7 = vpop.f32.mrf.mxu3 }
  0xdd   :  { %v4923_v20 = vadd.f32 %v1498_v7, %v1156_v12  ;;  %v4925_v10 = vpop.f32.mrf.mxu0  ;;  %v876_v7 = vadd.f32 %v4731_v8, %v330_v39  ;;  %v535_v12 = vand.u32 4294901760, %v534_v43  ;;  %v7790_v43 = vand.u32 4294901760, %v4691_v34 }
  0xde   :  { %v4927_v38 = vpop.f32.mrf.mxu1  ;;  %v884_v13 = vadd.f32 %v4779_v58, %v346_v61 }
  0xdf   :  { %7786 = vst [vmem:[#allocation44_spill] sm:$0xff] %v4923_v20  ;;  %v1161_v30 = vadd.f32 %v1160_v22, %v876_v7  ;;  %v7619_v20 = vand.u32 4294901760, %v4937_v27  ;;  %v189_v7 = vsel %vm97_vm1, %v54_v51, 0 }
  0xe0   :  { %528 = vmatmul.f32.gmra.mxu0 %v527_v29  ;;  %1244 = vmatmul.f32.gmra.mxu2 %v4691_v34  ;;  %v55_v34 = vld [vmem:[%s7529_s0 + $0xf8] sm:$0xff] }
  0xe1   :  { %970 = vmatmul.f32.gmra.mxu1 %v4845_v52  ;;  %1599 = vmatmul.f32.gmra.mxu3 %v7787_v31  ;;  %v542_v22 = vsub.f32 %v4937_v27, %v7619_v20  ;;  %v4971_v52 = vand.u32 4294901760, %v189_v7 }
  0xe3   :  { %v1165_v29 = vpop.f32.mrf.mxu2  ;;  %7791 = vst [vmem:[#allocation47_spill] sm:$0xff] %v4971_v52  ;;  %v4989_v51 = vsub.f32 %v189_v7, %v4971_v52  ;;  %v354_v7 = vadd.f32 %v4710_v46, %v4777_v26 }
  0xe4   :  { %v1504_v11 = vpop.f32.mrf.mxu3  ;;  %v1166_v31 = vadd.f32 %v1165_v29, %v880_v37  ;;  %v192_v37 = vsel %vm97_vm1, %v55_v34, 0 }
  0xe5   :  { %v4949_v5 = vadd.f32 %v1504_v11, %v1161_v30  ;;  %v4951_v8 = vpop.f32.mrf.mxu0  ;;  %v888_v26 = vadd.f32 %v4803_v48, %v354_v7 }
  0xe6   :  { %v4953_v39 = vpop.f32.mrf.mxu1 }
  0xe7   :  { %7789 = vst [vmem:[#allocation46_spill] sm:$0xff] %v4949_v5  ;;  %v7622_v5 = vand.u32 4294901760, %v4963_v21 }
  0xe8   :  { %536 = vmatmul.f32.gmra.mxu0 %v535_v12  ;;  %1249 = vmatmul.f32.gmra.mxu2 %v4717_v47  ;;  %v543_v12 = vand.u32 4294901760, %v542_v22  ;;  %v7793_v22 = vand.u32 4294901760, %v4717_v47  ;;  %v56_v47 = vld [vmem:[%s7529_s0 + $0x100] sm:$0xff] }
  0xe9   :  { %974 = vmatmul.f32.gmra.mxu1 %v4869_v16  ;;  %1605 = vmatmul.f32.gmra.mxu3 %v7790_v43  ;;  %v550_v29 = vsub.f32 %v4963_v21, %v7622_v5  ;;  %v4997_v16 = vand.u32 4294901760, %v192_v37 }
  0xeb   :  { %v1170_v30 = vpop.f32.mrf.mxu2  ;;  %7794 = vst [vmem:[#allocation49_spill] sm:$0xff] %v4997_v16  ;;  %v5015_v34 = vsub.f32 %v192_v37, %v4997_v16  ;;  %v362_v37 = vadd.f32 %v4710_v46, %v4801_v56 }
  0xec   :  { %v1510_v11 = vpop.f32.mrf.mxu3  ;;  %v1171_v43 = vadd.f32 %v1170_v30, %v884_v13  ;;  %v195_v13 = vsel %vm97_vm1, %v56_v47, 0 }
  0xed   :  { %v4975_v20 = vadd.f32 %v1510_v11, %v1166_v31  ;;  %v4977_v59 = vpop.f32.mrf.mxu0  ;;  %v892_v56 = vadd.f32 %v4827_v50, %v362_v37 }
  0xee   :  { %v4979_v49 = vpop.f32.mrf.mxu1 }
  0xef   :  { %7792 = vst [vmem:[#allocation48_spill] sm:$0xff] %v4975_v20  ;;  %v7625_v20 = vand.u32 4294901760, %v4989_v51 }
  0xf0   :  { %544 = vmatmul.f32.gmra.mxu0 %v543_v12  ;;  %1254 = vmatmul.f32.gmra.mxu2 %v4741_v14  ;;  %v551_v12 = vand.u32 4294901760, %v550_v29  ;;  %v7796_v29 = vand.u32 4294901760, %v4741_v14  ;;  %v57_v14 = vld [vmem:[%s7529_s0 + $0x108] sm:$0xff] }
  0xf1   :  { %978 = vmatmul.f32.gmra.mxu1 %v4893_v25  ;;  %1611 = vmatmul.f32.gmra.mxu3 %v7793_v22  ;;  %v558_v30 = vsub.f32 %v4989_v51, %v7625_v20  ;;  %v5023_v25 = vand.u32 4294901760, %v195_v13 }
  0xf3   :  { %v1175_v31 = vpop.f32.mrf.mxu2  ;;  %7797 = vst [vmem:[#allocation51_spill] sm:$0xff] %v5023_v25  ;;  %v5041_v47 = vsub.f32 %v195_v13, %v5023_v25  ;;  %v370_v13 = vadd.f32 %v4710_v46, %v4825_v2 }
  0xf4   :  { %v1516_v11 = vpop.f32.mrf.mxu3  ;;  %v1176_v22 = vadd.f32 %v1175_v31, %v888_v26  ;;  %v198_v26 = vsel %vm97_vm1, %v57_v14, 0 }
  0xf5   :  { %v5001_v5 = vadd.f32 %v1516_v11, %v1171_v43  ;;  %v5003_v58 = vpop.f32.mrf.mxu0  ;;  %v896_v2 = vadd.f32 %v4851_v24, %v370_v13 }
  0xf6   :  { %v5005_v61 = vpop.f32.mrf.mxu1 }
  0xf7   :  { %7795 = vst [vmem:[#allocation50_spill] sm:$0xff] %v5001_v5  ;;  %v7628_v5 = vand.u32 4294901760, %v5015_v34 }
  0xf8   :  { %552 = vmatmul.f32.gmra.mxu0 %v551_v12  ;;  %1259 = vmatmul.f32.gmra.mxu2 %v4765_v19  ;;  %v559_v12 = vand.u32 4294901760, %v558_v30  ;;  %v7799_v30 = vand.u32 4294901760, %v4765_v19  ;;  %v58_v19 = vld [vmem:[%s7529_s0 + $0x110] sm:$0xff] }
  0xf9   :  { %982 = vmatmul.f32.gmra.mxu1 %v4919_v18  ;;  %1617 = vmatmul.f32.gmra.mxu3 %v7796_v29  ;;  %v566_v31 = vsub.f32 %v5015_v34, %v7628_v5  ;;  %v5049_v18 = vand.u32 4294901760, %v198_v26 }
  0xfb   :  { %v1180_v43 = vpop.f32.mrf.mxu2  ;;  %7800 = vst [vmem:[#allocation53_spill] sm:$0xff] %v5049_v18  ;;  %v5067_v14 = vsub.f32 %v198_v26, %v5049_v18  ;;  %v378_v26 = vadd.f32 %v4710_v46, %v4849_v36 }
  0xfc   :  { %v1522_v11 = vpop.f32.mrf.mxu3  ;;  %v1181_v29 = vadd.f32 %v1180_v43, %v892_v56  ;;  %v201_v56 = vsel %vm97_vm1, %v58_v19, 0 }
  0xfd   :  { %v5027_v20 = vadd.f32 %v1522_v11, %v1176_v22  ;;  %v5029_v48 = vpop.f32.mrf.mxu0  ;;  %v900_v36 = vadd.f32 %v4875_v55, %v378_v26 }
  0xfe   :  { %v5031_v7 = vpop.f32.mrf.mxu1 }
  0xff   :  { %7798 = vst [vmem:[#allocation52_spill] sm:$0xff] %v5027_v20  ;;  %v7631_v20 = vand.u32 4294901760, %v5041_v47 }
 0x100   :  { %560 = vmatmul.f32.gmra.mxu0 %v559_v12  ;;  %1264 = vmatmul.f32.gmra.mxu2 %v4789_v9  ;;  %v567_v12 = vand.u32 4294901760, %v566_v31  ;;  %v7802_v31 = vand.u32 4294901760, %v4789_v9  ;;  %v59_v9 = vld [vmem:[%s7529_s0 + $0x118] sm:$0xff] }
 0x101   :  { %986 = vmatmul.f32.gmra.mxu1 %v4945_v3  ;;  %1623 = vmatmul.f32.gmra.mxu3 %v7799_v30  ;;  %v574_v43 = vsub.f32 %v5041_v47, %v7631_v20  ;;  %v5075_v3 = vand.u32 4294901760, %v201_v56 }
 0x103   :  { %v1185_v22 = vpop.f32.mrf.mxu2  ;;  %7803 = vst [vmem:[#allocation55_spill] sm:$0xff] %v5075_v3  ;;  %v5093_v19 = vsub.f32 %v201_v56, %v5075_v3  ;;  %v386_v56 = vadd.f32 %v4710_v46, %v4873_v45 }
 0x104   :  { %v1528_v11 = vpop.f32.mrf.mxu3  ;;  %v1186_v30 = vadd.f32 %v1185_v22, %v896_v2  ;;  %v204_v2 = vsel %vm97_vm1, %v59_v9, 0 }
 0x105   :  { %v5053_v5 = vadd.f32 %v1528_v11, %v1181_v29  ;;  %v5055_v50 = vpop.f32.mrf.mxu0  ;;  %v904_v45 = vadd.f32 %v4901_v41, %v386_v56 }
 0x106   :  { %v5057_v37 = vpop.f32.mrf.mxu1 }
 0x107   :  { %7801 = vst [vmem:[#allocation54_spill] sm:$0xff] %v5053_v5  ;;  %v7634_v5 = vand.u32 4294901760, %v5067_v14 }
 0x108   :  { %568 = vmatmul.f32.gmra.mxu0 %v567_v12  ;;  %1269 = vmatmul.f32.gmra.mxu2 %v4813_v17  ;;  %v575_v12 = vand.u32 4294901760, %v574_v43  ;;  %v7805_v43 = vand.u32 4294901760, %v4813_v17  ;;  %v60_v17 = vld [vmem:[%s7529_s0 + $0x120] sm:$0xff] }
 0x109   :  { %990 = vmatmul.f32.gmra.mxu1 %v4971_v52  ;;  %1629 = vmatmul.f32.gmra.mxu3 %v7802_v31  ;;  %v582_v22 = vsub.f32 %v5067_v14, %v7634_v5  ;;  %v5101_v52 = vand.u32 4294901760, %v204_v2 }
 0x10b   :  { %v1190_v29 = vpop.f32.mrf.mxu2  ;;  %7806 = vst [vmem:[#allocation57_spill] sm:$0xff] %v5101_v52  ;;  %v5119_v9 = vsub.f32 %v204_v2, %v5101_v52  ;;  %v394_v2 = vadd.f32 %v4710_v46, %v4899_v53 }
 0x10c   :  { %v1534_v11 = vpop.f32.mrf.mxu3  ;;  %v1191_v31 = vadd.f32 %v1190_v29, %v900_v36  ;;  %v207_v36 = vsel %vm97_vm1, %v60_v17, 0 }
 0x10d   :  { %v5079_v20 = vadd.f32 %v1534_v11, %v1186_v30  ;;  %v5081_v24 = vpop.f32.mrf.mxu0  ;;  %v908_v53 = vadd.f32 %v4927_v38, %v394_v2 }
 0x10e   :  { %v5083_v13 = vpop.f32.mrf.mxu1 }
 0x10f   :  { %7804 = vst [vmem:[#allocation56_spill] sm:$0xff] %v5079_v20  ;;  %v7637_v20 = vand.u32 4294901760, %v5093_v19 }
 0x110   :  { %576 = vmatmul.f32.gmra.mxu0 %v575_v12  ;;  %1274 = vmatmul.f32.gmra.mxu2 %v4837_v57  ;;  %v583_v12 = vand.u32 4294901760, %v582_v22  ;;  %v7808_v22 = vand.u32 4294901760, %v4837_v57  ;;  %v61_v57 = vld [vmem:[%s7529_s0 + $0x128] sm:$0xff] }
 0x111   :  { %994 = vmatmul.f32.gmra.mxu1 %v4997_v16  ;;  %1635 = vmatmul.f32.gmra.mxu3 %v7805_v43  ;;  %v590_v29 = vsub.f32 %v5093_v19, %v7637_v20  ;;  %v5127_v16 = vand.u32 4294901760, %v207_v36 }
 0x113   :  { %v1195_v30 = vpop.f32.mrf.mxu2  ;;  %7809 = vst [vmem:[#allocation59_spill] sm:$0xff] %v5127_v16  ;;  %v5145_v17 = vsub.f32 %v207_v36, %v5127_v16  ;;  %v402_v36 = vadd.f32 %v4710_v46, %v4925_v10 }
 0x114   :  { %v1540_v11 = vpop.f32.mrf.mxu3  ;;  %v1196_v43 = vadd.f32 %v1195_v30, %v904_v45  ;;  %v210_v45 = vsel %vm97_vm1, %v61_v57, 0 }
 0x115   :  { %v5105_v5 = vadd.f32 %v1540_v11, %v1191_v31  ;;  %v5107_v55 = vpop.f32.mrf.mxu0  ;;  %v912_v10 = vadd.f32 %v4953_v39, %v402_v36 }
 0x116   :  { %v5109_v26 = vpop.f32.mrf.mxu1 }
 0x117   :  { %7807 = vst [vmem:[#allocation58_spill] sm:$0xff] %v5105_v5  ;;  %v7640_v5 = vand.u32 4294901760, %v5119_v9 }
 0x118   :  { %584 = vmatmul.f32.gmra.mxu0 %v583_v12  ;;  %1279 = vmatmul.f32.gmra.mxu2 %v4861_v23  ;;  %v591_v12 = vand.u32 4294901760, %v590_v29  ;;  %v7811_v29 = vand.u32 4294901760, %v4861_v23  ;;  %v62_v23 = vld [vmem:[%s7529_s0 + $0x130] sm:$0xff] }
 0x119   :  { %998 = vmatmul.f32.gmra.mxu1 %v5023_v25  ;;  %1641 = vmatmul.f32.gmra.mxu3 %v7808_v22  ;;  %v598_v30 = vsub.f32 %v5119_v9, %v7640_v5  ;;  %v7643_v25 = vand.u32 4294901760, %v5145_v17 }
 0x11b   :  { %v1200_v31 = vpop.f32.mrf.mxu2 }
 0x11c   :  { %v1546_v11 = vpop.f32.mrf.mxu3  ;;  %v1201_v22 = vadd.f32 %v1200_v31, %v908_v53  ;;  %v606_v31 = vsub.f32 %v5145_v17, %v7643_v25  ;;  %v213_v53 = vsel %vm97_vm1, %v62_v23, 0 }
 0x11d   :  { %v5131_v20 = vadd.f32 %v1546_v11, %v1196_v43  ;;  %v5133_v41 = vpop.f32.mrf.mxu0 }
 0x11e   :  { %v5135_v56 = vpop.f32.mrf.mxu1 }
 0x11f   :  { %7810 = vst [vmem:[#allocation60_spill] sm:$0xff] %v5131_v20  ;;  %v5153_v20 = vand.u32 4294901760, %v210_v45 }
 0x120   :  { %592 = vmatmul.f32.gmra.mxu0 %v591_v12  ;;  %1284 = vmatmul.f32.gmra.mxu2 %v4885_v40  ;;  %v599_v12 = vand.u32 4294901760, %v598_v30  ;;  %v7814_v30 = vand.u32 4294901760, %v4885_v40  ;;  %v63_v40 = vld [vmem:[%s7529_s0 + $0x138] sm:$0xff] }
 0x121   :  { %1002 = vmatmul.f32.gmra.mxu1 %v5049_v18  ;;  %1647 = vmatmul.f32.gmra.mxu3 %v7811_v29  ;;  %7812 = vst [vmem:[#allocation61_spill] sm:$0xff] %v5153_v20  ;;  %v5171_v57 = vsub.f32 %v210_v45, %v5153_v20  ;;  %v410_v45 = vadd.f32 %v4710_v46, %v4951_v8 }
 0x123   :  { %v1205_v43 = vpop.f32.mrf.mxu2  ;;  %v7646_v18 = vand.u32 4294901760, %v5171_v57  ;;  %v916_v8 = vadd.f32 %v4979_v49, %v410_v45 }
 0x124   :  { %v1552_v11 = vpop.f32.mrf.mxu3  ;;  %v1206_v29 = vadd.f32 %v1205_v43, %v912_v10  ;;  %v216_v10 = vsel %vm97_vm1, %v63_v40, 0 }
 0x125   :  { %v5157_v5 = vadd.f32 %v1552_v11, %v1201_v22  ;;  %v5159_v38 = vpop.f32.mrf.mxu0  ;;  %v614_v43 = vsub.f32 %v5171_v57, %v7646_v18 }
 0x126   :  { %v5161_v2 = vpop.f32.mrf.mxu1 }
 0x127   :  { %7813 = vst [vmem:[#allocation62_spill] sm:$0xff] %v5157_v5  ;;  %v5179_v5 = vand.u32 4294901760, %v213_v53 }
 0x128   :  { %600 = vmatmul.f32.gmra.mxu0 %v599_v12  ;;  %1289 = vmatmul.f32.gmra.mxu2 %v4911_v35  ;;  %v607_v12 = vand.u32 4294901760, %v606_v31  ;;  %v7817_v31 = vand.u32 4294901760, %v4911_v35  ;;  %v64_v35 = vld [vmem:[%s7529_s0 + $0x140] sm:$0xff] }
 0x129   :  { %1006 = vmatmul.f32.gmra.mxu1 %v5075_v3  ;;  %1653 = vmatmul.f32.gmra.mxu3 %v7814_v30  ;;  %7815 = vst [vmem:[#allocation63_spill] sm:$0xff] %v5179_v5  ;;  %v5197_v23 = vsub.f32 %v213_v53, %v5179_v5  ;;  %v418_v53 = vadd.f32 %v4710_v46, %v4977_v59 }
 0x12b   :  { %v1210_v22 = vpop.f32.mrf.mxu2  ;;  %v7649_v3 = vand.u32 4294901760, %v5197_v23  ;;  %v920_v59 = vadd.f32 %v5005_v61, %v418_v53 }
 0x12c   :  { %v1558_v11 = vpop.f32.mrf.mxu3  ;;  %v1211_v30 = vadd.f32 %v1210_v22, %v916_v8  ;;  %v219_v8 = vsel %vm97_vm1, %v64_v35, 0 }
 0x12d   :  { %v5183_v25 = vadd.f32 %v1558_v11, %v1206_v29  ;;  %v5185_v39 = vpop.f32.mrf.mxu0  ;;  %v622_v22 = vsub.f32 %v5197_v23, %v7649_v3 }
 0x12e   :  { %v5187_v36 = vpop.f32.mrf.mxu1 }
 0x12f   :  { %7816 = vst [vmem:[#allocation64_spill] sm:$0xff] %v5183_v25  ;;  %v5205_v25 = vand.u32 4294901760, %v216_v10 }
 0x130   :  { %608 = vmatmul.f32.gmra.mxu0 %v607_v12  ;;  %1294 = vmatmul.f32.gmra.mxu2 %v4937_v27  ;;  %v615_v12 = vand.u32 4294901760, %v614_v43  ;;  %v7820_v43 = vand.u32 4294901760, %v4937_v27  ;;  %v65_v27 = vld [vmem:[%s7529_s0 + $0x148] sm:$0xff] }
 0x131   :  { %1010 = vmatmul.f32.gmra.mxu1 %v5101_v52  ;;  %1659 = vmatmul.f32.gmra.mxu3 %v7817_v31  ;;  %7818 = vst [vmem:[#allocation65_spill] sm:$0xff] %v5205_v25  ;;  %v5223_v40 = vsub.f32 %v216_v10, %v5205_v25  ;;  %v426_v10 = vadd.f32 %v4710_v46, %v5003_v58 }
 0x133   :  { %v1215_v29 = vpop.f32.mrf.mxu2  ;;  %v7652_v52 = vand.u32 4294901760, %v5223_v40  ;;  %v924_v58 = vadd.f32 %v5031_v7, %v426_v10 }
 0x134   :  { %v1564_v11 = vpop.f32.mrf.mxu3  ;;  %v1216_v31 = vadd.f32 %v1215_v29, %v920_v59  ;;  %v222_v59 = vsel %vm97_vm1, %v65_v27, 0 }
 0x135   :  { %v5209_v18 = vadd.f32 %v1564_v11, %v1211_v30  ;;  %v5211_v49 = vpop.f32.mrf.mxu0  ;;  %v630_v29 = vsub.f32 %v5223_v40, %v7652_v52 }
 0x136   :  { %v5213_v45 = vpop.f32.mrf.mxu1 }
 0x137   :  { %7819 = vst [vmem:[#allocation66_spill] sm:$0xff] %v5209_v18  ;;  %v5231_v18 = vand.u32 4294901760, %v219_v8 }
 0x138   :  { %616 = vmatmul.f32.gmra.mxu0 %v615_v12  ;;  %1299 = vmatmul.f32.gmra.mxu2 %v4963_v21  ;;  %v623_v12 = vand.u32 4294901760, %v622_v22  ;;  %v7823_v22 = vand.u32 4294901760, %v4963_v21  ;;  %v66_v21 = vld [vmem:[%s7529_s0 + $0x150] sm:$0xff] }
 0x139   :  { %1014 = vmatmul.f32.gmra.mxu1 %v5127_v16  ;;  %1665 = vmatmul.f32.gmra.mxu3 %v7820_v43  ;;  %7821 = vst [vmem:[#allocation67_spill] sm:$0xff] %v5231_v18  ;;  %v5249_v35 = vsub.f32 %v219_v8, %v5231_v18  ;;  %v434_v8 = vadd.f32 %v4710_v46, %v5029_v48 }
 0x13b   :  { %v1220_v30 = vpop.f32.mrf.mxu2  ;;  %v7655_v16 = vand.u32 4294901760, %v5249_v35  ;;  %v928_v48 = vadd.f32 %v5057_v37, %v434_v8 }
 0x13c   :  { %v1570_v11 = vpop.f32.mrf.mxu3  ;;  %v1221_v43 = vadd.f32 %v1220_v30, %v924_v58  ;;  %v225_v58 = vsel %vm97_vm1, %v66_v21, 0 }
 0x13d   :  { %v5235_v3 = vadd.f32 %v1570_v11, %v1216_v31  ;;  %v5237_v61 = vpop.f32.mrf.mxu0  ;;  %v638_v30 = vsub.f32 %v5249_v35, %v7655_v16 }
 0x13e   :  { %v5239_v53 = vpop.f32.mrf.mxu1 }
 0x13f   :  { %7822 = vst [vmem:[#allocation68_spill] sm:$0xff] %v5235_v3  ;;  %v5257_v3 = vand.u32 4294901760, %v222_v59 }
 0x140   :  { %624 = vmatmul.f32.gmra.mxu0 %v623_v12  ;;  %1304 = vmatmul.f32.gmra.mxu2 %v4989_v51  ;;  %v631_v12 = vand.u32 4294901760, %v630_v29  ;;  %v7826_v29 = vand.u32 4294901760, %v4989_v51  ;;  %v67_v51 = vld [vmem:[%s7529_s0 + $0x158] sm:$0xff] }
 0x141   :  { %1018 = vmatmul.f32.gmra.mxu1 %v5153_v20  ;;  %1671 = vmatmul.f32.gmra.mxu3 %v7823_v22  ;;  %7824 = vst [vmem:[#allocation69_spill] sm:$0xff] %v5257_v3  ;;  %v5275_v27 = vsub.f32 %v222_v59, %v5257_v3  ;;  %v442_v59 = vadd.f32 %v4710_v46, %v5055_v50 }
 0x143   :  { %v1225_v31 = vpop.f32.mrf.mxu2  ;;  %v7658_v20 = vand.u32 4294901760, %v5275_v27  ;;  %v932_v50 = vadd.f32 %v5083_v13, %v442_v59 }
 0x144   :  { %v1576_v11 = vpop.f32.mrf.mxu3  ;;  %v1226_v22 = vadd.f32 %v1225_v31, %v928_v48  ;;  %v228_v48 = vsel %vm97_vm1, %v67_v51, 0 }
 0x145   :  { %v5261_v52 = vadd.f32 %v1576_v11, %v1221_v43  ;;  %v5263_v7 = vpop.f32.mrf.mxu0  ;;  %v646_v31 = vsub.f32 %v5275_v27, %v7658_v20 }
 0x146   :  { %v5265_v10 = vpop.f32.mrf.mxu1 }
 0x147   :  { %7825 = vst [vmem:[#allocation70_spill] sm:$0xff] %v5261_v52  ;;  %v5283_v52 = vand.u32 4294901760, %v225_v58 }
 0x148   :  { %632 = vmatmul.f32.gmra.mxu0 %v631_v12  ;;  %1309 = vmatmul.f32.gmra.mxu2 %v5015_v34  ;;  %v639_v12 = vand.u32 4294901760, %v638_v30  ;;  %v7829_v30 = vand.u32 4294901760, %v5015_v34  ;;  %v68_v34 = vld [vmem:[%s7529_s0 + $0x160] sm:$0xff] }
 0x149   :  { %1022 = vmatmul.f32.gmra.mxu1 %v5179_v5  ;;  %1677 = vmatmul.f32.gmra.mxu3 %v7826_v29  ;;  %7827 = vst [vmem:[#allocation71_spill] sm:$0xff] %v5283_v52  ;;  %v5301_v21 = vsub.f32 %v225_v58, %v5283_v52  ;;  %v450_v58 = vadd.f32 %v4710_v46, %v5081_v24 }
 0x14b   :  { %v1230_v43 = vpop.f32.mrf.mxu2  ;;  %v7661_v5 = vand.u32 4294901760, %v5301_v21  ;;  %v936_v24 = vadd.f32 %v5109_v26, %v450_v58 }
 0x14c   :  { %v1582_v11 = vpop.f32.mrf.mxu3  ;;  %v1231_v29 = vadd.f32 %v1230_v43, %v932_v50  ;;  %v231_v50 = vsel %vm97_vm1, %v68_v34, 0 }
 0x14d   :  { %v5287_v16 = vadd.f32 %v1582_v11, %v1226_v22  ;;  %v5289_v37 = vpop.f32.mrf.mxu0  ;;  %v654_v43 = vsub.f32 %v5301_v21, %v7661_v5 }
 0x14e   :  { %v5291_v8 = vpop.f32.mrf.mxu1 }
 0x14f   :  { %7828 = vst [vmem:[#allocation72_spill] sm:$0xff] %v5287_v16  ;;  %v5309_v16 = vand.u32 4294901760, %v228_v48 }
 0x150   :  { %640 = vmatmul.f32.gmra.mxu0 %v639_v12  ;;  %1314 = vmatmul.f32.gmra.mxu2 %v5041_v47  ;;  %v647_v12 = vand.u32 4294901760, %v646_v31  ;;  %v7832_v31 = vand.u32 4294901760, %v5041_v47  ;;  %v69_v47 = vld [vmem:[%s7529_s0 + $0x168] sm:$0xff] }
 0x151   :  { %1026 = vmatmul.f32.gmra.mxu1 %v5205_v25  ;;  %1683 = vmatmul.f32.gmra.mxu3 %v7829_v30  ;;  %7830 = vst [vmem:[#allocation73_spill] sm:$0xff] %v5309_v16  ;;  %v5327_v51 = vsub.f32 %v228_v48, %v5309_v16  ;;  %v458_v48 = vadd.f32 %v4710_v46, %v5107_v55 }
 0x153   :  { %v1235_v22 = vpop.f32.mrf.mxu2  ;;  %v7664_v25 = vand.u32 4294901760, %v5327_v51  ;;  %v940_v55 = vadd.f32 %v5135_v56, %v458_v48 }
 0x154   :  { %v1588_v11 = vpop.f32.mrf.mxu3  ;;  %v1236_v30 = vadd.f32 %v1235_v22, %v936_v24  ;;  %v234_v24 = vsel %vm97_vm1, %v69_v47, 0 }
 0x155   :  { %v5313_v20 = vadd.f32 %v1588_v11, %v1231_v29  ;;  %v5315_v13 = vpop.f32.mrf.mxu0  ;;  %v662_v22 = vsub.f32 %v5327_v51, %v7664_v25 }
 0x156   :  { %v5317_v59 = vpop.f32.mrf.mxu1 }
 0x157   :  { %7831 = vst [vmem:[#allocation74_spill] sm:$0xff] %v5313_v20  ;;  %v5335_v20 = vand.u32 4294901760, %v231_v50 }
 0x158   :  { %648 = vmatmul.f32.gmra.mxu0 %v647_v12  ;;  %1319 = vmatmul.f32.gmra.mxu2 %v5067_v14  ;;  %v655_v12 = vand.u32 4294901760, %v654_v43  ;;  %v7835_v43 = vand.u32 4294901760, %v5067_v14  ;;  %v70_v14 = vld [vmem:[%s7529_s0 + $0x170] sm:$0xff] }
 0x159   :  { %1030 = vmatmul.f32.gmra.mxu1 %v5231_v18  ;;  %1689 = vmatmul.f32.gmra.mxu3 %v7832_v31  ;;  %7833 = vst [vmem:[#allocation75_spill] sm:$0xff] %v5335_v20  ;;  %v5353_v34 = vsub.f32 %v231_v50, %v5335_v20  ;;  %v5361_v18 = vand.u32 4294901760, %v234_v24  ;;  %v466_v50 = vadd.f32 %v4710_v46, %v5133_v41 }
 0x15b   :  { %v1240_v29 = vpop.f32.mrf.mxu2  ;;  %7836 = vst [vmem:[#allocation77_spill] sm:$0xff] %v5361_v18  ;;  %v5379_v47 = vsub.f32 %v234_v24, %v5361_v18  ;;  %v944_v41 = vadd.f32 %v5161_v2, %v466_v50  ;;  %v474_v24 = vadd.f32 %v4710_v46, %v5159_v38  ;;  %v7841_v38 = vand.u32 4294901760, %v5119_v9 }
 0x15c   :  { %v1594_v11 = vpop.f32.mrf.mxu3  ;;  %v1241_v31 = vadd.f32 %v1240_v29, %v940_v55  ;;  %v237_v55 = vsel %vm97_vm1, %v70_v14, 0 }
 0x15d   :  { %v5339_v5 = vadd.f32 %v1594_v11, %v1236_v30  ;;  %v5341_v26 = vpop.f32.mrf.mxu0  ;;  %v948_v46 = vadd.f32 %v5187_v36, %v474_v24 }
 0x15e   :  { %v5343_v58 = vpop.f32.mrf.mxu1 }
 0x15f   :  { %7834 = vst [vmem:[#allocation76_spill] sm:$0xff] %v5339_v5  ;;  %v7667_v5 = vand.u32 4294901760, %v5353_v34 }
 0x160   :  { %656 = vmatmul.f32.gmra.mxu0 %v655_v12  ;;  %1324 = vmatmul.f32.gmra.mxu2 %v5093_v19  ;;  %v663_v12 = vand.u32 4294901760, %v662_v22  ;;  %v7838_v22 = vand.u32 4294901760, %v5093_v19  ;;  %v71_v19 = vld [vmem:[%s7529_s0 + $0x178] sm:$0xff] }
 0x161   :  { %1034 = vmatmul.f32.gmra.mxu1 %v5257_v3  ;;  %1695 = vmatmul.f32.gmra.mxu3 %v7835_v43  ;;  %v670_v29 = vsub.f32 %v5353_v34, %v7667_v5  ;;  %v5387_v3 = vand.u32 4294901760, %v237_v55 }
 0x163   :  { %v1245_v30 = vpop.f32.mrf.mxu2  ;;  %7839 = vst [vmem:[#allocation79_spill] sm:$0xff] %v5387_v3  ;;  %v5405_v14 = vsub.f32 %v237_v55, %v5387_v3  ;;  %v5418_v55 = vld [vmem:[%s7531_s2] ss:$0 sm:$0xff] }
 0x164   :  { %v1600_v11 = vpop.f32.mrf.mxu3  ;;  %v1246_v43 = vadd.f32 %v1245_v30, %v944_v41  ;;  %v482_v36 = vadd.f32 %v5418_v55, %v5185_v39 }
 0x165   :  { %v5365_v25 = vadd.f32 %v1600_v11, %v1241_v31  ;;  %v5367_v56 = vpop.f32.mrf.mxu0 }
 0x166   :  { %v5369_v48 = vpop.f32.mrf.mxu1  ;;  %v952_v39 = vadd.f32 %v5213_v45, %v482_v36 }
 0x167   :  { %7837 = vst [vmem:[#allocation78_spill] sm:$0xff] %v5365_v25  ;;  %v7668_v25 = vand.u32 4294901760, %v5379_v47 }
 0x168   :  { %664 = vmatmul.f32.gmra.mxu0 %v663_v12  ;;  %1329 = vmatmul.f32.gmra.mxu2 %v5119_v9  ;;  %v671_v12 = vand.u32 4294901760, %v670_v29  ;;  %v240_v29 = vsel %vm97_vm1, %v71_v19, 0  ;;  %v72_v19 = vld [vmem:[%s7529_s0 + $0x180] sm:$0xff] }
 0x169   :  { %1038 = vmatmul.f32.gmra.mxu1 %v5283_v52  ;;  %1701 = vmatmul.f32.gmra.mxu3 %v7838_v22  ;;  %v678_v30 = vsub.f32 %v5379_v47, %v7668_v25 }
 0x16b   :  { %v1250_v31 = vpop.f32.mrf.mxu2 }
 0x16c   :  { %v1606_v11 = vpop.f32.mrf.mxu3  ;;  %v1251_v41 = vadd.f32 %v1250_v31, %v948_v46 }
 0x16d   :  { %v5391_v5 = vadd.f32 %v1606_v11, %v1246_v43  ;;  %v5393_v2 = vpop.f32.mrf.mxu0  ;;  %v679_v11 = vand.u32 4294901760, %v678_v30 }
 0x16e   :  { %v5395_v50 = vpop.f32.mrf.mxu1 }
 0x16f   :  { %7840 = vst [vmem:[#allocation80_spill] sm:$0xff] %v5391_v5  ;;  %v5413_v5 = vand.u32 4294901760, %v240_v29 }
 0x170   :  { %672 = vmatmul.f32.gmra.mxu0 %v671_v12  ;;  %1334 = vmatmul.f32.gmra.mxu2 %v5145_v17  ;;  %v7673_v12 = vand.u32 4294901760, %v5405_v14 }
 0x171   :  { %1042 = vmatmul.f32.gmra.mxu1 %v5309_v16  ;;  %1707 = vmatmul.f32.gmra.mxu3 %v7841_v38  ;;  %7842 = vst [vmem:[#allocation81_spill] sm:$0xff] %v5413_v5  ;;  %v5436_v46 = vsub.f32 %v240_v29, %v5413_v5  ;;  %v7844_v38 = vand.u32 4294901760, %v5145_v17  ;;  %v490_v29 = vadd.f32 %v5418_v55, %v5211_v49  ;;  %v73_v17 = vld [vmem:[%s7529_s0 + $0x188] sm:$0xff]  ;;  %v7847_v49 = vand.u32 4294901760, %v5171_v57 }
 0x172   :  { %v686_v30 = vsub.f32 %v5405_v14, %v7673_v12 }
 0x173   :  { %v1255_v22 = vpop.f32.mrf.mxu2  ;;  %v7676_v16 = vand.u32 4294901760, %v5436_v46 }
 0x174   :  { %v1612_v43 = vpop.f32.mrf.mxu3 }
 0x175   :  { %v5422_v9 = vadd.f32 %v1612_v43, %v1251_v41  ;;  %v5424_v24 = vpop.f32.mrf.mxu0  ;;  %v243_v41 = vsel %vm97_vm1, %v72_v19, 0  ;;  %v1256_v43 = vadd.f32 %v1255_v22, %v952_v39  ;;  %v694_v22 = vsub.f32 %v5436_v46, %v7676_v16 }
 0x176   :  { %v5426_v31 = vpop.f32.mrf.mxu1  ;;  %v5444_v52 = vand.u32 4294901760, %v243_v41 }
 0x177   :  { %7843 = vst [vmem:[#allocation82_spill] sm:$0xff] %v5422_v9  ;;  %v687_v9 = vand.u32 4294901760, %v686_v30  ;;  %v246_v30 = vsel %vm97_vm1, %v73_v17, 0 }
 0x178   :  { %680 = vmatmul.f32.gmra.mxu0 %v679_v11  ;;  %1339 = vmatmul.f32.gmra.mxu2 %v5171_v57  ;;  %7845 = vst [vmem:[#allocation83_spill] sm:$0xff] %v5444_v52  ;;  %v5462_v19 = vsub.f32 %v243_v41, %v5444_v52  ;;  %v498_v41 = vadd.f32 %v5418_v55, %v5237_v61  ;;  %v74_v57 = vld [vmem:[%s7529_s0 + $0x190] sm:$0xff] }
 0x179   :  { %1046 = vmatmul.f32.gmra.mxu1 %v5335_v20  ;;  %1713 = vmatmul.f32.gmra.mxu3 %v7844_v38  ;;  %v5470_v20 = vand.u32 4294901760, %v246_v30 }
 0x17a   :  { %v960_v61 = vadd.f32 %v5265_v10, %v498_v41 }
 0x17b   :  { %v1260_v11 = vpop.f32.mrf.mxu2  ;;  %7848 = vst [vmem:[#allocation85_spill] sm:$0xff] %v5470_v20  ;;  %v5488_v17 = vsub.f32 %v246_v30, %v5470_v20  ;;  %v506_v30 = vadd.f32 %v5418_v55, %v5263_v7 }
 0x17c   :  { %v1618_v25 = vpop.f32.mrf.mxu3 }
 0x17d   :  { %v5448_v12 = vadd.f32 %v1618_v25, %v1256_v43  ;;  %v5450_v45 = vpop.f32.mrf.mxu0  ;;  %v956_v25 = vadd.f32 %v5239_v53, %v490_v29  ;;  %v695_v43 = vand.u32 4294901760, %v694_v22  ;;  %v7850_v22 = vand.u32 4294901760, %v5197_v23 }
 0x17e   :  { %v5452_v36 = vpop.f32.mrf.mxu1  ;;  %v964_v7 = vadd.f32 %v5291_v8, %v506_v30 }
 0x17f   :  { %7846 = vst [vmem:[#allocation84_spill] sm:$0xff] %v5448_v12  ;;  %v1261_v39 = vadd.f32 %v1260_v11, %v956_v25  ;;  %v7679_v12 = vand.u32 4294901760, %v5462_v19  ;;  %v249_v25 = vsel %vm97_vm1, %v74_v57, 0 }
 0x180   :  { %688 = vmatmul.f32.gmra.mxu0 %v687_v9  ;;  %1344 = vmatmul.f32.gmra.mxu2 %v5197_v23  ;;  %v75_v23 = vld [vmem:[%s7529_s0 + $0x198] sm:$0xff] }
 0x181   :  { %1050 = vmatmul.f32.gmra.mxu1 %v5361_v18  ;;  %1719 = vmatmul.f32.gmra.mxu3 %v7847_v49  ;;  %v702_v11 = vsub.f32 %v5462_v19, %v7679_v12  ;;  %v5496_v18 = vand.u32 4294901760, %v249_v25 }
 0x183   :  { %v1265_v9 = vpop.f32.mrf.mxu2  ;;  %7851 = vst [vmem:[#allocation87_spill] sm:$0xff] %v5496_v18  ;;  %v5514_v57 = vsub.f32 %v249_v25, %v5496_v18  ;;  %v514_v25 = vadd.f32 %v5418_v55, %v5289_v37 }
 0x184   :  { %v1624_v38 = vpop.f32.mrf.mxu3  ;;  %v1266_v49 = vadd.f32 %v1265_v9, %v960_v61  ;;  %v252_v61 = vsel %vm97_vm1, %v75_v23, 0 }
 0x185   :  { %v5474_v16 = vadd.f32 %v1624_v38, %v1261_v39  ;;  %v5476_v53 = vpop.f32.mrf.mxu0  ;;  %v968_v37 = vadd.f32 %v5317_v59, %v514_v25 }
 0x186   :  { %v5478_v29 = vpop.f32.mrf.mxu1 }
 0x187   :  { %7849 = vst [vmem:[#allocation86_spill] sm:$0xff] %v5474_v16  ;;  %v7682_v16 = vand.u32 4294901760, %v5488_v17 }
 0x188   :  { %696 = vmatmul.f32.gmra.mxu0 %v695_v43  ;;  %1349 = vmatmul.f32.gmra.mxu2 %v5223_v40  ;;  %v703_v43 = vand.u32 4294901760, %v702_v11  ;;  %v7853_v11 = vand.u32 4294901760, %v5223_v40  ;;  %v76_v40 = vld [vmem:[%s7529_s0 + $0x1a0] sm:$0xff] }
 0x189   :  { %1054 = vmatmul.f32.gmra.mxu1 %v5387_v3  ;;  %1725 = vmatmul.f32.gmra.mxu3 %v7850_v22  ;;  %v710_v9 = vsub.f32 %v5488_v17, %v7682_v16  ;;  %v5522_v3 = vand.u32 4294901760, %v252_v61 }
 0x18b   :  { %v1270_v39 = vpop.f32.mrf.mxu2  ;;  %7854 = vst [vmem:[#allocation89_spill] sm:$0xff] %v5522_v3  ;;  %v5540_v23 = vsub.f32 %v252_v61, %v5522_v3  ;;  %v522_v61 = vadd.f32 %v5418_v55, %v5315_v13 }
 0x18c   :  { %v1630_v38 = vpop.f32.mrf.mxu3  ;;  %v1271_v22 = vadd.f32 %v1270_v39, %v964_v7  ;;  %v255_v7 = vsel %vm97_vm1, %v76_v40, 0 }
 0x18d   :  { %v5500_v12 = vadd.f32 %v1630_v38, %v1266_v49  ;;  %v5502_v10 = vpop.f32.mrf.mxu0  ;;  %v972_v13 = vadd.f32 %v5343_v58, %v522_v61 }
 0x18e   :  { %v5504_v41 = vpop.f32.mrf.mxu1 }
 0x18f   :  { %7852 = vst [vmem:[#allocation88_spill] sm:$0xff] %v5500_v12  ;;  %v7685_v12 = vand.u32 4294901760, %v5514_v57 }
 0x190   :  { %704 = vmatmul.f32.gmra.mxu0 %v703_v43  ;;  %1354 = vmatmul.f32.gmra.mxu2 %v5249_v35  ;;  %v711_v43 = vand.u32 4294901760, %v710_v9  ;;  %v7856_v9 = vand.u32 4294901760, %v5249_v35  ;;  %v77_v35 = vld [vmem:[%s7529_s0 + $0x1a8] sm:$0xff] }
 0x191   :  { %1058 = vmatmul.f32.gmra.mxu1 %v5413_v5  ;;  %1731 = vmatmul.f32.gmra.mxu3 %v7853_v11  ;;  %v718_v39 = vsub.f32 %v5514_v57, %v7685_v12  ;;  %v5548_v5 = vand.u32 4294901760, %v255_v7 }
 0x193   :  { %v1275_v49 = vpop.f32.mrf.mxu2  ;;  %v5566_v40 = vsub.f32 %v255_v7, %v5548_v5  ;;  %v530_v7 = vadd.f32 %v5418_v55, %v5341_v26 }
 0x194   :  { %v1636_v38 = vpop.f32.mrf.mxu3  ;;  %v1276_v11 = vadd.f32 %v1275_v49, %v968_v37  ;;  %v258_v37 = vsel %vm97_vm1, %v77_v35, 0 }
 0x195   :  { %v5526_v16 = vadd.f32 %v1636_v38, %v1271_v22  ;;  %v5528_v8 = vpop.f32.mrf.mxu0  ;;  %v976_v26 = vadd.f32 %v5369_v48, %v530_v7 }
 0x196   :  { %v5530_v30 = vpop.f32.mrf.mxu1 }
 0x197   :  { %7855 = vst [vmem:[#allocation90_spill] sm:$0xff] %v5526_v16  ;;  %v7688_v16 = vand.u32 4294901760, %v5540_v23 }
 0x198   :  { %712 = vmatmul.f32.gmra.mxu0 %v711_v43  ;;  %1359 = vmatmul.f32.gmra.mxu2 %v5275_v27  ;;  %v719_v43 = vand.u32 4294901760, %v718_v39  ;;  %v7858_v39 = vand.u32 4294901760, %v5275_v27  ;;  %v78_v27 = vld [vmem:[%s7529_s0 + $0x1b0] sm:$0xff] }
 0x199   :  { %1062 = vmatmul.f32.gmra.mxu1 %v5444_v52  ;;  %1737 = vmatmul.f32.gmra.mxu3 %v7856_v9  ;;  %v726_v49 = vsub.f32 %v5540_v23, %v7688_v16  ;;  %v7691_v52 = vand.u32 4294901760, %v5566_v40 }
 0x19b   :  { %v1280_v22 = vpop.f32.mrf.mxu2 }
 0x19c   :  { %v1642_v38 = vpop.f32.mrf.mxu3  ;;  %v1281_v9 = vadd.f32 %v1280_v22, %v972_v13  ;;  %v734_v22 = vsub.f32 %v5566_v40, %v7691_v52  ;;  %v261_v13 = vsel %vm97_vm1, %v78_v27, 0 }
 0x19d   :  { %v5552_v12 = vadd.f32 %v1642_v38, %v1276_v11  ;;  %v5554_v59 = vpop.f32.mrf.mxu0 }
 0x19e   :  { %v5556_v25 = vpop.f32.mrf.mxu1 }
 0x19f   :  { %7857 = vst [vmem:[#allocation91_spill] sm:$0xff] %v5552_v12  ;;  %v5574_v12 = vand.u32 4294901760, %v258_v37 }
 0x1a0   :  { %720 = vmatmul.f32.gmra.mxu0 %v719_v43  ;;  %1364 = vmatmul.f32.gmra.mxu2 %v5301_v21  ;;  %v727_v43 = vand.u32 4294901760, %v726_v49  ;;  %v7861_v49 = vand.u32 4294901760, %v5301_v21  ;;  %v79_v21 = vld [vmem:[%s7529_s0 + $0x1b8] sm:$0xff] }
 0x1a1   :  { %1066 = vmatmul.f32.gmra.mxu1 %v5470_v20  ;;  %1743 = vmatmul.f32.gmra.mxu3 %v7858_v39  ;;  %7859 = vst [vmem:[#allocation92_spill] sm:$0xff] %v5574_v12  ;;  %v5592_v35 = vsub.f32 %v258_v37, %v5574_v12  ;;  %v538_v37 = vadd.f32 %v5418_v55, %v5367_v56 }
 0x1a3   :  { %v1285_v11 = vpop.f32.mrf.mxu2  ;;  %v7694_v20 = vand.u32 4294901760, %v5592_v35  ;;  %v980_v56 = vadd.f32 %v5395_v50, %v538_v37 }
 0x1a4   :  { %v1648_v38 = vpop.f32.mrf.mxu3  ;;  %v1286_v39 = vadd.f32 %v1285_v11, %v976_v26  ;;  %v264_v26 = vsel %vm97_vm1, %v79_v21, 0 }
 0x1a5   :  { %v5578_v16 = vadd.f32 %v1648_v38, %v1281_v9  ;;  %v5580_v58 = vpop.f32.mrf.mxu0  ;;  %v742_v11 = vsub.f32 %v5592_v35, %v7694_v20 }
 0x1a6   :  { %v5582_v61 = vpop.f32.mrf.mxu1 }
 0x1a7   :  { %7860 = vst [vmem:[#allocation93_spill] sm:$0xff] %v5578_v16  ;;  %v5600_v16 = vand.u32 4294901760, %v261_v13 }
 0x1a8   :  { %728 = vmatmul.f32.gmra.mxu0 %v727_v43  ;;  %1369 = vmatmul.f32.gmra.mxu2 %v5327_v51  ;;  %v735_v43 = vand.u32 4294901760, %v734_v22  ;;  %v7864_v22 = vand.u32 4294901760, %v5327_v51 }
 0x1a9   :  { %1070 = vmatmul.f32.gmra.mxu1 %v5496_v18  ;;  %1749 = vmatmul.f32.gmra.mxu3 %v7861_v49  ;;  %7862 = vst [vmem:[#allocation94_spill] sm:$0xff] %v5600_v16  ;;  %v5618_v27 = vsub.f32 %v261_v13, %v5600_v16  ;;  %v546_v13 = vadd.f32 %v5418_v55, %v5393_v2  ;;  %v7866_v2 = vand.u32 4294901760, %v5353_v34 }
 0x1ab   :  { %v1290_v9 = vpop.f32.mrf.mxu2  ;;  %v7695_v18 = vand.u32 4294901760, %v5618_v27  ;;  %v984_v21 = vadd.f32 %v5426_v31, %v546_v13 }
 0x1ac   :  { %v1654_v38 = vpop.f32.mrf.mxu3  ;;  %v1291_v49 = vadd.f32 %v1290_v9, %v980_v56 }
 0x1ad   :  { %v5604_v52 = vadd.f32 %v1654_v38, %v1286_v39  ;;  %v5606_v48 = vpop.f32.mrf.mxu0  ;;  %v750_v51 = vsub.f32 %v5618_v27, %v7695_v18 }
 0x1ae   :  { %v5608_v7 = vpop.f32.mrf.mxu1 }
 0x1af   :  { %7863 = vst [vmem:[#allocation95_spill] sm:$0xff] %v5604_v52  ;;  %v5626_v52 = vand.u32 4294901760, %v264_v26 }
 0x1b0   :  { %736 = vmatmul.f32.gmra.mxu0 %v735_v43  ;;  %1374 = vmatmul.f32.gmra.mxu2 %v5353_v34  ;;  %v743_v43 = vand.u32 4294901760, %v742_v11 }
 0x1b1   :  { %1074 = vmatmul.f32.gmra.mxu1 %v5522_v3  ;;  %1755 = vmatmul.f32.gmra.mxu3 %v7864_v22  ;;  %7865 = vst [vmem:[#allocation96_spill] sm:$0xff] %v5626_v52  ;;  %v5641_v9 = vsub.f32 %v264_v26, %v5626_v52 }
 0x1b3   :  { %v1295_v39 = vpop.f32.mrf.mxu2 }
 0x1b4   :  { %v1660_v38 = vpop.f32.mrf.mxu3  ;;  %v1296_v11 = vadd.f32 %v1295_v39, %v984_v21  ;;  %v7867_v39 = vand.u32 4294901760, %v5379_v47 }
 0x1b5   :  { %v5630_v20 = vadd.f32 %v1660_v38, %v1291_v49  ;;  %v5632_v50 = vpop.f32.mrf.mxu0  ;;  %v751_v49 = vand.u32 4294901760, %v750_v51  ;;  %v757_v38 = vand.u32 4294901760, %v5641_v9 }
 0x1b6   :  { %v5634_v37 = vpop.f32.mrf.mxu1 }
 0x1b7   :  { %v758_v34 = vsub.f32 %v5641_v9, %v757_v38 }
 0x1b8   :  { %744 = vmatmul.f32.gmra.mxu0 %v743_v43  ;;  %1379 = vmatmul.f32.gmra.mxu2 %v5379_v47  ;;  %v554_v43 = vadd.f32 %v5418_v55, %v5424_v24  ;;  %v7868_v47 = vand.u32 4294901760, %v5405_v14 }
 0x1b9   :  { %1078 = vmatmul.f32.gmra.mxu1 %v5548_v5  ;;  %1761 = vmatmul.f32.gmra.mxu3 %v7866_v2  ;;  %v759_v21 = vand.u32 4294901760, %v758_v34  ;;  %v562_v2 = vadd.f32 %v5418_v55, %v5450_v45  ;;  %v570_v45 = vadd.f32 %v5418_v55, %v5476_v53 }
 0x1ba   :  { %v988_v31 = vadd.f32 %v5452_v36, %v554_v43 }
 0x1bb   :  { %v1300_v56 = vpop.f32.mrf.mxu2  ;;  %v992_v36 = vadd.f32 %v5478_v29, %v562_v2  ;;  %v996_v29 = vadd.f32 %v5504_v41, %v570_v45 }
 0x1bc   :  { %v1666_v22 = vpop.f32.mrf.mxu3  ;;  %v1301_v24 = vadd.f32 %v1300_v56, %v988_v31 }
 0x1bd   :  { %v5650_v18 = vadd.f32 %v1666_v22, %v1296_v11  ;;  %v5652_v26 = vpop.f32.mrf.mxu0 }
 0x1be   :  { %v5654_v3 = vpop.f32.mrf.mxu1 }
 0x1c0   :  { %752 = vmatmul.f32.gmra.mxu0 %v751_v49  ;;  %1384 = vmatmul.f32.gmra.mxu2 %v5405_v14  ;;  %v7870_v14 = vand.u32 4294901760, %v5436_v46 }
 0x1c1   :  { %1082 = vmatmul.f32.gmra.mxu1 %v5574_v12  ;;  %1767 = vmatmul.f32.gmra.mxu3 %v7867_v39 }
 0x1c3   :  { %v1305_v13 = vpop.f32.mrf.mxu2 }
 0x1c4   :  { %v1672_v51 = vpop.f32.mrf.mxu3  ;;  %v1306_v56 = vadd.f32 %v1305_v13, %v992_v36 }
 0x1c5   :  { %v5666_v11 = vadd.f32 %v1672_v51, %v1301_v24  ;;  %v5668_v22 = vpop.f32.mrf.mxu0 }
 0x1c6   :  { %v5670_v49 = vpop.f32.mrf.mxu1 }
 0x1c8   :  { %760 = vmatmul.f32.gmra.mxu0 %v759_v21  ;;  %1389 = vmatmul.f32.gmra.mxu2 %v5436_v46  ;;  %v578_v21 = vadd.f32 %v5418_v55, %v5502_v10  ;;  %v7873_v46 = vand.u32 4294901760, %v5462_v19 }
 0x1c9   :  { %1086 = vmatmul.f32.gmra.mxu1 %v5600_v16  ;;  %1773 = vmatmul.f32.gmra.mxu3 %v7868_v47 }
 0x1ca   :  { %v1000_v41 = vadd.f32 %v5530_v30, %v578_v21 }
 0x1cb   :  { %v1310_v43 = vpop.f32.mrf.mxu2 }
 0x1cc   :  { %v1678_v34 = vpop.f32.mrf.mxu3  ;;  %v1311_v13 = vadd.f32 %v1310_v43, %v996_v29 }
 0x1cd   :  { %v5679_v31 = vadd.f32 %v1678_v34, %v1306_v56  ;;  %v5681_v39 = vpop.f32.mrf.mxu0  ;;  %v586_v34 = vadd.f32 %v5418_v55, %v5528_v8 }
 0x1ce   :  { %7869 = vst [vmem:[#allocation97_spill] sm:$0xff] %v5681_v39  ;;  %v5683_v24 = vpop.f32.mrf.mxu1 }
 0x1d0   :  { %1394 = vmatmul.f32.gmra.mxu2 %v5462_v19  ;;  %1911 = vmatmul.f32.vlgmr.msrb.gmra.mxu0 %v4239_v15  ;;  %v1004_v19 = vadd.f32 %v5556_v25, %v586_v34 }
 0x1d1   :  { %1090 = vmatmul.f32.gmra.mxu1 %v5626_v52  ;;  %1779 = vmatmul.f32.gmra.mxu3 %v7870_v14 }
 0x1d3   :  { %v1315_v51 = vpop.f32.mrf.mxu2 }
 0x1d4   :  { %v1684_v53 = vpop.f32.mrf.mxu3  ;;  %v1316_v56 = vadd.f32 %v1315_v51, %v1000_v41  ;;  %v594_v51 = vadd.f32 %v5418_v55, %v5554_v59 }
 0x1d5   :  { %v5693_v2 = vadd.f32 %v1684_v53, %v1311_v13  ;;  %v5695_v36 = vpop.f32.mrf.mxu0 }
 0x1d6   :  { %7871 = vst [vmem:[#allocation98_spill] sm:$0xff] %v5695_v36  ;;  %v5697_v47 = vpop.f32.mrf.mxu1 }
 0x1d7   :  { %7872 = vst [vmem:[#allocation99_spill] sm:$0xff] %v5697_v47 }
 0x1d8   :  { %1399 = vmatmul.f32.gmra.mxu2 %v5488_v17  ;;  %1915 = vmatmul.f32.gmra.mxu0 %v4278_v32 }
 0x1d9   :  { %1785 = vmatmul.f32.gmra.mxu3 %v7873_v46  ;;  %2189 = vmatmul.f32.vlgmr.msrb.gmra.mxu1 %v4239_v15  ;;  %v7877_v15 = vand.u32 4294901760, %v5488_v17  ;;  %v1008_v17 = vadd.f32 %v5582_v61, %v594_v51 }
 0x1db   :  { %v1320_v43 = vpop.f32.mrf.mxu2 }
 0x1dc   :  { %v1690_v10 = vpop.f32.mrf.mxu3  ;;  %v1321_v30 = vadd.f32 %v1320_v43, %v1004_v19 }
 0x1dd   :  { %v5707_v45 = vadd.f32 %v1690_v10, %v1316_v56  ;;  %v5709_v29 = vpop.f32.mrf.mxu0  ;;  %v602_v56 = vadd.f32 %v5418_v55, %v5580_v58 }
 0x1de   :  { %7875 = vst [vmem:[#allocation101_spill] sm:$0xff] %v5709_v29  ;;  %v5711_v14 = vpop.f32.mrf.mxu1 }
 0x1df   :  { %7874 = vst [vmem:[#allocation100_spill] sm:$0xff] %v5707_v45 }
 0x1e0   :  { %7876 = vst [vmem:[#allocation102_spill] sm:$0xff] %v5711_v14  ;;  %1404 = vmatmul.f32.gmra.mxu2 %v5514_v57  ;;  %1919 = vmatmul.f32.gmra.mxu0 %v4324_v54  ;;  %v7973_v14 = vld [vmem:[#allocation28_spill] sm:$0xff] }
 0x1e1   :  { %1791 = vmatmul.f32.gmra.mxu3 %v7877_v15  ;;  %2193 = vmatmul.f32.gmra.mxu1 %v4278_v32  ;;  %v7881_v32 = vand.u32 4294901760, %v5514_v57  ;;  %v1012_v57 = vadd.f32 %v5608_v7, %v602_v56  ;;  %v610_v15 = vadd.f32 %v5418_v55, %v5606_v48  ;;  %v626_v56 = vadd.f32 %v5418_v55, %v5652_v26 }
 0x1e3   :  { %v1325_v13 = vpop.f32.mrf.mxu2 }
 0x1e4   :  { %v1696_v8 = vpop.f32.mrf.mxu3  ;;  %v1326_v25 = vadd.f32 %v1325_v13, %v1008_v17  ;;  %v618_v17 = vadd.f32 %v5418_v55, %v5632_v50 }
 0x1e5   :  { %v5721_v53 = vadd.f32 %v1696_v8, %v1321_v30  ;;  %v5723_v21 = vpop.f32.mrf.mxu0 }
 0x1e6   :  { %7879 = vst [vmem:[#allocation104_spill] sm:$0xff] %v5723_v21  ;;  %v5725_v41 = vpop.f32.mrf.mxu1 }
 0x1e7   :  { %7878 = vst [vmem:[#allocation103_spill] sm:$0xff] %v5721_v53 }
 0x1e8   :  { %7880 = vst [vmem:[#allocation105_spill] sm:$0xff] %v5725_v41  ;;  %1409 = vmatmul.f32.gmra.mxu2 %v5540_v23  ;;  %1923 = vmatmul.f32.gmra.mxu0 %v4348_v6 }
 0x1e9   :  { %1797 = vmatmul.f32.gmra.mxu3 %v7881_v32  ;;  %2197 = vmatmul.f32.gmra.mxu1 %v4324_v54  ;;  %v7885_v54 = vand.u32 4294901760, %v5540_v23  ;;  %v1016_v23 = vadd.f32 %v5634_v37, %v610_v15 }
 0x1eb   :  { %v1330_v46 = vpop.f32.mrf.mxu2 }
 0x1ec   :  { %v1702_v59 = vpop.f32.mrf.mxu3  ;;  %v1331_v61 = vadd.f32 %v1330_v46, %v1012_v57 }
 0x1ed   :  { %v5735_v43 = vadd.f32 %v1702_v59, %v1326_v25  ;;  %v5737_v10 = vpop.f32.mrf.mxu0 }
 0x1ee   :  { %7883 = vst [vmem:[#allocation107_spill] sm:$0xff] %v5737_v10  ;;  %v5739_v34 = vpop.f32.mrf.mxu1 }
 0x1ef   :  { %7882 = vst [vmem:[#allocation106_spill] sm:$0xff] %v5735_v43  ;;  %v7947_v43 = vld [vmem:[#allocation23_spill] sm:$0xff] }
 0x1f0   :  { %7884 = vst [vmem:[#allocation108_spill] sm:$0xff] %v5739_v34  ;;  %1414 = vmatmul.f32.gmra.mxu2 %v5566_v40  ;;  %1927 = vmatmul.f32.gmra.mxu0 %v4387_v33 }
 0x1f1   :  { %1803 = vmatmul.f32.gmra.mxu3 %v7885_v54  ;;  %2201 = vmatmul.f32.gmra.mxu1 %v4348_v6  ;;  %v7889_v6 = vand.u32 4294901760, %v5566_v40  ;;  %v1020_v40 = vadd.f32 %v5654_v3, %v618_v17  ;;  %v1024_v3 = vadd.f32 %v5670_v49, %v626_v56  ;;  %v7917_v56 = vand.u32 4294901760, %v4344_v1 }
 0x1f3   :  { %v1335_v19 = vpop.f32.mrf.mxu2 }
 0x1f4   :  { %v1708_v58 = vpop.f32.mrf.mxu3  ;;  %v1336_v7 = vadd.f32 %v1335_v19, %v1016_v23 }
 0x1f5   :  { %v5749_v30 = vadd.f32 %v1708_v58, %v1331_v61  ;;  %v5751_v13 = vpop.f32.mrf.mxu0  ;;  %v634_v58 = vadd.f32 %v5418_v55, %v5668_v22 }
 0x1f6   :  { %7887 = vst [vmem:[#allocation110_spill] sm:$0xff] %v5751_v13  ;;  %v5753_v8 = vpop.f32.mrf.mxu1 }
 0x1f7   :  { %7886 = vst [vmem:[#allocation109_spill] sm:$0xff] %v5749_v30 }
 0x1f8   :  { %7888 = vst [vmem:[#allocation111_spill] sm:$0xff] %v5753_v8  ;;  %1419 = vmatmul.f32.gmra.mxu2 %v5592_v35  ;;  %1931 = vmatmul.f32.gmra.mxu0 %v4428_v44 }
 0x1f9   :  { %1809 = vmatmul.f32.gmra.mxu3 %v7889_v6  ;;  %2205 = vmatmul.f32.gmra.mxu1 %v4387_v33  ;;  %v7893_v33 = vand.u32 4294901760, %v5592_v35 }
 0x1fb   :  { %v1340_v51 = vpop.f32.mrf.mxu2 }
 0x1fc   :  { %v1714_v48 = vpop.f32.mrf.mxu3  ;;  %v1341_v37 = vadd.f32 %v1340_v51, %v1020_v40  ;;  %v7910_v40 = vand.u32 4294901760, %v4336_v60 }
 0x1fd   :  { %v5763_v32 = vadd.f32 %v1714_v48, %v1336_v7  ;;  %v5765_v25 = vpop.f32.mrf.mxu0 }
 0x1fe   :  { %7891 = vst [vmem:[#allocation113_spill] sm:$0xff] %v5765_v25  ;;  %v5767_v46 = vpop.f32.mrf.mxu1 }
 0x1ff   :  { %7890 = vst [vmem:[#allocation112_spill] sm:$0xff] %v5763_v32  ;;  %v7951_v32 = vld [vmem:[#allocation24_spill] sm:$0xff] }
 0x200   :  { %7892 = vst [vmem:[#allocation114_spill] sm:$0xff] %v5767_v46  ;;  %1424 = vmatmul.f32.gmra.mxu2 %v5618_v27  ;;  %1935 = vmatmul.f32.gmra.mxu0 %v4458_v62 }
 0x201   :  { %1815 = vmatmul.f32.gmra.mxu3 %v7893_v33  ;;  %2209 = vmatmul.f32.gmra.mxu1 %v4428_v44  ;;  %v7897_v44 = vand.u32 4294901760, %v5618_v27  ;;  %v1028_v27 = vadd.f32 %v5683_v24, %v634_v58  ;;  %v7905_v24 = vand.u32 4294901760, %v4271_v28 }
 0x203   :  { %v1345_v59 = vpop.f32.mrf.mxu2 }
 0x204   :  { %v1720_v50 = vpop.f32.mrf.mxu3  ;;  %v1346_v35 = vadd.f32 %v1345_v59, %v1024_v3  ;;  %v7915_v59 = vld [vmem:[#allocation9_spill] sm:$0xff] }
 0x205   :  { %v5777_v57 = vadd.f32 %v1720_v50, %v1341_v37  ;;  %v5779_v54 = vpop.f32.mrf.mxu0  ;;  %v7916_v50 = vld [vmem:[#allocation18_spill] sm:$0xff] }
 0x206   :  { %7895 = vst [vmem:[#allocation116_spill] sm:$0xff] %v5779_v54  ;;  %v5781_v61 = vpop.f32.mrf.mxu1 }
 0x207   :  { %7894 = vst [vmem:[#allocation115_spill] sm:$0xff] %v5777_v57 }
 0x208   :  { %7896 = vst [vmem:[#allocation117_spill] sm:$0xff] %v5781_v61  ;;  %1429 = vmatmul.f32.gmra.mxu2 %v5641_v9  ;;  %1939 = vmatmul.f32.gmra.mxu0 %v4487_v4  ;;  %v7987_v61 = vld [vmem:[#allocation64_spill] sm:$0xff] }
 0x209   :  { %1821 = vmatmul.f32.gmra.mxu3 %v7897_v44  ;;  %2213 = vmatmul.f32.gmra.mxu1 %v4458_v62 }
 0x20b   :  { %v1350_v19 = vpop.f32.mrf.mxu2 }
 0x20c   :  { %v1726_v26 = vpop.f32.mrf.mxu3  ;;  %v1351_v62 = vadd.f32 %v1350_v19, %v1028_v27  ;;  %v7923_v19 = vld [vmem:[#allocation19_spill] sm:$0xff] }
 0x20d   :  { %v5791_v15 = vadd.f32 %v1726_v26, %v1346_v35  ;;  %v5793_v23 = vpop.f32.mrf.mxu0  ;;  %v7922_v35 = vld [vmem:[#allocation11_spill] sm:$0xff]  ;;  %v7924_v26 = vand.u32 4294901760, %v7915_v59 }
 0x20e   :  { %7899 = vst [vmem:[#allocation119_spill] sm:$0xff] %v5793_v23  ;;  %v5795_v6 = vpop.f32.mrf.mxu1  ;;  %v7971_v23 = vld [vmem:[#allocation60_spill] sm:$0xff] }
 0x20f   :  { %7898 = vst [vmem:[#allocation118_spill] sm:$0xff] %v5791_v15 }
 0x210   :  { %7900 = vst [vmem:[#allocation120_spill] sm:$0xff] %v5795_v6  ;;  %1434 = vmatmul.f32.gmra.mxu2 %v4271_v28  ;;  %1943 = vmatmul.f32.gmra.mxu0 %v4511_v63 }
 0x211   :  { %1827 = vmatmul.f32.gmra.mxu3 %v757_v38  ;;  %2217 = vmatmul.f32.gmra.mxu1 %v4487_v4 }
 0x213   :  { %v5803_v49 = vpop.f32.mrf.mxu2 }
 0x214   :  { %7901 = vst [vmem:[#allocation121_spill] sm:$0xff] %v5803_v49  ;;  %v1732_v22 = vpop.f32.mrf.mxu3 }
 0x215   :  { %v5805_v7 = vadd.f32 %v1732_v22, %v1351_v62  ;;  %v5807_v51 = vpop.f32.mrf.mxu0  ;;  %v7929_v62 = vld [vmem:[#allocation13_spill] sm:$0xff]  ;;  %v7930_v22 = vld [vmem:[#allocation20_spill] sm:$0xff] }
 0x216   :  { %7903 = vst [vmem:[#allocation123_spill] sm:$0xff] %v5807_v51  ;;  %v5809_v48 = vpop.f32.mrf.mxu1 }
 0x217   :  { %7902 = vst [vmem:[#allocation122_spill] sm:$0xff] %v5805_v7 }
 0x218   :  { %7904 = vst [vmem:[#allocation124_spill] sm:$0xff] %v5809_v48  ;;  %1439 = vmatmul.f32.gmra.mxu2 %v4336_v60  ;;  %1947 = vmatmul.f32.gmra.mxu0 %v4529_v42 }
 0x219   :  { %1833 = vmatmul.f32.gmra.mxu3 %v7905_v24  ;;  %2221 = vmatmul.f32.gmra.mxu1 %v4511_v63  ;;  %v7931_v24 = vand.u32 4294901760, %v7922_v35 }
 0x21b   :  { %v5816_v4 = vpop.f32.mrf.mxu2 }
 0x21c   :  { %7906 = vst [vmem:[#allocation125_spill] sm:$0xff] %v5816_v4  ;;  %v5818_v9 = vpop.f32.mrf.mxu3 }
 0x21d   :  { %7907 = vst [vmem:[#allocation126_spill] sm:$0xff] %v5818_v9  ;;  %v5820_v38 = vpop.f32.mrf.mxu0 }
 0x21e   :  { %7908 = vst [vmem:[#allocation127_spill] sm:$0xff] %v5820_v38  ;;  %v5822_v17 = vpop.f32.mrf.mxu1 }
 0x21f   :  { %7909 = vst [vmem:[#allocation128_spill] sm:$0xff] %v5822_v17 }
 0x220   :  { %1444 = vmatmul.f32.gmra.mxu2 %v4344_v1  ;;  %1951 = vmatmul.f32.gmra.mxu0 %v4544_v0 }
 0x221   :  { %1839 = vmatmul.f32.gmra.mxu3 %v7910_v40  ;;  %2225 = vmatmul.f32.gmra.mxu1 %v4529_v42 }
 0x223   :  { %v5829_v28 = vpop.f32.mrf.mxu2 }
 0x224   :  { %7911 = vst [vmem:[#allocation129_spill] sm:$0xff] %v5829_v28  ;;  %v5831_v63 = vpop.f32.mrf.mxu3 }
 0x225   :  { %7912 = vst [vmem:[#allocation130_spill] sm:$0xff] %v5831_v63  ;;  %v5833_v33 = vpop.f32.mrf.mxu0 }
 0x226   :  { %7913 = vst [vmem:[#allocation131_spill] sm:$0xff] %v5833_v33  ;;  %v5835_v37 = vpop.f32.mrf.mxu1 }
 0x227   :  { %7914 = vst [vmem:[#allocation132_spill] sm:$0xff] %v5835_v37 }
 0x228   :  { %1449 = vmatmul.f32.gmra.mxu2 %v7915_v59  ;;  %1955 = vmatmul.f32.gmra.mxu0 %v7916_v50 }
 0x229   :  { %1845 = vmatmul.f32.gmra.mxu3 %v7917_v56  ;;  %2229 = vmatmul.f32.gmra.mxu1 %v4544_v0 }
 0x22b   :  { %v5842_v60 = vpop.f32.mrf.mxu2 }
 0x22c   :  { %7918 = vst [vmem:[#allocation9_spill] sm:$0xff] %v5842_v60  ;;  %v5844_v42 = vpop.f32.mrf.mxu3 }
 0x22d   :  { %7919 = vst [vmem:[#allocation18_spill] sm:$0xff] %v5844_v42  ;;  %v5846_v3 = vpop.f32.mrf.mxu0 }
 0x22e   :  { %7920 = vst [vmem:[#allocation133_spill] sm:$0xff] %v5846_v3  ;;  %v5848_v44 = vpop.f32.mrf.mxu1 }
 0x22f   :  { %7921 = vst [vmem:[#allocation134_spill] sm:$0xff] %v5848_v44  ;;  %v7942_v44 = vld [vmem:[#allocation17_spill] sm:$0xff] }
 0x230   :  { %1454 = vmatmul.f32.gmra.mxu2 %v7922_v35  ;;  %1959 = vmatmul.f32.gmra.mxu0 %v7923_v19 }
 0x231   :  { %1851 = vmatmul.f32.gmra.mxu3 %v7924_v26  ;;  %2233 = vmatmul.f32.gmra.mxu1 %v7916_v50  ;;  %v7936_v26 = vld [vmem:[#allocation15_spill] sm:$0xff] }
 0x233   :  { %v5855_v1 = vpop.f32.mrf.mxu2 }
 0x234   :  { %7925 = vst [vmem:[#allocation11_spill] sm:$0xff] %v5855_v1  ;;  %v5857_v0 = vpop.f32.mrf.mxu3 }
 0x235   :  { %7926 = vst [vmem:[#allocation19_spill] sm:$0xff] %v5857_v0  ;;  %v5859_v58 = vpop.f32.mrf.mxu0 }
 0x236   :  { %7927 = vst [vmem:[#allocation135_spill] sm:$0xff] %v5859_v58  ;;  %v5861_v27 = vpop.f32.mrf.mxu1  ;;  %v7937_v58 = vld [vmem:[#allocation21_spill] sm:$0xff] }
 0x237   :  { %7928 = vst [vmem:[#allocation136_spill] sm:$0xff] %v5861_v27  ;;  %v7938_v27 = vand.u32 4294901760, %v7929_v62 }
 0x238   :  { %1459 = vmatmul.f32.gmra.mxu2 %v7929_v62  ;;  %1963 = vmatmul.f32.gmra.mxu0 %v7930_v22 }
 0x239   :  { %1857 = vmatmul.f32.gmra.mxu3 %v7931_v24  ;;  %2237 = vmatmul.f32.gmra.mxu1 %v7923_v19 }
 0x23b   :  { %v5868_v40 = vpop.f32.mrf.mxu2 }
 0x23c   :  { %7932 = vst [vmem:[#allocation13_spill] sm:$0xff] %v5868_v40  ;;  %v5870_v59 = vpop.f32.mrf.mxu3 }
 0x23d   :  { %7933 = vst [vmem:[#allocation20_spill] sm:$0xff] %v5870_v59  ;;  %v5872_v50 = vpop.f32.mrf.mxu0 }
 0x23e   :  { %7934 = vst [vmem:[#allocation137_spill] sm:$0xff] %v5872_v50  ;;  %v5874_v56 = vpop.f32.mrf.mxu1  ;;  %v7943_v50 = vld [vmem:[#allocation22_spill] sm:$0xff] }
 0x23f   :  { %7935 = vst [vmem:[#allocation138_spill] sm:$0xff] %v5874_v56  ;;  %v7944_v56 = vand.u32 4294901760, %v7936_v26 }
 0x240   :  { %1464 = vmatmul.f32.gmra.mxu2 %v7936_v26  ;;  %1967 = vmatmul.f32.gmra.mxu0 %v7937_v58 }
 0x241   :  { %1863 = vmatmul.f32.gmra.mxu3 %v7938_v27  ;;  %2241 = vmatmul.f32.gmra.mxu1 %v7930_v22 }
 0x243   :  { %v5881_v35 = vpop.f32.mrf.mxu2 }
 0x244   :  { %7939 = vst [vmem:[#allocation15_spill] sm:$0xff] %v5881_v35  ;;  %v5883_v19 = vpop.f32.mrf.mxu3  ;;  %v7985_v35 = vld [vmem:[#allocation49_spill] sm:$0xff] }
 0x245   :  { %7940 = vst [vmem:[#allocation21_spill] sm:$0xff] %v5883_v19  ;;  %v761_v24 = vpop.f32.mrf.mxu0 }
 0x246   :  { %v5885_v3 = vpop.f32.mrf.mxu1  ;;  %v762_v4 = vadd.f32 %v5418_v55, %v761_v24  ;;  %v7975_v24 = vld [vmem:[#allocation37_spill] sm:$0xff] }
 0x247   :  { %7941 = vst [vmem:[#allocation139_spill] sm:$0xff] %v5885_v3  ;;  %v7948_v3 = vand.u32 4294901760, %v7942_v44 }
 0x248   :  { %1469 = vmatmul.f32.gmra.mxu2 %v7942_v44  ;;  %1971 = vmatmul.f32.gmra.mxu0 %v7943_v50 }
 0x249   :  { %1869 = vmatmul.f32.gmra.mxu3 %v7944_v56  ;;  %2245 = vmatmul.f32.gmra.mxu1 %v7937_v58 }
 0x24b   :  { %v5892_v62 = vpop.f32.mrf.mxu2 }
 0x24c   :  { %7945 = vst [vmem:[#allocation17_spill] sm:$0xff] %v5892_v62  ;;  %v5894_v27 = vpop.f32.mrf.mxu3 }
 0x24d   :  { %7946 = vst [vmem:[#allocation22_spill] sm:$0xff] %v5894_v27  ;;  %v5896_v22 = vpop.f32.mrf.mxu0  ;;  %v7983_v27 = vld [vmem:[#allocation70_spill] sm:$0xff] }
 0x24e   :  { %v1091_v33 = vpop.f32.mrf.mxu1 }
 0x250   :  { %1975 = vmatmul.f32.gmra.mxu0 %v7947_v43 }
 0x251   :  { %1875 = vmatmul.f32.gmra.mxu3 %v7948_v3  ;;  %2249 = vmatmul.f32.gmra.mxu1 %v7943_v50  ;;  %v7954_v50 = vld [vmem:[#allocation25_spill] sm:$0xff] }
 0x253   :  { %v5902_v30 = vpop.f32.mrf.mxu2 }
 0x254   :  { %7949 = vst [vmem:[#allocation23_spill] sm:$0xff] %v5902_v30  ;;  %v5904_v26 = vpop.f32.mrf.mxu3 }
 0x255   :  { %7950 = vst [vmem:[#allocation140_spill] sm:$0xff] %v5904_v26  ;;  %v5906_v56 = vpop.f32.mrf.mxu0 }
 0x256   :  { %v5908_v58 = vpop.f32.mrf.mxu1 }
 0x258   :  { %1979 = vmatmul.f32.gmra.mxu0 %v7951_v32 }
 0x259   :  { %2253 = vmatmul.f32.gmra.mxu1 %v7947_v43  ;;  %v7957_v43 = vld [vmem:[#allocation26_spill] sm:$0xff] }
 0x25b   :  { %v5912_v57 = vpop.f32.mrf.mxu2 }
 0x25c   :  { %7952 = vst [vmem:[#allocation24_spill] sm:$0xff] %v5912_v57  ;;  %v5914_v53 = vpop.f32.mrf.mxu3 }
 0x25d   :  { %7953 = vst [vmem:[#allocation141_spill] sm:$0xff] %v5914_v53  ;;  %v5916_v44 = vpop.f32.mrf.mxu0 }
 0x25e   :  { %v5918_v3 = vpop.f32.mrf.mxu1 }
 0x260   :  { %1983 = vmatmul.f32.gmra.mxu0 %v7954_v50 }
 0x261   :  { %2257 = vmatmul.f32.gmra.mxu1 %v7951_v32  ;;  %v7960_v32 = vld [vmem:[#allocation27_spill] sm:$0xff] }
 0x263   :  { %v5922_v15 = vpop.f32.mrf.mxu2 }
 0x264   :  { %7955 = vst [vmem:[#allocation25_spill] sm:$0xff] %v5922_v15  ;;  %v5924_v45 = vpop.f32.mrf.mxu3 }
 0x265   :  { %7956 = vst [vmem:[#allocation142_spill] sm:$0xff] %v5924_v45  ;;  %v5926_v7 = vpop.f32.mrf.mxu0 }
 0x266   :  { %v5928_v30 = vpop.f32.mrf.mxu1 }
 0x268   :  { %1987 = vmatmul.f32.gmra.mxu0 %v7957_v43 }
 0x269   :  { %2261 = vmatmul.f32.gmra.mxu1 %v7954_v50  ;;  %v7963_v50 = vld [vmem:[#allocation29_spill] sm:$0xff] }
 0x26b   :  { %v5932_v53 = vpop.f32.mrf.mxu2 }
 0x26c   :  { %7958 = vst [vmem:[#allocation26_spill] sm:$0xff] %v5932_v53  ;;  %v5934_v57 = vpop.f32.mrf.mxu3 }
 0x26d   :  { %7959 = vst [vmem:[#allocation143_spill] sm:$0xff] %v5934_v57  ;;  %v5936_v37 = vpop.f32.mrf.mxu0 }
 0x26e   :  { %v5938_v17 = vpop.f32.mrf.mxu1 }
 0x270   :  { %1991 = vmatmul.f32.gmra.mxu0 %v7960_v32 }
 0x271   :  { %2265 = vmatmul.f32.gmra.mxu1 %v7957_v43  ;;  %v7966_v43 = vld [vmem:[#allocation31_spill] sm:$0xff] }
 0x273   :  { %v5942_v45 = vpop.f32.mrf.mxu2 }
 0x274   :  { %7961 = vst [vmem:[#allocation27_spill] sm:$0xff] %v5942_v45  ;;  %v5944_v15 = vpop.f32.mrf.mxu3 }
 0x275   :  { %7962 = vst [vmem:[#allocation144_spill] sm:$0xff] %v5944_v15  ;;  %v5946_v48 = vpop.f32.mrf.mxu0 }
 0x276   :  { %v5948_v26 = vpop.f32.mrf.mxu1 }
 0x278   :  { %1995 = vmatmul.f32.gmra.mxu0 %v7963_v50 }
 0x279   :  { %2269 = vmatmul.f32.gmra.mxu1 %v7960_v32  ;;  %v7969_v32 = vld [vmem:[#allocation33_spill] sm:$0xff] }
 0x27b   :  { %v5952_v53 = vpop.f32.mrf.mxu2 }
 0x27c   :  { %7964 = vst [vmem:[#allocation29_spill] sm:$0xff] %v5952_v53  ;;  %v5954_v57 = vpop.f32.mrf.mxu3 }
 0x27d   :  { %7965 = vst [vmem:[#allocation145_spill] sm:$0xff] %v5954_v57  ;;  %v5956_v63 = vpop.f32.mrf.mxu0 }
 0x27e   :  { %v5958_v38 = vpop.f32.mrf.mxu1 }
 0x280   :  { %1999 = vmatmul.f32.gmra.mxu0 %v7966_v43 }
 0x281   :  { %2273 = vmatmul.f32.gmra.mxu1 %v7963_v50 }
 0x283   :  { %v5962_v45 = vpop.f32.mrf.mxu2 }
 0x284   :  { %7967 = vst [vmem:[#allocation31_spill] sm:$0xff] %v5962_v45  ;;  %v5964_v15 = vpop.f32.mrf.mxu3  ;;  %v7972_v45 = vld [vmem:[#allocation35_spill] sm:$0xff] }
 0x285   :  { %7968 = vst [vmem:[#allocation146_spill] sm:$0xff] %v5964_v15  ;;  %v5966_v62 = vpop.f32.mrf.mxu0  ;;  %v1092_v15 = vadd.f32 %v1091_v33, %v762_v4 }
 0x286   :  { %v5968_v42 = vpop.f32.mrf.mxu1 }
 0x288   :  { %2003 = vmatmul.f32.gmra.mxu0 %v7969_v32 }
 0x289   :  { %2277 = vmatmul.f32.gmra.mxu1 %v7966_v43 }
 0x28b   :  { %v1430_v53 = vpop.f32.mrf.mxu2 }
 0x28c   :  { %v5972_v57 = vpop.f32.mrf.mxu3  ;;  %v1431_v28 = vadd.f32 %v1430_v53, %v1092_v15  ;;  %v7977_v53 = vld [vmem:[#allocation39_spill] sm:$0xff] }
 0x28d   :  { %7970 = vst [vmem:[#allocation33_spill] sm:$0xff] %v5972_v57  ;;  %v1944_v51 = vpop.f32.mrf.mxu0 }
 0x28e   :  { %v1945_v50 = vadd.f32 %v1944_v51, %v7971_v23  ;;  %v5976_v0 = vpop.f32.mrf.mxu1 }
 0x290   :  { %2007 = vmatmul.f32.gmra.mxu0 %v7972_v45 }
 0x291   :  { %2281 = vmatmul.f32.gmra.mxu1 %v7969_v32  ;;  %v7979_v32 = vld [vmem:[#allocation43_spill] sm:$0xff] }
 0x293   :  { %v1435_v6 = vpop.f32.mrf.mxu2 }
 0x294   :  { %v1436_v59 = vadd.f32 %v1435_v6, %v7973_v14  ;;  %v1828_v43 = vpop.f32.mrf.mxu3  ;;  %v7978_v6 = vld [vmem:[#allocation41_spill] sm:$0xff] }
 0x295   :  { %v5981_v60 = vadd.f32 %v1828_v43, %v1431_v28  ;;  %v1948_v57 = vpop.f32.mrf.mxu0 }
 0x296   :  { %v2222_v41 = vpop.f32.mrf.mxu1 }
 0x297   :  { %7974 = vst [vmem:[#allocation60_spill] sm:$0xff] %v5981_v60  ;;  %v5983_v55 = vadd.f32 %v2222_v41, %v1945_v50  ;;  %v7980_v50 = vld [vmem:[#allocation45_spill] sm:$0xff] }
 0x298   :  { %2011 = vmatmul.f32.gmra.mxu0 %v7975_v24 }
 0x299   :  { %2285 = vmatmul.f32.gmra.mxu1 %v7972_v45 }
 0x29c   :  { %v1834_v23 = vpop.f32.mrf.mxu3 }
 0x29d   :  { %v5987_v51 = vadd.f32 %v1834_v23, %v1436_v59  ;;  %v1952_v4 = vpop.f32.mrf.mxu0  ;;  %v7981_v23 = vld [vmem:[#allocation47_spill] sm:$0xff] }
 0x29e   :  { %v2226_v33 = vpop.f32.mrf.mxu1 }
 0x29f   :  { %7976 = vst [vmem:[#allocation35_spill] sm:$0xff] %v5987_v51  ;;  %v7982_v51 = vld [vmem:[#allocation72_spill] sm:$0xff] }
 0x2a0   :  { %2015 = vmatmul.f32.gmra.mxu0 %v7977_v53 }
 0x2a1   :  { %2289 = vmatmul.f32.gmra.mxu1 %v7975_v24 }
 0x2a5   :  { %v1956_v14 = vpop.f32.mrf.mxu0 }
 0x2a6   :  { %v2230_v15 = vpop.f32.mrf.mxu1 }
 0x2a8   :  { %2019 = vmatmul.f32.gmra.mxu0 %v7978_v6 }
 0x2a9   :  { %2293 = vmatmul.f32.gmra.mxu1 %v7977_v53 }
 0x2ad   :  { %v1960_v41 = vpop.f32.mrf.mxu0 }
 0x2ae   :  { %v2234_v28 = vpop.f32.mrf.mxu1 }
 0x2b0   :  { %2023 = vmatmul.f32.gmra.mxu0 %v7979_v32 }
 0x2b1   :  { %2297 = vmatmul.f32.gmra.mxu1 %v7978_v6  ;;  %v7984_v6 = vld [vmem:[#allocation68_spill] sm:$0xff] }
 0x2b2   :  { %v1961_v54 = vadd.f32 %v1960_v41, %v7984_v6  ;;  %v7989_v41 = vld [vmem:[#allocation62_spill] sm:$0xff] }
 0x2b5   :  { %v1964_v45 = vpop.f32.mrf.mxu0 }
 0x2b6   :  { %v2238_v59 = vpop.f32.mrf.mxu1  ;;  %v1965_v19 = vadd.f32 %v1964_v45, %v7983_v27 }
 0x2b7   :  { %v2239_v29 = vadd.f32 %v2238_v59, %v1961_v54  ;;  %v7990_v54 = vld [vmem:[#allocation51_spill] sm:$0xff] }
 0x2b8   :  { %2027 = vmatmul.f32.gmra.mxu0 %v7980_v50 }
 0x2b9   :  { %2301 = vmatmul.f32.gmra.mxu1 %v7979_v32  ;;  %v7986_v32 = vld [vmem:[#allocation66_spill] sm:$0xff] }
 0x2ba   :  { %v1957_v8 = vadd.f32 %v1956_v14, %v7986_v32 }
 0x2bc   :  { %v2235_v46 = vadd.f32 %v2234_v28, %v1957_v8 }
 0x2bd   :  { %v1968_v43 = vpop.f32.mrf.mxu0 }
 0x2be   :  { %v2242_v24 = vpop.f32.mrf.mxu1  ;;  %v1969_v53 = vadd.f32 %v1968_v43, %v7982_v51  ;;  %v7988_v43 = vld [vmem:[#allocation74_spill] sm:$0xff]  ;;  %v2456_v6 = vmax.f32 %v2235_v46, 0.0 }
 0x2bf   :  { %v2243_v36 = vadd.f32 %v2242_v24, %v1965_v19  ;;  %v1949_v19 = vadd.f32 %v1948_v57, %v7989_v41  ;;  %v2457_v24 = vmax.f32 %v2239_v29, 0.0  ;;  %v7992_v29 = vld [vmem:[#allocation56_spill] sm:$0xff]  ;;  %v7994_v41 = vld [vmem:[#allocation50_spill] sm:$0xff] }
 0x2c0   :  { %2031 = vmatmul.f32.gmra.mxu0 %v7981_v23  ;;  %v6028_v28 = vand.u32 4294901760, %v2456_v6 }
 0x2c1   :  { %2305 = vmatmul.f32.gmra.mxu1 %v7980_v50  ;;  %v1953_v50 = vadd.f32 %v1952_v4, %v7987_v61  ;;  %v2458_v51 = vmax.f32 %v2243_v36, 0.0  ;;  %v7991_v61 = vld [vmem:[#allocation58_spill] sm:$0xff]  ;;  %v6021_v4 = vand.u32 4294901760, %v2457_v24 }
 0x2c3   :  { %v2231_v45 = vadd.f32 %v2230_v15, %v1953_v50  ;;  %v6012_v14 = vand.u32 4294901760, %v2458_v51  ;;  %v2453_v50 = vmax.f32 %v5983_v55, 0.0 }
 0x2c5   :  { %v1972_v60 = vpop.f32.mrf.mxu0  ;;  %v2455_v57 = vmax.f32 %v2231_v45, 0.0  ;;  %v7995_v45 = vld [vmem:[#allocation52_spill] sm:$0xff] }
 0x2c6   :  { %v2246_v1 = vpop.f32.mrf.mxu1  ;;  %v1973_v21 = vadd.f32 %v1972_v60, %v7988_v43  ;;  %v1941_v60 = vadd.f32 %v5966_v62, %v7991_v61 }
 0x2c7   :  { %v2247_v34 = vadd.f32 %v2246_v1, %v1969_v53  ;;  %v6046_v43 = vand.u32 4294901760, %v2455_v57 }
 0x2c8   :  { %2035 = vmatmul.f32.gmra.mxu0 %v7985_v35 }
 0x2c9   :  { %v2459_v40 = vmax.f32 %v2247_v34, 0.0  ;;  %2309 = vmatmul.f32.gmra.mxu1 %v7981_v23  ;;  %v2227_v23 = vadd.f32 %v2226_v33, %v1949_v19  ;;  %v2219_v33 = vadd.f32 %v5976_v0, %v1941_v60  ;;  %v1925_v19 = vadd.f32 %v5926_v7, %v7994_v41 }
 0x2ca   :  { %v6081_v60 = vand.u32 4294901760, %v2453_v50 }
 0x2cb   :  { %v6007_v27 = vand.u32 4294901760, %v2459_v40  ;;  %v2454_v15 = vmax.f32 %v2227_v23, 0.0  ;;  %v2452_v55 = vmax.f32 %v2219_v33, 0.0  ;;  %v6090_v33 = vadd.f32 %v5938_v17, %v1925_v19 }
 0x2cd   :  { %v6009_v1 = vpop.f32.mrf.mxu0  ;;  %v6016_v36 = vsub.f32 %v2459_v40, %v6007_v27  ;;  %v6031_v40 = vsub.f32 %v2458_v51, %v6012_v14  ;;  %v6049_v51 = vsub.f32 %v2457_v24, %v6021_v4  ;;  %v6062_v23 = vand.u32 4294901760, %v2454_v15 }
 0x2ce   :  { %v2250_v34 = vpop.f32.mrf.mxu1  ;;  %v6065_v24 = vsub.f32 %v2456_v6, %v6028_v28  ;;  %v6094_v41 = vand.u32 4294901760, %v2452_v55 }
 0x2cf   :  { %v2251_v53 = vadd.f32 %v2250_v34, %v1973_v21  ;;  %v1937_v21 = vadd.f32 %v5956_v63, %v7992_v29  ;;  %v7699_v63 = vand.u32 4294901760, %v6016_v36  ;;  %v1929_v34 = vadd.f32 %v5936_v37, %v7995_v45 }
 0x2d0   :  { %2039 = vmatmul.f32.gmra.mxu0 %v7990_v54  ;;  %v7698_v7 = vand.u32 4294901760, %v6031_v40  ;;  %v6084_v29 = vsub.f32 %v2455_v57, %v6046_v43  ;;  %v7703_v45 = vand.u32 4294901760, %v6065_v24 }
 0x2d1   :  { %v2460_v8 = vmax.f32 %v2251_v53, 0.0  ;;  %2313 = vmatmul.f32.gmra.mxu1 %v7985_v35  ;;  %v7993_v35 = vld [vmem:[#allocation54_spill] sm:$0xff]  ;;  %v6043_v0 = vadd.f32 %v5968_v42, %v1937_v21  ;;  %v6070_v61 = vadd.f32 %v5948_v26, %v1929_v34  ;;  %v2570_v37 = vsub.f32 %v6016_v36, %v7699_v63  ;;  %v8000_v63 = vld [vmem:[#allocation55_spill] sm:$0xff] }
 0x2d2   :  { %v1933_v59 = vadd.f32 %v5946_v48, %v7993_v35  ;;  %v7700_v26 = vand.u32 4294901760, %v6049_v51  ;;  %v2576_v57 = vsub.f32 %v6031_v40, %v7698_v7 }
 0x2d3   :  { %v6025_v46 = vand.u32 4294901760, %v2460_v8  ;;  %v2451_v6 = vmax.f32 %v6043_v0, 0.0  ;;  %v6097_v0 = vsub.f32 %v2454_v15, %v6062_v23  ;;  %v2449_v34 = vmax.f32 %v6070_v61, 0.0  ;;  %v7999_v61 = vld [vmem:[#allocation44_spill] sm:$0xff] }
 0x2d4   :  { %v6058_v53 = vadd.f32 %v5958_v38, %v1933_v59  ;;  %v2571_v15 = vand.u32 4294901760, %v2570_v37  ;;  %v2448_v37 = vmax.f32 %v6090_v33, 0.0 }
 0x2d5   :  { %v6036_v62 = vsub.f32 %v2460_v8, %v6025_v46  ;;  %2521 = vmatpush.msra.mxu2 %v6025_v46  ;;  %v6039_v32 = vpop.f32.mrf.mxu0  ;;  %v7996_v8 = vld [vmem:[#allocation53_spill] sm:$0xff] }
 0x2d6   :  { %v6051_v48 = vpop.f32.mrf.mxu1  ;;  %v2450_v35 = vmax.f32 %v6058_v53, 0.0 }
 0x2d7   :  { %v7701_v42 = vand.u32 4294901760, %v6036_v62  ;;  %2523 = vmatpush.msra.mxu2 %v6007_v27 }
 0x2d8   :  { %2043 = vmatmul.f32.gmra.mxu0 %v7996_v8 }
 0x2d9   :  { %2317 = vmatmul.f32.gmra.mxu1 %v7990_v54  ;;  %2525 = vmatpush.msra.mxu2 %v6012_v14  ;;  %v2564_v38 = vsub.f32 %v6036_v62, %v7701_v42  ;;  %v7997_v54 = vld [vmem:[#allocation48_spill] sm:$0xff]  ;;  %v2588_v42 = vsub.f32 %v6065_v24, %v7703_v45 }
 0x2da   :  { %v1921_v21 = vadd.f32 %v5916_v44, %v7997_v54  ;;  %v7998_v44 = vld [vmem:[#allocation46_spill] sm:$0xff]  ;;  %v6113_v54 = vsub.f32 %v2453_v50, %v6081_v60  ;;  %v6129_v50 = vsub.f32 %v2452_v55, %v6094_v41  ;;  %v2509_v55 = vld [vmem:[%s7532_s3] sm:$0xff] }
 0x2db   :  { %2527 = vmatpush.msra.mxu2 %v6021_v4  ;;  %v2565_v59 = vand.u32 4294901760, %v2564_v38  ;;  %v1917_v17 = vadd.f32 %v5906_v56, %v7998_v44  ;;  %v6110_v38 = vand.u32 4294901760, %v2451_v6  ;;  %v2582_v56 = vsub.f32 %v6049_v51, %v7700_v26  ;;  %2511 = vst [vmem:[#allocation1] ss:$4 sm:$0xff] %v2509_v55 }
 0x2dc   :  { %v2199_v19 = vadd.f32 %v5928_v30, %v1921_v21  ;;  %v7702_v30 = vand.u32 4294901760, %v6084_v29  ;;  %v1913_v21 = vadd.f32 %v5896_v22, %v7999_v61  ;;  %v6125_v44 = vand.u32 4294901760, %v2450_v35 }
 0x2dd   :  { %2529 = vmatpush.msra.mxu2 %v6028_v28  ;;  %2566 = vmatpush.msra.mxu3 %v2565_v59  ;;  %v6108_v53 = vpop.f32.mrf.mxu0  ;;  %v2195_v59 = vadd.f32 %v5918_v3, %v1917_v17  ;;  %v2577_v26 = vand.u32 4294901760, %v2576_v57  ;;  %v7704_v22 = vand.u32 4294901760, %v6097_v0  ;;  %v6137_v17 = vand.u32 4294901760, %v2449_v34 }
 0x2de   :  { %v6115_v7 = vpop.f32.mrf.mxu1  ;;  %v2191_v3 = vadd.f32 %v5908_v58, %v1913_v21  ;;  %v2447_v33 = vmax.f32 %v2199_v19, 0.0  ;;  %v6145_v57 = vsub.f32 %v2451_v6, %v6110_v38  ;;  %v2594_v58 = vsub.f32 %v6084_v29, %v7702_v30 }
 0x2df   :  { %2531 = vmatpush.msra.mxu2 %v6046_v43  ;;  %2572 = vmatpush.msra.mxu3 %v2571_v15  ;;  %v2583_v15 = vand.u32 4294901760, %v2582_v56  ;;  %v7705_v19 = vand.u32 4294901760, %v6113_v54  ;;  %v2446_v61 = vmax.f32 %v2195_v59, 0.0  ;;  %v6155_v21 = vsub.f32 %v2450_v35, %v6125_v44 }
 0x2e0   :  { %2047 = vmatmul.f32.gmra.mxu0 %v8000_v63  ;;  %v2589_v6 = vand.u32 4294901760, %v2588_v42  ;;  %v2445_v30 = vmax.f32 %v2191_v3, 0.0  ;;  %v6161_v45 = vand.u32 4294901760, %v2447_v33  ;;  %v6167_v55 = vsub.f32 %v2449_v34, %v6137_v17  ;;  %v8001_v34 = vld [vmem:[#allocation57_spill] sm:$0xff] }
 0x2e1   :  { %2321 = vmatmul.f32.gmra.mxu1 %v7996_v8  ;;  %2533 = vmatpush.msra.mxu2 %v6062_v23  ;;  %v6151_v8 = vand.u32 4294901760, %v2448_v37  ;;  %v2595_v42 = vand.u32 4294901760, %v2594_v58  ;;  %v6175_v3 = vand.u32 4294901760, %v2446_v61  ;;  %v8002_v10 = vand.u32 4294901760, %v6129_v50 }
 0x2e2   :  { %2578 = vmatpush.msra.mxu3 %v2577_v26  ;;  %v2600_v26 = vsub.f32 %v6097_v0, %v7704_v22  ;;  %v6189_v22 = vsub.f32 %v2447_v33, %v6161_v45  ;;  %v8004_v33 = vand.u32 4294901760, %v6155_v21 }
 0x2e3   :  { %2535 = vmatpush.msra.mxu2 %v6081_v60  ;;  %v6179_v56 = vsub.f32 %v2448_v37, %v6151_v8  ;;  %v2612_v58 = vsub.f32 %v6129_v50, %v8002_v10  ;;  %v2512_v37 = vld.sshfl [vmem:[#allocation1] sm:$0xff pattern:$0x73625140]  ;;  %v6200_v25 = vsub.f32 %v2446_v61, %v6175_v3 }
 0x2e4   :  { %2584 = vmatpush.msra.mxu3 %v2583_v15  ;;  %v2606_v15 = vsub.f32 %v6113_v54, %v7705_v19  ;;  %v6186_v19 = vand.u32 4294901760, %v2445_v30  ;;  %v6197_v9 = vand.u32 4294901760, %v2512_v37 }
 0x2e5   :  { %2537 = vmatpush.msra.mxu2 %v6094_v41  ;;  %v6164_v59 = vpop.f32.mrf.mxu0  ;;  %v8007_v39 = vand.u32 4294901760, %v6179_v56 }
 0x2e6   :  { %2590 = vmatpush.msra.mxu3 %v2589_v6  ;;  %v6169_v35 = vpop.f32.mrf.mxu1  ;;  %v2601_v6 = vand.u32 4294901760, %v2600_v26  ;;  %v8003_v26 = vand.u32 4294901760, %v6145_v57  ;;  %v6208_v49 = vsub.f32 %v2512_v37, %v6197_v9 }
 0x2e7   :  { %2539 = vmatpush.msra.mxu2 %v6110_v38 }
 0x2e8   :  { %2596 = vmatpush.msra.mxu3 %v2595_v42  ;;  %2051 = vmatmul.f32.gmra.mxu0 %v8001_v34  ;;  %v2607_v42 = vand.u32 4294901760, %v2606_v15  ;;  %v2618_v13 = vsub.f32 %v6145_v57, %v8003_v26  ;;  %v6211_v26 = vsub.f32 %v2445_v30, %v6186_v19  ;;  %v7710_v37 = vand.u32 4294901760, %v6208_v49  ;;  %v8006_v30 = vld [vmem:[#allocation59_spill] sm:$0xff] }
 0x2e9   :  { %2325 = vmatmul.f32.gmra.mxu1 %v8000_v63  ;;  %2541 = vmatpush.msra.mxu2 %v6125_v44  ;;  %v2613_v63 = vand.u32 4294901760, %v2612_v58 }
 0x2ea   :  { %2602 = vmatpush.msra.mxu3 %v2601_v6  ;;  %v2624_v6 = vsub.f32 %v6155_v21, %v8004_v33  ;;  %v2619_v58 = vand.u32 4294901760, %v2618_v13  ;;  %v7712_v13 = vand.u32 4294901760, %v6200_v25  ;;  %v7711_v52 = vand.u32 4294901760, %v6211_v26 }
 0x2eb   :  { %2543 = vmatpush.msra.mxu2 %v6137_v17 }
 0x2ec   :  { %2608 = vmatpush.msra.mxu3 %v2607_v42  ;;  %v8005_v42 = vand.u32 4294901760, %v6167_v55  ;;  %v2625_v47 = vand.u32 4294901760, %v2624_v6 }
 0x2ed   :  { %2545 = vmatpush.msra.mxu2 %v6151_v8  ;;  %v6214_v61 = vpop.f32.mrf.mxu0 }
 0x2ee   :  { %2614 = vmatpush.msra.mxu3 %v2613_v63  ;;  %v6216_v10 = vpop.f32.mrf.mxu1  ;;  %v2630_v33 = vsub.f32 %v6167_v55, %v8005_v42  ;;  %v2636_v63 = vsub.f32 %v6179_v56, %v8007_v39  ;;  %v2555_v42 = vsub.f32 %v6208_v49, %v7710_v37 }
 0x2ef   :  { %2547 = vmatpush.msra.mxu2 %v6161_v45 }
 0x2f0   :  { %2620 = vmatpush.msra.mxu3 %v2619_v58  ;;  %2055 = vmatmul.f32.gmra.mxu0 %v8006_v30  ;;  %v2631_v15 = vand.u32 4294901760, %v2630_v33  ;;  %v8008_v58 = vand.u32 4294901760, %v6189_v22  ;;  %v2556_v16 = vand.u32 4294901760, %v2555_v42  ;;  %v2637_v39 = vand.u32 4294901760, %v2636_v63  ;;  %v8009_v42 = vld [vmem:[#allocation61_spill] sm:$0xff] }
 0x2f1   :  { %2329 = vmatmul.f32.gmra.mxu1 %v8001_v34  ;;  %2549 = vmatpush.msra.mxu2 %v6175_v3  ;;  %v2648_v34 = vsub.f32 %v6200_v25, %v7712_v13 }
 0x2f2   :  { %2626 = vmatpush.msra.mxu3 %v2625_v47  ;;  %v2642_v6 = vsub.f32 %v6189_v22, %v8008_v58 }
 0x2f3   :  { %2551 = vmatpush.msra.mxu2 %v6186_v19  ;;  %v2649_v63 = vand.u32 4294901760, %v2648_v34 }
 0x2f4   :  { %2632 = vmatpush.msra.mxu3 %v2631_v15  ;;  %2557 = vmatmul.f32.vlgmr.msra.gmra.mxu2 %v2556_v16  ;;  %v2643_v33 = vand.u32 4294901760, %v2642_v6  ;;  %v2654_v15 = vsub.f32 %v6211_v26, %v7711_v52 }
 0x2f5   :  { %2664 = vmatpush.msrb.mxu2 %v6036_v62  ;;  %v6243_v37 = vpop.f32.mrf.mxu0 }
 0x2f6   :  { %2638 = vmatpush.msra.mxu3 %v2637_v39  ;;  %v6245_v47 = vpop.f32.mrf.mxu1  ;;  %v2655_v16 = vand.u32 4294901760, %v2654_v15 }
 0x2f7   :  { %2667 = vmatpush.msrb.mxu2 %v6016_v36 }
 0x2f8   :  { %2644 = vmatpush.msra.mxu3 %v2643_v33  ;;  %2059 = vmatmul.f32.gmra.mxu0 %v8009_v42  ;;  %v8011_v33 = vld [vmem:[#allocation65_spill] sm:$0xff] }
 0x2f9   :  { %2670 = vmatpush.msrb.mxu2 %v6031_v40  ;;  %2333 = vmatmul.f32.gmra.mxu1 %v8006_v30  ;;  %v8010_v30 = vld [vmem:[#allocation63_spill] sm:$0xff] }
 0x2fa   :  { %2650 = vmatpush.msra.mxu3 %v2649_v63  ;;  %v8012_v63 = vld [vmem:[#allocation91_spill] sm:$0xff] }
 0x2fb   :  { %2673 = vmatpush.msrb.mxu2 %v6049_v51 }
 0x2fc   :  { %2656 = vmatpush.msra.mxu3 %v2655_v16 }
 0x2fd   :  { %2676 = vmatpush.msrb.mxu2 %v6065_v24  ;;  %v6257_v58 = vpop.f32.mrf.mxu0  ;;  %2658 = vmatmul.f32.vlgmr.msra.gmra.mxu3 %v6197_v9 }
 0x2fe   :  { %2717 = vmatpush.msrb.mxu3 %v6025_v46  ;;  %v6259_v6 = vpop.f32.mrf.mxu1 }
 0x2ff   :  { %2679 = vmatpush.msrb.mxu2 %v6084_v29 }
 0x300   :  { %2719 = vmatpush.msrb.mxu3 %v6007_v27  ;;  %2063 = vmatmul.f32.gmra.mxu0 %v8010_v30 }
 0x301   :  { %2682 = vmatpush.msrb.mxu2 %v6097_v0  ;;  %2337 = vmatmul.f32.gmra.mxu1 %v8009_v42 }
 0x302   :  { %2721 = vmatpush.msrb.mxu3 %v6012_v14 }
 0x303   :  { %2685 = vmatpush.msrb.mxu2 %v6113_v54 }
 0x304   :  { %2723 = vmatpush.msrb.mxu3 %v6021_v4 }
 0x305   :  { %2688 = vmatpush.msrb.mxu2 %v6129_v50  ;;  %v6272_v39 = vpop.f32.mrf.mxu0 }
 0x306   :  { %2725 = vmatpush.msrb.mxu3 %v6028_v28  ;;  %v6274_v34 = vpop.f32.mrf.mxu1 }
 0x307   :  { %2691 = vmatpush.msrb.mxu2 %v6145_v57 }
 0x308   :  { %2727 = vmatpush.msrb.mxu3 %v6046_v43  ;;  %2067 = vmatmul.f32.gmra.mxu0 %v8011_v33 }
 0x309   :  { %2694 = vmatpush.msrb.mxu2 %v6155_v21  ;;  %2341 = vmatmul.f32.gmra.mxu1 %v8010_v30  ;;  %v8013_v30 = vld [vmem:[#allocation67_spill] sm:$0xff] }
 0x30a   :  { %2729 = vmatpush.msrb.mxu3 %v6062_v23 }
 0x30b   :  { %2697 = vmatpush.msrb.mxu2 %v6167_v55 }
 0x30c   :  { %2731 = vmatpush.msrb.mxu3 %v6081_v60 }
 0x30d   :  { %2700 = vmatpush.msrb.mxu2 %v6179_v56  ;;  %v2008_v15 = vpop.f32.mrf.mxu0 }
 0x30e   :  { %2733 = vmatpush.msrb.mxu3 %v6094_v41  ;;  %v2009_v42 = vadd.f32 %v2008_v15, %v8012_v63  ;;  %v6287_v16 = vpop.f32.mrf.mxu1  ;;  %v8014_v15 = vand.u32 4294901760, %v6036_v62  ;;  %v8015_v63 = vand.u32 4294901760, %v6016_v36  ;;  %v8017_v62 = vld [vmem:[#allocation69_spill] sm:$0xff]  ;;  %v8019_v36 = vand.u32 4294901760, %v6065_v24  ;;  %v8023_v24 = vld [vmem:[#allocation71_spill] sm:$0xff] }
 0x30f   :  { %2703 = vmatpush.msrb.mxu2 %v6189_v22 }
 0x310   :  { %2735 = vmatpush.msrb.mxu3 %v6110_v38  ;;  %2071 = vmatmul.f32.gmra.mxu0 %v8013_v30 }
 0x311   :  { %2706 = vmatpush.msrb.mxu2 %v6200_v25  ;;  %2345 = vmatmul.f32.gmra.mxu1 %v8011_v33  ;;  %v8016_v33 = vand.u32 4294901760, %v6031_v40  ;;  %v8020_v40 = vand.u32 4294901760, %v6208_v49 }
 0x312   :  { %2737 = vmatpush.msrb.mxu3 %v6125_v44 }
 0x313   :  { %2709 = vmatpush.msrb.mxu2 %v6211_v26 }
 0x314   :  { %2739 = vmatpush.msrb.mxu3 %v6137_v17  ;;  %2712 = vmatmul.f32.vlgmr.msrb.gmra.mxu2 %v6208_v49  ;;  %v8025_v49 = vand.u32 4294901760, %v6129_v50  ;;  %v8031_v50 = vand.u32 4294901760, %v6189_v22 }
 0x315   :  { %2758 = vmatpush.msra.mxu2 %v8014_v15  ;;  %v6303_v52 = vpop.f32.mrf.mxu0  ;;  %v8018_v15 = vand.u32 4294901760, %v6049_v51  ;;  %v8022_v51 = vand.u32 4294901760, %v6097_v0 }
 0x316   :  { %2741 = vmatpush.msrb.mxu3 %v6151_v8  ;;  %v2286_v13 = vpop.f32.mrf.mxu1 }
 0x317   :  { %2762 = vmatpush.msra.mxu2 %v8015_v63  ;;  %v6305_v12 = vadd.f32 %v2286_v13, %v2009_v42  ;;  %v8021_v42 = vand.u32 4294901760, %v6084_v29  ;;  %v8026_v29 = vand.u32 4294901760, %v6145_v57 }
 0x318   :  { %2743 = vmatpush.msrb.mxu3 %v6161_v45  ;;  %2075 = vmatmul.f32.gmra.mxu0 %v8017_v62 }
 0x319   :  { %2766 = vmatpush.msra.mxu2 %v8016_v33  ;;  %2349 = vmatmul.f32.gmra.mxu1 %v8013_v30 }
 0x31a   :  { %2745 = vmatpush.msrb.mxu3 %v6175_v3 }
 0x31b   :  { %2770 = vmatpush.msra.mxu2 %v8018_v15  ;;  %v8038_v15 = vld [vmem:[#allocation95_spill] sm:$0xff] }
 0x31c   :  { %2747 = vmatpush.msrb.mxu3 %v6186_v19 }
 0x31d   :  { %2774 = vmatpush.msra.mxu2 %v8019_v36  ;;  %v2016_v13 = vpop.f32.mrf.mxu0  ;;  %2751 = vmatmul.f32.vlgmr.msrb.gmra.mxu3 %v8020_v40 }
 0x31e   :  { %2825 = vmatpush.msra.mxu3 %v6025_v46  ;;  %v6324_v30 = vpop.f32.mrf.mxu1  ;;  %v8024_v46 = vand.u32 4294901760, %v6113_v54  ;;  %v8028_v54 = vld [vmem:[#allocation73_spill] sm:$0xff]  ;;  %v2017_v36 = vadd.f32 %v2016_v13, %v8038_v15 }
 0x31f   :  { %2778 = vmatpush.msra.mxu2 %v8021_v42 }
 0x320   :  { %2827 = vmatpush.msra.mxu3 %v6007_v27  ;;  %2079 = vmatmul.f32.gmra.mxu0 %v8023_v24 }
 0x321   :  { %2782 = vmatpush.msra.mxu2 %v8022_v51  ;;  %2353 = vmatmul.f32.gmra.mxu1 %v8017_v62 }
 0x322   :  { %2829 = vmatpush.msra.mxu3 %v6012_v14  ;;  %v8027_v14 = vand.u32 4294901760, %v6155_v21  ;;  %v8033_v21 = vld [vmem:[#allocation75_spill] sm:$0xff] }
 0x323   :  { %2786 = vmatpush.msra.mxu2 %v8024_v46 }
 0x324   :  { %2831 = vmatpush.msra.mxu3 %v6021_v4  ;;  %v8029_v4 = vand.u32 4294901760, %v6167_v55 }
 0x325   :  { %2790 = vmatpush.msra.mxu2 %v8025_v49  ;;  %v2020_v27 = vpop.f32.mrf.mxu0 }
 0x326   :  { %2833 = vmatpush.msra.mxu3 %v6028_v28  ;;  %v2294_v0 = vpop.f32.mrf.mxu1  ;;  %v8030_v28 = vand.u32 4294901760, %v6179_v56 }
 0x327   :  { %2794 = vmatpush.msra.mxu2 %v8026_v29  ;;  %v2295_v46 = vadd.f32 %v2294_v0, %v2017_v36  ;;  %v8042_v0 = vld [vmem:[#allocation88_spill] sm:$0xff] }
 0x328   :  { %2835 = vmatpush.msra.mxu3 %v6046_v43  ;;  %2083 = vmatmul.f32.gmra.mxu0 %v8028_v54 }
 0x329   :  { %2798 = vmatpush.msra.mxu2 %v8027_v14  ;;  %2357 = vmatmul.f32.gmra.mxu1 %v8023_v24 }
 0x32a   :  { %2837 = vmatpush.msra.mxu3 %v6062_v23  ;;  %v8032_v23 = vand.u32 4294901760, %v6200_v25  ;;  %v8035_v25 = vld [vmem:[#allocation77_spill] sm:$0xff] }
 0x32b   :  { %2802 = vmatpush.msra.mxu2 %v8029_v4  ;;  %v8040_v4 = vld [vmem:[#allocation83_spill] sm:$0xff] }
 0x32c   :  { %2839 = vmatpush.msra.mxu3 %v6081_v60  ;;  %v8034_v60 = vand.u32 4294901760, %v6211_v26 }
 0x32d   :  { %2806 = vmatpush.msra.mxu2 %v8030_v28  ;;  %v2024_v43 = vpop.f32.mrf.mxu0  ;;  %v8041_v28 = vld [vmem:[#allocation90_spill] sm:$0xff] }
 0x32e   :  { %2841 = vmatpush.msra.mxu3 %v6094_v41  ;;  %v2298_v57 = vpop.f32.mrf.mxu1  ;;  %v2025_v26 = vadd.f32 %v2024_v43, %v5650_v18  ;;  %v8039_v18 = vld [vmem:[#allocation93_spill] sm:$0xff]  ;;  %v2005_v43 = vadd.f32 %v6272_v39, %v8041_v28 }
 0x32f   :  { %2810 = vmatpush.msra.mxu2 %v8031_v50  ;;  %v2013_v24 = vadd.f32 %v6303_v52, %v8039_v18  ;;  %v2471_v50 = vmax.f32 %v2295_v46, 0.0 }
 0x330   :  { %2843 = vmatpush.msra.mxu3 %v6110_v38  ;;  %2087 = vmatmul.f32.gmra.mxu0 %v8033_v21 }
 0x331   :  { %2814 = vmatpush.msra.mxu2 %v8032_v23  ;;  %2361 = vmatmul.f32.gmra.mxu1 %v8028_v54  ;;  %v2283_v23 = vadd.f32 %v6287_v16, %v2005_v43 }
 0x332   :  { %2845 = vmatpush.msra.mxu3 %v6125_v44 }
 0x333   :  { %2818 = vmatpush.msra.mxu2 %v8034_v60 }
 0x334   :  { %2847 = vmatpush.msra.mxu3 %v6137_v17  ;;  %2820 = vmatmul.f32.vlgmr.msra.gmra.mxu2 %v6197_v9  ;;  %v8036_v17 = vld [vmem:[#allocation79_spill] sm:$0xff] }
 0x335   :  { %v2028_v41 = vpop.f32.mrf.mxu0 }
 0x336   :  { %2849 = vmatpush.msra.mxu3 %v6151_v8  ;;  %v2302_v38 = vpop.f32.mrf.mxu1 }
 0x337   :  { %v2303_v62 = vadd.f32 %v2302_v38, %v2025_v26  ;;  %v8043_v38 = vld [vmem:[#allocation86_spill] sm:$0xff] }
 0x338   :  { %2851 = vmatpush.msra.mxu3 %v6161_v45  ;;  %2091 = vmatmul.f32.gmra.mxu0 %v8035_v25  ;;  %v2029_v45 = vadd.f32 %v2028_v41, %v5666_v11  ;;  %v1997_v39 = vadd.f32 %v6243_v37, %v8043_v38  ;;  %v8044_v37 = vld [vmem:[#allocation82_spill] sm:$0xff] }
 0x339   :  { %2365 = vmatmul.f32.gmra.mxu1 %v8033_v21  ;;  %v2473_v49 = vmax.f32 %v2303_v62, 0.0 }
 0x33a   :  { %2853 = vmatpush.msra.mxu3 %v6175_v3  ;;  %v6431_v26 = vadd.f32 %v6259_v6, %v1997_v39 }
 0x33b   :  { %v6395_v52 = vand.u32 4294901760, %v2473_v49 }
 0x33c   :  { %2855 = vmatpush.msra.mxu3 %v6186_v19  ;;  %v8037_v19 = vld [vmem:[#allocation81_spill] sm:$0xff]  ;;  %v2466_v18 = vmax.f32 %v6431_v26, 0.0 }
 0x33d   :  { %2857 = vmatmul.f32.vlgmr.msra.gmra.mxu3 %v6197_v9  ;;  %v2032_v44 = vpop.f32.mrf.mxu0  ;;  %v2021_v9 = vadd.f32 %v2020_v27, %v5630_v20  ;;  %v2291_v27 = vadd.f32 %v6324_v30, %v2013_v24  ;;  %v2001_v30 = vadd.f32 %v6257_v58, %v8042_v0  ;;  %v8049_v0 = vld [vmem:[#allocation76_spill] sm:$0xff] }
 0x33e   :  { %v2306_v22 = vpop.f32.mrf.mxu1  ;;  %v2033_v8 = vadd.f32 %v2032_v44, %v5679_v31  ;;  %v6499_v38 = vand.u32 4294901760, %v2466_v18 }
 0x33f   :  { %v2307_v63 = vadd.f32 %v2306_v22, %v2029_v45  ;;  %v2299_v40 = vadd.f32 %v2298_v57, %v2021_v9  ;;  %v2470_v21 = vmax.f32 %v2291_v27, 0.0  ;;  %v2279_v16 = vadd.f32 %v6274_v34, %v2001_v30  ;;  %v8046_v9 = vld [vmem:[#allocation85_spill] sm:$0xff] }
 0x340   :  { %2095 = vmatmul.f32.gmra.mxu0 %v8036_v17  ;;  %v2469_v22 = vmax.f32 %v6305_v12, 0.0  ;;  %v1989_v45 = vadd.f32 %v6164_v59, %v8044_v37  ;;  %v2468_v12 = vmax.f32 %v2283_v23, 0.0  ;;  %v1977_v30 = vadd.f32 %v6009_v1, %v8049_v0 }
 0x341   :  { %2369 = vmatmul.f32.gmra.mxu1 %v8035_v25  ;;  %v2474_v31 = vmax.f32 %v2307_v63, 0.0  ;;  %v2472_v14 = vmax.f32 %v2299_v40, 0.0  ;;  %v6435_v63 = vand.u32 4294901760, %v2470_v21  ;;  %v2467_v62 = vmax.f32 %v2279_v16, 0.0  ;;  %v8047_v40 = vld [vmem:[#allocation80_spill] sm:$0xff] }
 0x342   :  { %v6452_v15 = vand.u32 4294901760, %v2469_v22  ;;  %v6466_v46 = vand.u32 4294901760, %v2468_v12  ;;  %v2255_v1 = vadd.f32 %v6051_v48, %v1977_v30 }
 0x343   :  { %v6387_v54 = vand.u32 4294901760, %v2474_v31  ;;  %v6403_v60 = vand.u32 4294901760, %v2472_v14  ;;  %v6484_v28 = vand.u32 4294901760, %v2467_v62 }
 0x344   :  { %v6487_v43 = vsub.f32 %v2469_v22, %v6452_v15  ;;  %v6503_v39 = vsub.f32 %v2468_v12, %v6466_v46 }
 0x345   :  { %v2036_v56 = vpop.f32.mrf.mxu0  ;;  %v6406_v41 = vsub.f32 %v2474_v31, %v6387_v54  ;;  %v1985_v31 = vadd.f32 %v6108_v53, %v8047_v40  ;;  %v8048_v53 = vld [vmem:[#allocation78_spill] sm:$0xff] }
 0x346   :  { %v2310_v55 = vpop.f32.mrf.mxu1  ;;  %v2037_v42 = vadd.f32 %v2036_v56, %v5693_v2  ;;  %v7718_v48 = vand.u32 4294901760, %v6487_v43 }
 0x347   :  { %v2311_v3 = vadd.f32 %v2310_v55, %v2033_v8  ;;  %v6422_v8 = vsub.f32 %v2473_v49, %v6395_v52  ;;  %v8045_v55 = vld [vmem:[#allocation84_spill] sm:$0xff]  ;;  %v6469_v49 = vsub.f32 %v2470_v21, %v6435_v63  ;;  %v6478_v27 = vadd.f32 %v6169_v35, %v1985_v31 }
 0x348   :  { %2099 = vmatmul.f32.gmra.mxu0 %v8037_v19 }
 0x349   :  { %v2475_v33 = vmax.f32 %v2311_v3, 0.0  ;;  %2373 = vmatmul.f32.gmra.mxu1 %v8036_v17  ;;  %v6419_v17 = vand.u32 4294901760, %v2471_v50  ;;  %v1993_v3 = vadd.f32 %v6214_v61, %v8045_v55  ;;  %v7719_v37 = vand.u32 4294901760, %v6469_v49  ;;  %v8050_v55 = vld [vmem:[#allocation87_spill] sm:$0xff] }
 0x34b   :  { %v6380_v11 = vand.u32 4294901760, %v2475_v33  ;;  %v6442_v59 = vadd.f32 %v6245_v47, %v1993_v3  ;;  %v6455_v36 = vsub.f32 %v2471_v50, %v6419_v17  ;;  %v7728_v47 = vand.u32 4294901760, %v6422_v8 }
 0x34c   :  { %v6516_v3 = vsub.f32 %v2467_v62, %v6484_v28  ;;  %v6529_v62 = vsub.f32 %v2466_v18, %v6499_v38  ;;  %v2941_v31 = vsub.f32 %v6469_v49, %v7719_v37 }
 0x34d   :  { %v6382_v51 = vpop.f32.mrf.mxu0  ;;  %v6390_v13 = vsub.f32 %v2475_v33, %v6380_v11  ;;  %v6438_v33 = vsub.f32 %v2472_v14, %v6403_v60  ;;  %v2465_v14 = vmax.f32 %v6442_v59, 0.0  ;;  %v7725_v35 = vand.u32 4294901760, %v6455_v36  ;;  %v2513_v59 = vld.sshfl [vmem:[#allocation1 + $0x8] sm:$0xff pattern:$0x73625140] }
 0x34e   :  { %v2314_v29 = vpop.f32.mrf.mxu1  ;;  %v6526_v40 = vand.u32 4294901760, %v2513_v59  ;;  %v7716_v0 = vand.u32 4294901760, %v6516_v3 }
 0x34f   :  { %v2315_v20 = vadd.f32 %v2314_v29, %v2037_v42  ;;  %v2910_v58 = vand.u32 4294901760, %v6390_v13  ;;  %v6462_v42 = vadd.f32 %v6216_v10, %v1989_v45  ;;  %v1981_v10 = vadd.f32 %v6039_v32, %v8048_v53 }
 0x350   :  { %2103 = vmatmul.f32.gmra.mxu0 %v8040_v4  ;;  %v2923_v32 = vsub.f32 %v6422_v8, %v7728_v47  ;;  %v6511_v45 = vand.u32 4294901760, %v2465_v14  ;;  %v2935_v12 = vsub.f32 %v6455_v36, %v7725_v35  ;;  %v8057_v35 = vld [vmem:[#allocation121_spill] sm:$0xff] }
 0x351   :  { %v2476_v2 = vmax.f32 %v2315_v20, 0.0  ;;  %2377 = vmatmul.f32.gmra.mxu1 %v8037_v19  ;;  %v2916_v19 = vand.u32 4294901760, %v6406_v41  ;;  %v2911_v6 = vsub.f32 %v6390_v13, %v2910_v58  ;;  %v7727_v20 = vand.u32 4294901760, %v6438_v33 }
 0x352   :  { %v2259_v23 = vadd.f32 %v6115_v7, %v1981_v10  ;;  %v2464_v21 = vmax.f32 %v6462_v42, 0.0  ;;  %v2463_v7 = vmax.f32 %v6478_v27, 0.0  ;;  %v2924_v26 = vand.u32 4294901760, %v2923_v32 }
 0x353   :  { %v6400_v57 = vand.u32 4294901760, %v2476_v2  ;;  %v2917_v29 = vsub.f32 %v6406_v41, %v2916_v19  ;;  %v2929_v22 = vsub.f32 %v6438_v33, %v7727_v20  ;;  %v7715_v42 = vand.u32 4294901760, %v6503_v39  ;;  %v8059_v20 = vld [vmem:[#allocation126_spill] sm:$0xff] }
 0x354   :  { %v6541_v10 = vsub.f32 %v2513_v59, %v6526_v40  ;;  %v6544_v18 = vsub.f32 %v2465_v14, %v6511_v45  ;;  %v2947_v32 = vsub.f32 %v6487_v43, %v7718_v48  ;;  %v2942_v14 = vand.u32 4294901760, %v2941_v31 }
 0x355   :  { %v6411_v25 = vsub.f32 %v2476_v2, %v6400_v57  ;;  %2862 = vmatpush.msrb.mxu2 %v6400_v57  ;;  %v6414_v44 = vpop.f32.mrf.mxu0  ;;  %v2918_v16 = vand.u32 4294901760, %v2917_v29  ;;  %v6535_v29 = vand.u32 4294901760, %v2463_v7 }
 0x356   :  { %v6424_v56 = vpop.f32.mrf.mxu1  ;;  %v7724_v31 = vand.u32 4294901760, %v6544_v18 }
 0x357   :  { %v2904_v34 = vand.u32 4294901760, %v6411_v25  ;;  %2864 = vmatpush.msrb.mxu2 %v6380_v11  ;;  %v6568_v59 = vsub.f32 %v2463_v7, %v6535_v29 }
 0x358   :  { %2107 = vmatmul.f32.gmra.mxu0 %v8046_v9 }
 0x359   :  { %2866 = vmatpush.msrb.mxu2 %v6387_v54  ;;  %v2905_v61 = vsub.f32 %v6411_v25, %v2904_v34  ;;  %2381 = vmatmul.f32.gmra.mxu1 %v8040_v4  ;;  %v2912_v4 = vand.u32 4294901760, %v2911_v6  ;;  %v6523_v6 = vand.u32 4294901760, %v2464_v21 }
 0x35b   :  { %2868 = vmatpush.msrb.mxu2 %v6395_v52  ;;  %v2906_v24 = vand.u32 4294901760, %v2905_v61  ;;  %v2462_v61 = vmax.f32 %v2259_v23, 0.0  ;;  %v6556_v23 = vsub.f32 %v2464_v21, %v6523_v6  ;;  %v2948_v21 = vand.u32 4294901760, %v2947_v32 }
 0x35d   :  { %2870 = vmatpush.msrb.mxu2 %v6403_v60  ;;  %2907 = vmatpush.msrb.mxu3 %v2906_v24  ;;  %v6482_v2 = vpop.f32.mrf.mxu0  ;;  %v2461_v24 = vmax.f32 %v2255_v1, 0.0  ;;  %v6552_v30 = vand.u32 4294901760, %v2462_v61 }
 0x35e   :  { %v6489_v50 = vpop.f32.mrf.mxu1 }
 0x35f   :  { %2872 = vmatpush.msrb.mxu2 %v6419_v17  ;;  %2913 = vmatpush.msrb.mxu3 %v2912_v4  ;;  %v2936_v4 = vand.u32 4294901760, %v2935_v12  ;;  %v6562_v1 = vand.u32 4294901760, %v2461_v24  ;;  %v7726_v12 = vand.u32 4294901760, %v6541_v10 }
 0x360   :  { %2111 = vmatmul.f32.gmra.mxu0 %v8050_v55 }
 0x361   :  { %2874 = vmatpush.msrb.mxu2 %v6435_v63  ;;  %2385 = vmatmul.f32.gmra.mxu1 %v8046_v9  ;;  %v2930_v9 = vand.u32 4294901760, %v2929_v22  ;;  %v7717_v22 = vand.u32 4294901760, %v6529_v62 }
 0x362   :  { %2919 = vmatpush.msrb.mxu3 %v2918_v16  ;;  %v2953_v16 = vsub.f32 %v6503_v39, %v7715_v42 }
 0x363   :  { %2876 = vmatpush.msrb.mxu2 %v6452_v15  ;;  %v2965_v7 = vsub.f32 %v6529_v62, %v7717_v22  ;;  %v7721_v22 = vand.u32 4294901760, %v6568_v59 }
 0x364   :  { %2925 = vmatpush.msrb.mxu3 %v2924_v26  ;;  %v8051_v26 = vld [vmem:[#allocation89_spill] sm:$0xff]  ;;  %v2954_v42 = vand.u32 4294901760, %v2953_v16 }
 0x365   :  { %2878 = vmatpush.msrb.mxu2 %v6466_v46  ;;  %v6538_v53 = vpop.f32.mrf.mxu0  ;;  %v2966_v48 = vand.u32 4294901760, %v2965_v7 }
 0x366   :  { %2931 = vmatpush.msrb.mxu3 %v2930_v9  ;;  %v6546_v27 = vpop.f32.mrf.mxu1  ;;  %v2959_v9 = vsub.f32 %v6516_v3, %v7716_v0  ;;  %v6590_v0 = vsub.f32 %v2461_v24, %v6562_v1 }
 0x367   :  { %2880 = vmatpush.msrb.mxu2 %v6484_v28 }
 0x368   :  { %2937 = vmatpush.msrb.mxu3 %v2936_v4  ;;  %2115 = vmatmul.f32.gmra.mxu0 %v8051_v26  ;;  %v6577_v4 = vsub.f32 %v2462_v61, %v6552_v30  ;;  %v2960_v16 = vand.u32 4294901760, %v2959_v9  ;;  %v7722_v7 = vand.u32 4294901760, %v6590_v0 }
 0x369   :  { %2882 = vmatpush.msrb.mxu2 %v6499_v38  ;;  %2389 = vmatmul.f32.gmra.mxu1 %v8050_v55  ;;  %v7720_v55 = vand.u32 4294901760, %v6556_v23 }
 0x36a   :  { %2943 = vmatpush.msrb.mxu3 %v2942_v14  ;;  %v2896_v14 = vsub.f32 %v6541_v10, %v7726_v12  ;;  %v7723_v24 = vand.u32 4294901760, %v6577_v4 }
 0x36b   :  { %2884 = vmatpush.msrb.mxu2 %v6511_v45  ;;  %v2977_v37 = vsub.f32 %v6556_v23, %v7720_v55 }
 0x36c   :  { %2949 = vmatpush.msrb.mxu3 %v2948_v21  ;;  %v2971_v21 = vsub.f32 %v6544_v18, %v7724_v31 }
 0x36d   :  { %2886 = vmatpush.msrb.mxu2 %v6523_v6  ;;  %v6584_v32 = vpop.f32.mrf.mxu0  ;;  %v2978_v55 = vand.u32 4294901760, %v2977_v37 }
 0x36e   :  { %2955 = vmatpush.msrb.mxu3 %v2954_v42  ;;  %v6592_v61 = vpop.f32.mrf.mxu1  ;;  %v2897_v42 = vand.u32 4294901760, %v2896_v14  ;;  %v2972_v9 = vand.u32 4294901760, %v2971_v21  ;;  %v2989_v14 = vsub.f32 %v6577_v4, %v7723_v24 }
 0x36f   :  { %2888 = vmatpush.msrb.mxu2 %v6535_v29 }
 0x370   :  { %2961 = vmatpush.msrb.mxu3 %v2960_v16  ;;  %2119 = vmatmul.f32.gmra.mxu0 %v5548_v5  ;;  %v2983_v16 = vsub.f32 %v6568_v59, %v7721_v22  ;;  %v2990_v37 = vand.u32 4294901760, %v2989_v14  ;;  %v8052_v22 = vld [vmem:[#allocation92_spill] sm:$0xff] }
 0x371   :  { %2890 = vmatpush.msrb.mxu2 %v6552_v30  ;;  %2393 = vmatmul.f32.gmra.mxu1 %v8051_v26 }
 0x372   :  { %2967 = vmatpush.msrb.mxu3 %v2966_v48  ;;  %v2984_v21 = vand.u32 4294901760, %v2983_v16 }
 0x373   :  { %2892 = vmatpush.msrb.mxu2 %v6562_v1 }
 0x374   :  { %2973 = vmatpush.msrb.mxu3 %v2972_v9  ;;  %2898 = vmatmul.f32.vlgmr.msrb.gmra.mxu2 %v2897_v42  ;;  %v2995_v9 = vsub.f32 %v6590_v0, %v7722_v7 }
 0x375   :  { %3005 = vmatpush.msra.mxu2 %v6411_v25  ;;  %v6615_v48 = vpop.f32.mrf.mxu0  ;;  %v8060_v25 = vld [vmem:[#allocation6_spill] sm:$0xff] }
 0x376   :  { %2979 = vmatpush.msrb.mxu3 %v2978_v55  ;;  %v6617_v26 = vpop.f32.mrf.mxu1  ;;  %v2996_v55 = vand.u32 4294901760, %v2995_v9  ;;  %v6659_v9 = vld [vmem:[%s7531_s2] ss:$0 sm:$0xff] }
 0x377   :  { %3008 = vmatpush.msra.mxu2 %v6390_v13  ;;  %v8062_v13 = vand.u32 4294901760, %v6438_v33 }
 0x378   :  { %2985 = vmatpush.msrb.mxu3 %v2984_v21  ;;  %2123 = vmatmul.f32.gmra.mxu0 %v8052_v22 }
 0x379   :  { %3011 = vmatpush.msra.mxu2 %v6406_v41  ;;  %2397 = vmatmul.f32.gmra.mxu1 %v5548_v5  ;;  %v8053_v5 = vld [vmem:[#allocation94_spill] sm:$0xff] }
 0x37a   :  { %2991 = vmatpush.msrb.mxu3 %v2990_v37  ;;  %v8055_v37 = vld [vmem:[#allocation97_spill] sm:$0xff] }
 0x37b   :  { %3014 = vmatpush.msra.mxu2 %v6422_v8 }
 0x37c   :  { %2997 = vmatpush.msrb.mxu3 %v2996_v55  ;;  %v642_v55 = vadd.f32 %v6659_v9, %v8055_v37  ;;  %v8058_v37 = vld [vmem:[#allocation5_spill] sm:$0xff] }
 0x37d   :  { %3017 = vmatpush.msra.mxu2 %v6438_v33  ;;  %v6629_v42 = vpop.f32.mrf.mxu0  ;;  %2999 = vmatmul.f32.vlgmr.msrb.gmra.mxu3 %v6526_v40  ;;  %v8067_v33 = vand.u32 4294901760, %v6487_v43 }
 0x37e   :  { %3058 = vmatpush.msra.mxu3 %v6400_v57  ;;  %v6632_v16 = vpop.f32.mrf.mxu1 }
 0x37f   :  { %3020 = vmatpush.msra.mxu2 %v6455_v36 }
 0x380   :  { %3060 = vmatpush.msra.mxu3 %v6380_v11  ;;  %2127 = vmatmul.f32.gmra.mxu0 %v8053_v5 }
 0x381   :  { %3023 = vmatpush.msra.mxu2 %v6469_v49  ;;  %2401 = vmatmul.f32.gmra.mxu1 %v8052_v22  ;;  %v8054_v22 = vld [vmem:[#allocation96_spill] sm:$0xff] }
 0x382   :  { %3062 = vmatpush.msra.mxu3 %v6387_v54 }
 0x383   :  { %3026 = vmatpush.msra.mxu2 %v6487_v43  ;;  %v8073_v43 = vand.u32 4294901760, %v6556_v23 }
 0x384   :  { %3064 = vmatpush.msra.mxu3 %v6395_v52 }
 0x385   :  { %3029 = vmatpush.msra.mxu2 %v6503_v39  ;;  %v6644_v14 = vpop.f32.mrf.mxu0 }
 0x386   :  { %3066 = vmatpush.msra.mxu3 %v6403_v60  ;;  %v6646_v21 = vpop.f32.mrf.mxu1 }
 0x387   :  { %3032 = vmatpush.msra.mxu2 %v6516_v3 }
 0x388   :  { %3068 = vmatpush.msra.mxu3 %v6419_v17  ;;  %2131 = vmatmul.f32.gmra.mxu0 %v8054_v22 }
 0x389   :  { %3035 = vmatpush.msra.mxu2 %v6529_v62  ;;  %2405 = vmatmul.f32.gmra.mxu1 %v8053_v5  ;;  %v8056_v5 = vld [vmem:[#allocation99_spill] sm:$0xff] }
 0x38a   :  { %3070 = vmatpush.msra.mxu3 %v6435_v63  ;;  %v1032_v31 = vadd.f32 %v8056_v5, %v642_v55  ;;  %v8084_v5 = vld [vmem:[#allocation117_spill] sm:$0xff] }
 0x38b   :  { %3038 = vmatpush.msra.mxu2 %v6544_v18 }
 0x38c   :  { %3072 = vmatpush.msra.mxu3 %v6452_v15  ;;  %v1356_v12 = vadd.f32 %v8057_v35, %v1032_v31 }
 0x38d   :  { %3041 = vmatpush.msra.mxu2 %v6556_v23  ;;  %v2072_v7 = vpop.f32.mrf.mxu0 }
 0x38e   :  { %3074 = vmatpush.msra.mxu3 %v6466_v46  ;;  %v6665_v24 = vpop.f32.mrf.mxu1  ;;  %v1739_v47 = vadd.f32 %v8059_v20, %v1356_v12  ;;  %v8070_v20 = vand.u32 4294901760, %v6529_v62  ;;  %v8076_v62 = vld [vmem:[#allocation10_spill] sm:$0xff] }
 0x38f   :  { %3044 = vmatpush.msra.mxu2 %v6568_v59 }
 0x390   :  { %3076 = vmatpush.msra.mxu3 %v6484_v28  ;;  %2135 = vmatmul.f32.gmra.mxu0 %v8058_v37  ;;  %v2073_v55 = vadd.f32 %v2072_v7, %v1739_v47 }
 0x391   :  { %3047 = vmatpush.msra.mxu2 %v6577_v4  ;;  %2409 = vmatmul.f32.gmra.mxu1 %v8054_v22 }
 0x392   :  { %3078 = vmatpush.msra.mxu3 %v6499_v38 }
 0x393   :  { %3050 = vmatpush.msra.mxu2 %v6590_v0 }
 0x394   :  { %3080 = vmatpush.msra.mxu3 %v6511_v45  ;;  %3053 = vmatmul.f32.vlgmr.msra.gmra.mxu2 %v6541_v10 }
 0x395   :  { %3099 = vmatpush.msrb.mxu2 %v2904_v34  ;;  %v6684_v35 = vpop.f32.mrf.mxu0  ;;  %v8061_v34 = vand.u32 4294901760, %v6422_v8  ;;  %v8065_v8 = vand.u32 4294901760, %v6469_v49 }
 0x396   :  { %3082 = vmatpush.msra.mxu3 %v6523_v6  ;;  %v2350_v31 = vpop.f32.mrf.mxu1 }
 0x397   :  { %3103 = vmatpush.msrb.mxu2 %v2910_v58  ;;  %v6687_v22 = vadd.f32 %v2350_v31, %v2073_v55  ;;  %v8063_v58 = vand.u32 4294901760, %v6541_v10  ;;  %v8079_v10 = vld [vmem:[#allocation110_spill] sm:$0xff]  ;;  %v8086_v31 = vld [vmem:[#allocation111_spill] sm:$0xff] }
 0x398   :  { %3084 = vmatpush.msra.mxu3 %v6535_v29  ;;  %2139 = vmatmul.f32.gmra.mxu0 %v8060_v25 }
 0x399   :  { %3107 = vmatpush.msrb.mxu2 %v2916_v19  ;;  %2413 = vmatmul.f32.gmra.mxu1 %v8058_v37  ;;  %v8064_v19 = vand.u32 4294901760, %v6455_v36  ;;  %v8085_v37 = vld [vmem:[#allocation101_spill] sm:$0xff] }
 0x39a   :  { %3086 = vmatpush.msra.mxu3 %v6552_v30  ;;  %v658_v55 = vadd.f32 %v6659_v9, %v8085_v37 }
 0x39b   :  { %3111 = vmatpush.msrb.mxu2 %v8061_v34  ;;  %v8087_v34 = vld [vmem:[#allocation13_spill] sm:$0xff] }
 0x39c   :  { %3088 = vmatpush.msra.mxu3 %v6562_v1 }
 0x39d   :  { %3115 = vmatpush.msrb.mxu2 %v8062_v13  ;;  %3092 = vmatmul.f32.vlgmr.msra.gmra.mxu3 %v8063_v58  ;;  %v6703_v41 = vpop.f32.mrf.mxu0 }
 0x39e   :  { %3166 = vmatpush.msrb.mxu3 %v6400_v57  ;;  %v6707_v47 = vpop.f32.mrf.mxu1  ;;  %v8066_v57 = vld [vmem:[#allocation7_spill] sm:$0xff] }
 0x39f   :  { %3119 = vmatpush.msrb.mxu2 %v8064_v19  ;;  %v8089_v19 = vld [vmem:[#allocation14_spill] sm:$0xff] }
 0x3a0   :  { %3168 = vmatpush.msrb.mxu3 %v6380_v11  ;;  %2143 = vmatmul.f32.gmra.mxu0 %v8066_v57  ;;  %v8068_v11 = vand.u32 4294901760, %v6503_v39  ;;  %v8074_v39 = vand.u32 4294901760, %v6568_v59 }
 0x3a1   :  { %3123 = vmatpush.msrb.mxu2 %v8065_v8  ;;  %2417 = vmatmul.f32.gmra.mxu1 %v8060_v25  ;;  %v8090_v8 = vld [vmem:[#allocation98_spill] sm:$0xff] }
 0x3a2   :  { %3170 = vmatpush.msrb.mxu3 %v6387_v54  ;;  %v8069_v54 = vand.u32 4294901760, %v6516_v3  ;;  %v8075_v3 = vand.u32 4294901760, %v6577_v4  ;;  %v8083_v4 = vld [vmem:[#allocation114_spill] sm:$0xff] }
 0x3a3   :  { %3127 = vmatpush.msrb.mxu2 %v8067_v33  ;;  %v8091_v33 = vld [vmem:[#allocation116_spill] sm:$0xff] }
 0x3a4   :  { %3172 = vmatpush.msrb.mxu3 %v6395_v52  ;;  %v8071_v52 = vld [vmem:[#allocation8_spill] sm:$0xff] }
 0x3a5   :  { %3131 = vmatpush.msrb.mxu2 %v8068_v11  ;;  %v6720_v36 = vpop.f32.mrf.mxu0  ;;  %v698_v11 = vadd.f32 %v6659_v9, %v8091_v33  ;;  %v8104_v33 = vld [vmem:[#allocation123_spill] sm:$0xff] }
 0x3a6   :  { %3174 = vmatpush.msrb.mxu3 %v6403_v60  ;;  %v6725_v49 = vpop.f32.mrf.mxu1  ;;  %v8072_v60 = vand.u32 4294901760, %v6544_v18  ;;  %v682_v18 = vadd.f32 %v6659_v9, %v8079_v10 }
 0x3a7   :  { %3135 = vmatpush.msrb.mxu2 %v8069_v54  ;;  %v8092_v54 = vld [vmem:[#allocation108_spill] sm:$0xff] }
 0x3a8   :  { %3176 = vmatpush.msrb.mxu3 %v6419_v17  ;;  %2147 = vmatmul.f32.gmra.mxu0 %v8071_v52  ;;  %v1052_v7 = vadd.f32 %v8083_v4, %v682_v18  ;;  %v8097_v18 = vld [vmem:[#allocation9_spill] sm:$0xff]  ;;  %v8099_v4 = vld [vmem:[#allocation102_spill] sm:$0xff] }
 0x3a9   :  { %3139 = vmatpush.msrb.mxu2 %v8070_v20  ;;  %2421 = vmatmul.f32.gmra.mxu1 %v8066_v57  ;;  %v650_v57 = vadd.f32 %v6659_v9, %v8090_v8 }
 0x3aa   :  { %3178 = vmatpush.msrb.mxu3 %v6435_v63  ;;  %v1381_v13 = vadd.f32 %v8087_v34, %v1052_v7 }
 0x3ab   :  { %3143 = vmatpush.msrb.mxu2 %v8072_v60  ;;  %v1036_v7 = vadd.f32 %v8099_v4, %v650_v57  ;;  %v8113_v4 = vld [vmem:[#allocation128_spill] sm:$0xff] }
 0x3ac   :  { %3180 = vmatpush.msrb.mxu3 %v6452_v15  ;;  %v8077_v15 = vand.u32 4294901760, %v6590_v0 }
 0x3ad   :  { %3147 = vmatpush.msrb.mxu2 %v8073_v43  ;;  %v2088_v17 = vpop.f32.mrf.mxu0  ;;  %v8094_v43 = vld [vmem:[#allocation21_spill] sm:$0xff] }
 0x3ae   :  { %3182 = vmatpush.msrb.mxu3 %v6466_v46  ;;  %v6741_v63 = vpop.f32.mrf.mxu1 }
 0x3af   :  { %3151 = vmatpush.msrb.mxu2 %v8074_v39  ;;  %v1769_v39 = vadd.f32 %v8094_v43, %v1381_v13 }
 0x3b0   :  { %3184 = vmatpush.msrb.mxu3 %v6484_v28  ;;  %2151 = vmatmul.f32.gmra.mxu0 %v8076_v62 }
 0x3b1   :  { %3155 = vmatpush.msrb.mxu2 %v8075_v3  ;;  %2425 = vmatmul.f32.gmra.mxu1 %v8071_v52  ;;  %v8093_v52 = vld [vmem:[#allocation11_spill] sm:$0xff]  ;;  %v8095_v3 = vld [vmem:[#allocation22_spill] sm:$0xff] }
 0x3b2   :  { %3186 = vmatpush.msrb.mxu3 %v6499_v38  ;;  %v8078_v38 = vld [vmem:[#allocation12_spill] sm:$0xff] }
 0x3b3   :  { %3159 = vmatpush.msrb.mxu2 %v8077_v15  ;;  %v8096_v15 = vld [vmem:[#allocation105_spill] sm:$0xff] }
 0x3b4   :  { %3188 = vmatpush.msrb.mxu3 %v6511_v45  ;;  %3161 = vmatmul.f32.vlgmr.msrb.gmra.mxu2 %v6526_v40  ;;  %v8080_v45 = vld [vmem:[#allocation113_spill] sm:$0xff]  ;;  %v1040_v10 = vadd.f32 %v8096_v15, %v658_v55  ;;  %v8103_v55 = vld [vmem:[#allocation119_spill] sm:$0xff] }
 0x3b5   :  { %v2092_v46 = vpop.f32.mrf.mxu0  ;;  %v690_v0 = vadd.f32 %v6659_v9, %v8080_v45  ;;  %v706_v8 = vadd.f32 %v6659_v9, %v8103_v55  ;;  %v8117_v55 = vld [vmem:[#allocation141_spill] sm:$0xff] }
 0x3b6   :  { %3190 = vmatpush.msrb.mxu3 %v6523_v6  ;;  %v2366_v28 = vpop.f32.mrf.mxu1  ;;  %v8081_v6 = vld [vmem:[#allocation107_spill] sm:$0xff] }
 0x3b8   :  { %3192 = vmatpush.msrb.mxu3 %v6535_v29  ;;  %2155 = vmatmul.f32.gmra.mxu0 %v8078_v38  ;;  %v674_v29 = vadd.f32 %v6659_v9, %v8081_v6  ;;  %v2093_v6 = vadd.f32 %v2092_v46, %v1769_v39  ;;  %v714_v46 = vadd.f32 %v6659_v9, %v8104_v33  ;;  %v8118_v33 = vld [vmem:[#allocation25_spill] sm:$0xff] }
 0x3b9   :  { %2429 = vmatmul.f32.gmra.mxu1 %v8076_v62 }
 0x3ba   :  { %3194 = vmatpush.msrb.mxu3 %v6552_v30  ;;  %v8082_v30 = vld [vmem:[#allocation104_spill] sm:$0xff]  ;;  %v1048_v25 = vadd.f32 %v8086_v31, %v674_v29 }
 0x3bb   :  { %v666_v59 = vadd.f32 %v6659_v9, %v8082_v30 }
 0x3bc   :  { %3196 = vmatpush.msrb.mxu3 %v6562_v1  ;;  %v1056_v1 = vadd.f32 %v8084_v5, %v690_v0  ;;  %v1376_v60 = vadd.f32 %v8093_v52, %v1048_v25  ;;  %v8098_v0 = vld [vmem:[#allocation20_spill] sm:$0xff]  ;;  %v8102_v25 = vld [vmem:[#allocation19_spill] sm:$0xff]  ;;  %v8107_v52 = vld [vmem:[#allocation17_spill] sm:$0xff] }
 0x3bd   :  { %3198 = vmatmul.f32.vlgmr.msrb.gmra.mxu3 %v6526_v40  ;;  %v2096_v23 = vpop.f32.mrf.mxu0  ;;  %v8088_v40 = vld [vmem:[#allocation15_spill] sm:$0xff]  ;;  %v1044_v20 = vadd.f32 %v8092_v54, %v666_v59  ;;  %v8100_v5 = vld [vmem:[#allocation120_spill] sm:$0xff]  ;;  %v8101_v59 = vld [vmem:[#allocation129_spill] sm:$0xff] }
 0x3be   :  { %v2370_v12 = vpop.f32.mrf.mxu1  ;;  %v1386_v58 = vadd.f32 %v8088_v40, %v1056_v1  ;;  %v1060_v1 = vadd.f32 %v8100_v5, %v698_v11  ;;  %v1366_v37 = vadd.f32 %v8101_v59, %v1040_v10 }
 0x3bf   :  { %v1371_v45 = vadd.f32 %v8097_v18, %v1044_v20  ;;  %v2371_v40 = vadd.f32 %v2370_v12, %v2093_v6  ;;  %v8106_v20 = vld [vmem:[#allocation18_spill] sm:$0xff]  ;;  %v8111_v18 = vld [vmem:[#allocation140_spill] sm:$0xff] }
 0x3c0   :  { %2159 = vmatmul.f32.gmra.mxu0 %v8089_v19  ;;  %v1775_v62 = vadd.f32 %v8095_v3, %v1386_v58  ;;  %v1751_v57 = vadd.f32 %v8106_v20, %v1366_v37  ;;  %v1391_v11 = vadd.f32 %v8107_v52, %v1060_v1  ;;  %v8108_v3 = vld [vmem:[#allocation16_spill] sm:$0xff]  ;;  %v8120_v20 = vld [vmem:[#allocation142_spill] sm:$0xff] }
 0x3c1   :  { %2433 = vmatmul.f32.gmra.mxu1 %v8078_v38  ;;  %v1763_v38 = vadd.f32 %v8098_v0, %v1376_v60  ;;  %v1757_v34 = vadd.f32 %v8102_v25, %v1371_v45  ;;  %v8112_v6 = vld [vmem:[#allocation124_spill] sm:$0xff] }
 0x3c2   :  { %v2097_v29 = vadd.f32 %v2096_v23, %v1775_v62  ;;  %v8105_v23 = vld [vmem:[#allocation125_spill] sm:$0xff]  ;;  %v8110_v62 = vld [vmem:[#allocation130_spill] sm:$0xff]  ;;  %v2081_v10 = vadd.f32 %v6703_v41, %v1751_v57  ;;  %v1781_v45 = vadd.f32 %v8111_v18, %v1391_v11  ;;  %v8114_v37 = vld [vmem:[#allocation132_spill] sm:$0xff] }
 0x3c3   :  { %v2089_v13 = vadd.f32 %v2088_v17, %v1763_v38  ;;  %v1361_v54 = vadd.f32 %v8105_v23, %v1036_v7  ;;  %v2085_v60 = vadd.f32 %v6720_v36, %v1757_v34  ;;  %v8109_v17 = vld [vmem:[#allocation127_spill] sm:$0xff]  ;;  %v2490_v38 = vmax.f32 %v2371_v40, 0.0 }
 0x3c4   :  { %v722_v12 = vadd.f32 %v6659_v9, %v8109_v17  ;;  %v1064_v36 = vadd.f32 %v8112_v6, %v706_v8  ;;  %v8122_v17 = vld [vmem:[#allocation118_spill] sm:$0xff] }
 0x3c5   :  { %v2100_v30 = vpop.f32.mrf.mxu0  ;;  %v2367_v43 = vadd.f32 %v2366_v28, %v2089_v13  ;;  %v1745_v15 = vadd.f32 %v8110_v62, %v1361_v54  ;;  %v2363_v0 = vadd.f32 %v6741_v63, %v2085_v60  ;;  %v8116_v13 = vld [vmem:[#allocation24_spill] sm:$0xff] }
 0x3c6   :  { %v2374_v31 = vpop.f32.mrf.mxu1  ;;  %v2101_v5 = vadd.f32 %v2100_v30, %v1781_v45  ;;  %v1072_v41 = vadd.f32 %v8114_v37, %v722_v12  ;;  %v8121_v60 = vld [vmem:[#allocation100_spill] sm:$0xff]  ;;  %v2065_v12 = vadd.f32 %v6629_v42, %v8122_v17  ;;  %v2485_v42 = vmax.f32 %v6687_v22, 0.0 }
 0x3c7   :  { %v2375_v58 = vadd.f32 %v2374_v31, %v2097_v29  ;;  %v2077_v28 = vadd.f32 %v6684_v35, %v1745_v15  ;;  %v2359_v29 = vadd.f32 %v6725_v49, %v2081_v10  ;;  %v2489_v7 = vmax.f32 %v2367_v43, 0.0  ;;  %v8115_v31 = vld [vmem:[#allocation23_spill] sm:$0xff] }
 0x3c8   :  { %2163 = vmatmul.f32.gmra.mxu0 %v8108_v3  ;;  %v1396_v25 = vadd.f32 %v8115_v31, %v1064_v36  ;;  %v6817_v35 = vand.u32 4294901760, %v2490_v38  ;;  %v6821_v30 = vadd.f32 %v8118_v33, %v1072_v41  ;;  %v6834_v43 = vadd.f32 %v6382_v51, %v8121_v60  ;;  %v8123_v15 = vld [vmem:[#allocation103_spill] sm:$0xff]  ;;  %v8126_v41 = vld [vmem:[#allocation109_spill] sm:$0xff] }
 0x3c9   :  { %v2491_v39 = vmax.f32 %v2375_v58, 0.0  ;;  %2437 = vmatmul.f32.gmra.mxu1 %v8089_v19  ;;  %v1068_v19 = vadd.f32 %v8113_v4, %v714_v46  ;;  %v2355_v63 = vadd.f32 %v6707_v47, %v2077_v28  ;;  %v2488_v58 = vmax.f32 %v2363_v0, 0.0  ;;  %v8119_v46 = vld [vmem:[#allocation122_spill] sm:$0xff] }
 0x3ca   :  { %v1787_v8 = vadd.f32 %v8117_v55, %v1396_v25  ;;  %v2069_v23 = vadd.f32 %v6644_v14, %v8119_v46  ;;  %v2487_v54 = vmax.f32 %v2359_v29, 0.0  ;;  %v6826_v52 = vand.u32 4294901760, %v2489_v7 }
 0x3cb   :  { %v6811_v1 = vand.u32 4294901760, %v2491_v39  ;;  %v1401_v40 = vadd.f32 %v8116_v13, %v1068_v19  ;;  %v2486_v62 = vmax.f32 %v2355_v63, 0.0  ;;  %v2045_v10 = vadd.f32 %v6414_v44, %v8123_v15  ;;  %v8127_v13 = vld [vmem:[#allocation106_spill] sm:$0xff] }
 0x3cc   :  { %v2347_v14 = vadd.f32 %v6665_v24, %v2069_v23  ;;  %v6841_v18 = vand.u32 4294901760, %v2488_v58  ;;  %v6851_v0 = vadd.f32 %v6646_v21, %v2065_v12  ;;  %v6854_v24 = vand.u32 4294901760, %v2487_v54 }
 0x3cd   :  { %v2104_v59 = vpop.f32.mrf.mxu0  ;;  %v1793_v57 = vadd.f32 %v8120_v20, %v1401_v40  ;;  %v6829_v47 = vsub.f32 %v2491_v39, %v6811_v1  ;;  %v6844_v39 = vsub.f32 %v2490_v38, %v6817_v35  ;;  %v6857_v6 = vsub.f32 %v2489_v7, %v6826_v52 }
 0x3ce   :  { %v2378_v34 = vpop.f32.mrf.mxu1  ;;  %v2105_v44 = vadd.f32 %v2104_v59, %v1787_v8  ;;  %v2484_v22 = vmax.f32 %v2347_v14, 0.0  ;;  %v6869_v4 = vand.u32 4294901760, %v2486_v62  ;;  %v6872_v7 = vsub.f32 %v2488_v58, %v6841_v18 }
 0x3cf   :  { %v2379_v49 = vadd.f32 %v2378_v34, %v2101_v5  ;;  %v3251_v28 = vand.u32 4294901760, %v6829_v47  ;;  %v3257_v37 = vand.u32 4294901760, %v6844_v39  ;;  %v2483_v31 = vmax.f32 %v6851_v0, 0.0 }
 0x3d0   :  { %v6885_v25 = vand.u32 4294901760, %v2485_v42  ;;  %v6888_v63 = vsub.f32 %v2487_v54, %v6854_v24  ;;  %v2049_v40 = vadd.f32 %v6482_v2, %v8127_v13  ;;  %v6904_v55 = vand.u32 4294901760, %v2484_v22 }
 0x3d1   :  { %v2492_v11 = vmax.f32 %v2379_v49, 0.0  ;;  %2441 = vmatmul.f32.gmra.mxu1 %v8108_v3  ;;  %v8124_v3 = vld [vmem:[#allocation115_spill] sm:$0xff]  ;;  %v6907_v8 = vsub.f32 %v2486_v62, %v6869_v4  ;;  %v3258_v46 = vsub.f32 %v6844_v39, %v3257_v37  ;;  %v3269_v23 = vand.u32 4294901760, %v6872_v7 }
 0x3d2   :  { %v2061_v51 = vadd.f32 %v6615_v48, %v8124_v3  ;;  %v8125_v48 = vld [vmem:[#allocation112_spill] sm:$0xff]  ;;  %v6915_v2 = vadd.f32 %v6546_v27, %v2049_v40  ;;  %v6918_v54 = vand.u32 4294901760, %v2483_v31  ;;  %v6921_v20 = vsub.f32 %v2485_v42, %v6885_v25 }
 0x3d3   :  { %v6846_v45 = vand.u32 4294901760, %v2492_v11  ;;  %v2057_v21 = vadd.f32 %v6584_v32, %v8125_v48  ;;  %v2053_v32 = vadd.f32 %v6538_v53, %v8126_v41  ;;  %v3252_v53 = vsub.f32 %v6829_v47, %v3251_v28 }
 0x3d4   :  { %v6867_v29 = vadd.f32 %v6632_v16, %v2061_v51  ;;  %v3275_v27 = vand.u32 4294901760, %v6888_v63  ;;  %v6929_v14 = vadd.f32 %v6489_v50, %v2045_v10  ;;  %v2514_v51 = vld.sshfl [vmem:[#allocation1 + $0x10] sm:$0xff pattern:$0x73625140]  ;;  %v3259_v42 = vand.u32 4294901760, %v3258_v46 }
 0x3d5   :  { %v6860_v36 = vsub.f32 %v2492_v11, %v6846_v45  ;;  %3203 = vmatpush.msra.mxu2 %v6846_v45  ;;  %v2108_v38 = vpop.f32.mrf.mxu0  ;;  %v6882_v16 = vadd.f32 %v6617_v26, %v2057_v21  ;;  %v3263_v26 = vand.u32 4294901760, %v6857_v6  ;;  %v6901_v58 = vadd.f32 %v6592_v61, %v2053_v32  ;;  %v8129_v32 = vld [vmem:[#allocation143_spill] sm:$0xff] }
 0x3d6   :  { %v2382_v19 = vpop.f32.mrf.mxu1  ;;  %v2482_v49 = vmax.f32 %v6867_v29, 0.0  ;;  %v2109_v11 = vadd.f32 %v2108_v38, %v1793_v57  ;;  %v3253_v17 = vand.u32 4294901760, %v3252_v53  ;;  %v6935_v57 = vsub.f32 %v2484_v22, %v6904_v55 }
 0x3d7   :  { %v3245_v5 = vand.u32 4294901760, %v6860_v36  ;;  %v6875_v59 = vadd.f32 %v2382_v19, %v2105_v44  ;;  %3205 = vmatpush.msra.mxu2 %v6811_v1  ;;  %v2481_v61 = vmax.f32 %v6882_v16, 0.0  ;;  %v3264_v12 = vsub.f32 %v6857_v6, %v3263_v26 }
 0x3d8   :  { %v2480_v62 = vmax.f32 %v6901_v58, 0.0  ;;  %v6932_v15 = vand.u32 4294901760, %v2482_v49  ;;  %v3270_v50 = vsub.f32 %v6872_v7, %v3269_v23  ;;  %v7734_v10 = vand.u32 4294901760, %v6907_v8 }
 0x3d9   :  { %v3246_v34 = vsub.f32 %v6860_v36, %v3245_v5  ;;  %3207 = vmatpush.msra.mxu2 %v6817_v35  ;;  %v2319_v44 = vadd.f32 %v6424_v56, %v6834_v43  ;;  %v2479_v38 = vmax.f32 %v6915_v2, 0.0  ;;  %v6947_v48 = vand.u32 4294901760, %v2481_v61  ;;  %v8128_v56 = vld [vmem:[#allocation131_spill] sm:$0xff] }
 0x3da   :  { %v6950_v21 = vsub.f32 %v2483_v31, %v6918_v54  ;;  %v3265_v29 = vand.u32 4294901760, %v3264_v12  ;;  %v3276_v22 = vsub.f32 %v6888_v63, %v3275_v27  ;;  %v7732_v19 = vand.u32 4294901760, %v6921_v20 }
 0x3db   :  { %3209 = vmatpush.msra.mxu2 %v6826_v52  ;;  %v3247_v33 = vand.u32 4294901760, %v3246_v34  ;;  %v6957_v41 = vand.u32 4294901760, %v2514_v51  ;;  %v730_v43 = vadd.f32 %v6659_v9, %v8128_v56  ;;  %v1799_v16 = vadd.f32 %v8129_v32, %v6821_v30  ;;  %v8131_v56 = vld [vmem:[#allocation26_spill] sm:$0xff] }
 0x3dc   :  { %v2478_v31 = vmax.f32 %v6929_v14, 0.0  ;;  %v6964_v34 = vand.u32 4294901760, %v2480_v62  ;;  %v6967_v53 = vsub.f32 %v2482_v49, %v6932_v15  ;;  %v3271_v13 = vand.u32 4294901760, %v3270_v50 }
 0x3dd   :  { %3211 = vmatpush.msra.mxu2 %v6841_v18  ;;  %3248 = vmatpush.msra.mxu3 %v3247_v33  ;;  %v2112_v60 = vpop.f32.mrf.mxu0  ;;  %v3282_v40 = vsub.f32 %v6907_v8, %v7734_v10  ;;  %v7730_v58 = vand.u32 4294901760, %v6935_v57  ;;  %v2477_v33 = vmax.f32 %v2319_v44, 0.0  ;;  %v6974_v46 = vand.u32 4294901760, %v2479_v38 }
 0x3de   :  { %v2386_v3 = vpop.f32.mrf.mxu1  ;;  %v6977_v30 = vsub.f32 %v2481_v61, %v6947_v48  ;;  %v7729_v2 = vand.u32 4294901760, %v6950_v21  ;;  %v2113_v49 = vadd.f32 %v2112_v60, %v1799_v16  ;;  %v3288_v12 = vsub.f32 %v6921_v20, %v7732_v19 }
 0x3df   :  { %v6937_v0 = vadd.f32 %v2386_v3, %v2109_v11  ;;  %3213 = vmatpush.msra.mxu2 %v6854_v24  ;;  %3254 = vmatpush.msra.mxu3 %v3253_v17  ;;  %v3277_v17 = vand.u32 4294901760, %v3276_v22  ;;  %v6985_v14 = vsub.f32 %v2514_v51, %v6957_v41  ;;  %v8130_v3 = vld [vmem:[#allocation134_spill] sm:$0xff]  ;;  %v6988_v50 = vand.u32 4294901760, %v2478_v31 }
 0x3e0   :  { %v6991_v61 = vsub.f32 %v2480_v62, %v6964_v34  ;;  %v3294_v22 = vsub.f32 %v6935_v57, %v7730_v58  ;;  %v7731_v51 = vand.u32 4294901760, %v6967_v53  ;;  %v7001_v32 = vand.u32 4294901760, %v2477_v33 }
 0x3e1   :  { %3215 = vmatpush.msra.mxu2 %v6869_v4  ;;  %3260 = vmatpush.msra.mxu3 %v3259_v42  ;;  %v1076_v42 = vadd.f32 %v8130_v3, %v730_v43  ;;  %v7004_v62 = vsub.f32 %v2479_v38, %v6974_v46  ;;  %v3289_v16 = vand.u32 4294901760, %v3288_v12  ;;  %v7016_v38 = vsub.f32 %v2478_v31, %v6988_v50 }
 0x3e2   :  { %v3295_v12 = vand.u32 4294901760, %v3294_v22 }
 0x3e3   :  { %3217 = vmatpush.msra.mxu2 %v6885_v25  ;;  %3266 = vmatpush.msra.mxu3 %v3265_v29  ;;  %v3283_v29 = vand.u32 4294901760, %v3282_v40  ;;  %v1411_v43 = vadd.f32 %v8131_v56, %v1076_v42  ;;  %v7733_v40 = vand.u32 4294901760, %v6977_v30  ;;  %v8133_v42 = vld [vmem:[#allocation144_spill] sm:$0xff]  ;;  %v7735_v56 = vand.u32 4294901760, %v6991_v61 }
 0x3e5   :  { %3219 = vmatpush.msra.mxu2 %v6904_v55  ;;  %3272 = vmatpush.msra.mxu3 %v3271_v13  ;;  %v2116_v11 = vpop.f32.mrf.mxu0  ;;  %v3300_v13 = vsub.f32 %v6950_v21, %v7729_v2  ;;  %v7024_v2 = vsub.f32 %v2477_v33, %v7001_v32  ;;  %v3312_v22 = vsub.f32 %v6977_v30, %v7733_v40 }
 0x3e6   :  { %v2390_v60 = vpop.f32.mrf.mxu1 }
 0x3e7   :  { %v6993_v44 = vadd.f32 %v2390_v60, %v2113_v49  ;;  %3221 = vmatpush.msra.mxu2 %v6918_v54  ;;  %3278 = vmatpush.msra.mxu3 %v3277_v17  ;;  %v3236_v49 = vand.u32 4294901760, %v6985_v14  ;;  %v8132_v17 = vld [vmem:[#allocation133_spill] sm:$0xff]  ;;  %v1805_v60 = vadd.f32 %v8133_v42, %v1411_v43  ;;  %v3301_v43 = vand.u32 4294901760, %v3300_v13  ;;  %v8134_v42 = vld [vmem:[#allocation136_spill] sm:$0xff] }
 0x3e8   :  { %v738_v3 = vadd.f32 %v6659_v9, %v8132_v17  ;;  %v7736_v17 = vand.u32 4294901760, %v7004_v62  ;;  %v3318_v13 = vsub.f32 %v6991_v61, %v7735_v56  ;;  %v3313_v10 = vand.u32 4294901760, %v3312_v22 }
 0x3e9   :  { %3223 = vmatpush.msra.mxu2 %v6932_v15  ;;  %3284 = vmatpush.msra.mxu3 %v3283_v29  ;;  %v3306_v29 = vsub.f32 %v6967_v53, %v7731_v51  ;;  %v2117_v58 = vadd.f32 %v2116_v11, %v1805_v60  ;;  %v7738_v60 = vand.u32 4294901760, %v7016_v38 }
 0x3ea   :  { %v1080_v51 = vadd.f32 %v8134_v42, %v738_v3  ;;  %v7737_v3 = vand.u32 4294901760, %v7024_v2 }
 0x3eb   :  { %3225 = vmatpush.msra.mxu2 %v6947_v48  ;;  %3290 = vmatpush.msra.mxu3 %v3289_v16  ;;  %v3237_v16 = vsub.f32 %v6985_v14, %v3236_v49  ;;  %v3307_v11 = vand.u32 4294901760, %v3306_v29  ;;  %v8136_v29 = vld [vmem:[#allocation135_spill] sm:$0xff]  ;;  %v3330_v22 = vsub.f32 %v7016_v38, %v7738_v60 }
 0x3ec   :  { %v746_v42 = vadd.f32 %v6659_v9, %v8136_v29 }
 0x3ed   :  { %3227 = vmatpush.msra.mxu2 %v6964_v34  ;;  %3296 = vmatpush.msra.mxu3 %v3295_v12  ;;  %v2120_v31 = vpop.f32.mrf.mxu0  ;;  %v8135_v12 = vld [vmem:[#allocation27_spill] sm:$0xff] }
 0x3ee   :  { %v2394_v33 = vpop.f32.mrf.mxu1  ;;  %v1416_v40 = vadd.f32 %v8135_v12, %v1080_v51  ;;  %v3319_v51 = vand.u32 4294901760, %v3318_v13 }
 0x3ef   :  { %v7035_v19 = vadd.f32 %v2394_v33, %v2117_v58  ;;  %3229 = vmatpush.msra.mxu2 %v6974_v46  ;;  %3302 = vmatpush.msra.mxu3 %v3301_v43  ;;  %v3324_v58 = vsub.f32 %v7004_v62, %v7736_v17  ;;  %v3238_v43 = vand.u32 4294901760, %v3237_v16  ;;  %v8137_v33 = vld [vmem:[#allocation145_spill] sm:$0xff]  ;;  %v3336_v16 = vsub.f32 %v7024_v2, %v7737_v3  ;;  %v8141_v3 = vld [vmem:[#allocation146_spill] sm:$0xff] }
 0x3f0   :  { %v1811_v56 = vadd.f32 %v8137_v33, %v1416_v40  ;;  %v3331_v33 = vand.u32 4294901760, %v3330_v22 }
 0x3f1   :  { %3231 = vmatpush.msra.mxu2 %v6988_v50  ;;  %3308 = vmatpush.msra.mxu3 %v3307_v11  ;;  %v3325_v17 = vand.u32 4294901760, %v3324_v58  ;;  %v3337_v58 = vand.u32 4294901760, %v3336_v16 }
 0x3f2   :  { %v2121_v11 = vadd.f32 %v2120_v31, %v1811_v56  ;;  %v8139_v56 = vld [vmem:[#allocation29_spill] sm:$0xff] }
 0x3f3   :  { %3233 = vmatpush.msra.mxu2 %v7001_v32  ;;  %3314 = vmatpush.msra.mxu3 %v3313_v10  ;;  %v8138_v10 = vld [vmem:[#allocation138_spill] sm:$0xff] }
 0x3f4   :  { %3239 = vmatmul.f32.vlgmr.msra.gmra.mxu2 %v3238_v43  ;;  %v1084_v13 = vadd.f32 %v8138_v10, %v746_v42 }
 0x3f5   :  { %3346 = vmatpush.msrb.mxu2 %v6860_v36  ;;  %3320 = vmatpush.msra.mxu3 %v3319_v51  ;;  %v2124_v12 = vpop.f32.mrf.mxu0  ;;  %v8140_v51 = vld [vmem:[#allocation137_spill] sm:$0xff]  ;;  %v8147_v36 = vand.u32 4294901760, %v6907_v8 }
 0x3f6   :  { %v2398_v40 = vpop.f32.mrf.mxu1  ;;  %v1421_v31 = vadd.f32 %v8139_v56, %v1084_v13  ;;  %v754_v43 = vadd.f32 %v6659_v9, %v8140_v51  ;;  %v8143_v9 = vld [vmem:[#allocation31_spill] sm:$0xff]  ;;  %v8145_v56 = vld [vmem:[#allocation60_spill] sm:$0xff]  ;;  %v7092_v51 = vpop.f32.mrf.mxu2 }
 0x3f7   :  { %3349 = vmatpush.msrb.mxu2 %v6829_v47  ;;  %v7061_v29 = vadd.f32 %v2398_v40, %v2121_v11  ;;  %3326 = vmatpush.msra.mxu3 %v3325_v17  ;;  %v8142_v11 = vld [vmem:[#allocation139_spill] sm:$0xff] }
 0x3f8   :  { %v1817_v60 = vadd.f32 %v8141_v3, %v1421_v31  ;;  %v1088_v16 = vadd.f32 %v8142_v11, %v754_v43  ;;  %v7096_v43 = vpop.f32.mrf.mxu3 }
 0x3f9   :  { %3352 = vmatpush.msrb.mxu2 %v6844_v39  ;;  %3332 = vmatpush.msra.mxu3 %v3331_v33 }
 0x3fa   :  { %v2125_v17 = vadd.f32 %v2124_v12, %v1817_v60  ;;  %v1426_v3 = vadd.f32 %v8143_v9, %v1088_v16  ;;  %v8144_v60 = vld [vmem:[#allocation33_spill] sm:$0xff] }
 0x3fb   :  { %3355 = vmatpush.msrb.mxu2 %v6857_v6  ;;  %3338 = vmatpush.msra.mxu3 %v3337_v58 }
 0x3fc   :  { %3340 = vmatmul.f32.vlgmr.msra.gmra.mxu3 %v6957_v41  ;;  %v1823_v12 = vadd.f32 %v8144_v60, %v1426_v3 }
 0x3fd   :  { %3358 = vmatpush.msrb.mxu2 %v6872_v7  ;;  %3399 = vmatpush.msrb.mxu3 %v6846_v45  ;;  %v2128_v42 = vpop.f32.mrf.mxu0  ;;  %v8149_v7 = vand.u32 4294901760, %v6935_v57 }
 0x3fe   :  { %v2402_v22 = vpop.f32.mrf.mxu1  ;;  %v2129_v10 = vadd.f32 %v2128_v42, %v1823_v12  ;;  %v7109_v9 = vpop.f32.mrf.mxu2 }
 0x3ff   :  { %3361 = vmatpush.msrb.mxu2 %v6888_v63  ;;  %3401 = vmatpush.msrb.mxu3 %v6811_v1  ;;  %v7075_v40 = vadd.f32 %v2402_v22, %v2125_v17  ;;  %v8146_v22 = vld [vmem:[#allocation35_spill] sm:$0xff] }
 0x400   :  { %v7115_v3 = vpop.f32.mrf.mxu3 }
 0x401   :  { %3364 = vmatpush.msrb.mxu2 %v6907_v8  ;;  %3403 = vmatpush.msrb.mxu3 %v6817_v35 }
 0x403   :  { %3367 = vmatpush.msrb.mxu2 %v6921_v20  ;;  %3405 = vmatpush.msrb.mxu3 %v6826_v52 }
 0x405   :  { %3370 = vmatpush.msrb.mxu2 %v6935_v57  ;;  %3407 = vmatpush.msrb.mxu3 %v6841_v18  ;;  %v2132_v13 = vpop.f32.mrf.mxu0 }
 0x406   :  { %v2406_v33 = vpop.f32.mrf.mxu1  ;;  %v2133_v31 = vadd.f32 %v2132_v13, %v8145_v56  ;;  %v1450_v47 = vpop.f32.mrf.mxu2 }
 0x407   :  { %3373 = vmatpush.msrb.mxu2 %v6950_v21  ;;  %3409 = vmatpush.msrb.mxu3 %v6854_v24  ;;  %v7088_v58 = vadd.f32 %v2406_v33, %v2129_v10 }
 0x409   :  { %3376 = vmatpush.msrb.mxu2 %v6967_v53  ;;  %3411 = vmatpush.msrb.mxu3 %v6869_v4 }
 0x40b   :  { %3379 = vmatpush.msrb.mxu2 %v6977_v30  ;;  %3413 = vmatpush.msrb.mxu3 %v6885_v25 }
 0x40d   :  { %3382 = vmatpush.msrb.mxu2 %v6991_v61  ;;  %3415 = vmatpush.msrb.mxu3 %v6904_v55  ;;  %v2136_v17 = vpop.f32.mrf.mxu0 }
 0x40e   :  { %v2410_v42 = vpop.f32.mrf.mxu1  ;;  %v2137_v11 = vadd.f32 %v2136_v17, %v8146_v22  ;;  %v1455_v63 = vpop.f32.mrf.mxu2 }
 0x40f   :  { %3385 = vmatpush.msrb.mxu2 %v7004_v62  ;;  %3417 = vmatpush.msrb.mxu3 %v6918_v54  ;;  %v7103_v16 = vadd.f32 %v2410_v42, %v2133_v31 }
 0x411   :  { %3388 = vmatpush.msrb.mxu2 %v7016_v38  ;;  %3419 = vmatpush.msrb.mxu3 %v6932_v15 }
 0x413   :  { %3391 = vmatpush.msrb.mxu2 %v7024_v2  ;;  %3421 = vmatpush.msrb.mxu3 %v6947_v48 }
 0x414   :  { %3394 = vmatmul.f32.vlgmr.msrb.gmra.mxu2 %v6985_v14 }
 0x415   :  { %3440 = vmatpush.msra.mxu2 %v3245_v5  ;;  %3423 = vmatpush.msrb.mxu3 %v6964_v34  ;;  %v7119_v60 = vpop.f32.mrf.mxu0 }
 0x416   :  { %v2414_v12 = vpop.f32.mrf.mxu1 }
 0x417   :  { %3444 = vmatpush.msra.mxu2 %v3251_v28  ;;  %3425 = vmatpush.msrb.mxu3 %v6974_v46  ;;  %v7122_v10 = vadd.f32 %v2414_v12, %v2137_v11  ;;  %v1852_v28 = vpop.f32.mrf.mxu3  ;;  %v8162_v12 = vld [vmem:[#allocation30_spill] sm:$0xff] }
 0x419   :  { %3448 = vmatpush.msra.mxu2 %v3257_v37  ;;  %3427 = vmatpush.msrb.mxu3 %v6988_v50 }
 0x41b   :  { %3452 = vmatpush.msra.mxu2 %v3263_v26  ;;  %3429 = vmatpush.msrb.mxu3 %v7001_v32 }
 0x41c   :  { %3433 = vmatmul.f32.vlgmr.msrb.gmra.mxu3 %v3236_v49  ;;  %v8160_v49 = vld [vmem:[#allocation34_spill] sm:$0xff] }
 0x41d   :  { %3456 = vmatpush.msra.mxu2 %v3269_v23  ;;  %3507 = vmatpush.msra.mxu3 %v6846_v45  ;;  %v7138_v39 = vpop.f32.mrf.mxu0  ;;  %v8148_v45 = vand.u32 4294901760, %v6921_v20  ;;  %v1460_v20 = vpop.f32.mrf.mxu2 }
 0x41e   :  { %v7140_v6 = vpop.f32.mrf.mxu1 }
 0x41f   :  { %3460 = vmatpush.msra.mxu2 %v3275_v27  ;;  %3509 = vmatpush.msra.mxu3 %v6811_v1  ;;  %v8150_v1 = vand.u32 4294901760, %v6950_v21  ;;  %v1858_v26 = vpop.f32.mrf.mxu3 }
 0x421   :  { %3464 = vmatpush.msra.mxu2 %v8147_v36  ;;  %3511 = vmatpush.msra.mxu3 %v6817_v35  ;;  %v8151_v35 = vand.u32 4294901760, %v6967_v53  ;;  %v8157_v53 = vld [vmem:[#allocation38_spill] sm:$0xff]  ;;  %v1441_v36 = vadd.f32 %v7092_v51, %v8162_v12 }
 0x423   :  { %3468 = vmatpush.msra.mxu2 %v8148_v45  ;;  %3513 = vmatpush.msra.mxu3 %v6826_v52  ;;  %v8152_v52 = vand.u32 4294901760, %v6977_v30  ;;  %v1461_v30 = vadd.f32 %v1460_v20, %v8157_v53 }
 0x425   :  { %3472 = vmatpush.msra.mxu2 %v8149_v7  ;;  %3515 = vmatpush.msra.mxu3 %v6841_v18  ;;  %v2148_v5 = vpop.f32.mrf.mxu0  ;;  %v8153_v18 = vand.u32 4294901760, %v6991_v61 }
 0x426   :  { %v2422_v37 = vpop.f32.mrf.mxu1 }
 0x427   :  { %3476 = vmatpush.msra.mxu2 %v8150_v1  ;;  %3517 = vmatpush.msra.mxu3 %v6854_v24  ;;  %v8154_v24 = vand.u32 4294901760, %v7004_v62  ;;  %v8163_v1 = vld [vmem:[#allocation42_spill] sm:$0xff] }
 0x429   :  { %3480 = vmatpush.msra.mxu2 %v8151_v35  ;;  %3519 = vmatpush.msra.mxu3 %v6869_v4  ;;  %v8155_v4 = vand.u32 4294901760, %v7016_v38  ;;  %v1451_v38 = vadd.f32 %v1450_v47, %v8160_v49  ;;  %v2499_v49 = vmax.f32 %v7088_v58, 0.0 }
 0x42b   :  { %3484 = vmatpush.msra.mxu2 %v8152_v52  ;;  %3521 = vmatpush.msra.mxu3 %v6885_v25  ;;  %v8156_v25 = vand.u32 4294901760, %v7024_v2  ;;  %v8158_v2 = vld [vmem:[#allocation40_spill] sm:$0xff]  ;;  %v1853_v17 = vadd.f32 %v1852_v28, %v1451_v38 }
 0x42d   :  { %3488 = vmatpush.msra.mxu2 %v8153_v18  ;;  %3523 = vmatpush.msra.mxu3 %v6904_v55  ;;  %v2152_v8 = vpop.f32.mrf.mxu0  ;;  %v1864_v55 = vpop.f32.mrf.mxu3  ;;  %v2149_v35 = vadd.f32 %v2148_v5, %v1853_v17 }
 0x42e   :  { %v2426_v23 = vpop.f32.mrf.mxu1  ;;  %v1865_v62 = vadd.f32 %v1864_v55, %v1461_v30 }
 0x42f   :  { %3492 = vmatpush.msra.mxu2 %v8154_v24  ;;  %3525 = vmatpush.msra.mxu3 %v6918_v54  ;;  %v2427_v24 = vadd.f32 %v2426_v23, %v2149_v35 }
 0x431   :  { %3496 = vmatpush.msra.mxu2 %v8155_v4  ;;  %3527 = vmatpush.msra.mxu3 %v6932_v15  ;;  %v1465_v15 = vpop.f32.mrf.mxu2 }
 0x432   :  { %v1466_v14 = vadd.f32 %v1465_v15, %v8158_v2 }
 0x433   :  { %3500 = vmatpush.msra.mxu2 %v8156_v25  ;;  %3529 = vmatpush.msra.mxu3 %v6947_v48 }
 0x434   :  { %3502 = vmatmul.f32.vlgmr.msra.gmra.mxu2 %v6957_v41 }
 0x435   :  { %3531 = vmatpush.msra.mxu3 %v6964_v34  ;;  %v2156_v54 = vpop.f32.mrf.mxu0  ;;  %v1870_v57 = vpop.f32.mrf.mxu3  ;;  %v8159_v34 = vld [vmem:[#allocation36_spill] sm:$0xff] }
 0x436   :  { %v2430_v27 = vpop.f32.mrf.mxu1  ;;  %v1456_v61 = vadd.f32 %v1455_v63, %v8159_v34  ;;  %v2500_v34 = vmax.f32 %v7103_v16, 0.0 }
 0x437   :  { %3533 = vmatpush.msra.mxu3 %v6974_v46  ;;  %v1871_v46 = vadd.f32 %v1870_v57, %v1466_v14 }
 0x438   :  { %v1859_v13 = vadd.f32 %v1858_v26, %v1456_v61  ;;  %v1841_v26 = vadd.f32 %v7096_v43, %v1441_v36  ;;  %v7243_v58 = vand.u32 4294901760, %v2500_v34 }
 0x439   :  { %3535 = vmatpush.msra.mxu3 %v6988_v50  ;;  %v2157_v50 = vadd.f32 %v2156_v54, %v1865_v62  ;;  %v1470_v56 = vpop.f32.mrf.mxu2  ;;  %v2504_v54 = vmax.f32 %v2427_v24, 0.0 }
 0x43a   :  { %v2153_v42 = vadd.f32 %v2152_v8, %v1859_v13  ;;  %v1471_v47 = vadd.f32 %v1470_v56, %v8163_v1  ;;  %v2141_v4 = vadd.f32 %v7119_v60, %v1841_v26 }
 0x43b   :  { %3537 = vmatpush.msra.mxu3 %v7001_v32  ;;  %v8161_v32 = vld [vmem:[#allocation32_spill] sm:$0xff] }
 0x43c   :  { %3539 = vmatmul.f32.vlgmr.msra.gmra.mxu3 %v6957_v41  ;;  %v1446_v41 = vadd.f32 %v7109_v9, %v8161_v32  ;;  %v2431_v63 = vadd.f32 %v2430_v27, %v2153_v42  ;;  %v2419_v5 = vadd.f32 %v7140_v6, %v2141_v4  ;;  %v2501_v6 = vmax.f32 %v7122_v10, 0.0 }
 0x43d   :  { %v2160_v48 = vpop.f32.mrf.mxu0  ;;  %v1876_v7 = vpop.f32.mrf.mxu3  ;;  %v2498_v32 = vmax.f32 %v7075_v40, 0.0  ;;  %v2497_v42 = vmax.f32 %v7061_v29, 0.0  ;;  %v7268_v29 = vsub.f32 %v2500_v34, %v7243_v58 }
 0x43e   :  { %v2434_v21 = vpop.f32.mrf.mxu1  ;;  %v2161_v33 = vadd.f32 %v2160_v48, %v1871_v46  ;;  %v1847_v45 = vadd.f32 %v7115_v3, %v1446_v41  ;;  %v1877_v18 = vadd.f32 %v1876_v7, %v1471_v47  ;;  %v2505_v51 = vmax.f32 %v2431_v63, 0.0 }
 0x43f   :  { %v2435_v22 = vadd.f32 %v2434_v21, %v2157_v50  ;;  %v2502_v60 = vmax.f32 %v2419_v5, 0.0  ;;  %v7229_v38 = vand.u32 4294901760, %v2501_v6  ;;  %v2496_v7 = vmax.f32 %v7035_v19, 0.0 }
 0x440   :  { %v2145_v28 = vadd.f32 %v7138_v39, %v1847_v45  ;;  %v7196_v57 = vand.u32 4294901760, %v2505_v51  ;;  %v2515_v45 = vld.sshfl [vmem:[#allocation1 + $0x18] sm:$0xff pattern:$0x73625140]  ;;  %v7265_v1 = vand.u32 4294901760, %v2498_v32  ;;  %v7276_v26 = vand.u32 4294901760, %v2497_v42 }
 0x441   :  { %v2506_v8 = vmax.f32 %v2435_v22, 0.0  ;;  %v7220_v61 = vand.u32 4294901760, %v2502_v60  ;;  %v7254_v22 = vand.u32 4294901760, %v2499_v49  ;;  %v7257_v40 = vsub.f32 %v2501_v6, %v7229_v38 }
 0x442   :  { %v2423_v25 = vadd.f32 %v2422_v37, %v2145_v28  ;;  %v7201_v37 = vand.u32 4294901760, %v2504_v54  ;;  %v7212_v30 = vsub.f32 %v2505_v51, %v7196_v57  ;;  %v7278_v19 = vand.u32 4294901760, %v2515_v45 }
 0x443   :  { %v7194_v27 = vand.u32 4294901760, %v2506_v8  ;;  %v7246_v41 = vsub.f32 %v2502_v60, %v7220_v61  ;;  %v3628_v24 = vand.u32 4294901760, %v7257_v40  ;;  %v7292_v4 = vsub.f32 %v2498_v32, %v7265_v1 }
 0x444   :  { %v2503_v15 = vmax.f32 %v2423_v25, 0.0  ;;  %v7223_v62 = vsub.f32 %v2504_v54, %v7201_v37  ;;  %v7306_v54 = vsub.f32 %v2497_v42, %v7276_v26 }
 0x445   :  { %v2164_v9 = vpop.f32.mrf.mxu0  ;;  %v7204_v21 = vsub.f32 %v2506_v8, %v7194_v27  ;;  %v3622_v63 = vand.u32 4294901760, %v7246_v41  ;;  %v2494_v8 = vmax.f32 %v6937_v0, 0.0  ;;  %v7303_v0 = vsub.f32 %v2515_v45, %v7278_v19 }
 0x446   :  { %v2438_v31 = vpop.f32.mrf.mxu1  ;;  %v2165_v20 = vadd.f32 %v2164_v9, %v1877_v18  ;;  %v7209_v53 = vand.u32 4294901760, %v2503_v15  ;;  %v3610_v17 = vand.u32 4294901760, %v7223_v62  ;;  %v7281_v9 = vsub.f32 %v2499_v49, %v7254_v22 }
 0x447   :  { %v2439_v11 = vadd.f32 %v2438_v31, %v2161_v33  ;;  %v3598_v46 = vand.u32 4294901760, %v7204_v21  ;;  %v3604_v33 = vand.u32 4294901760, %v7212_v30  ;;  %v3623_v51 = vsub.f32 %v7246_v41, %v3622_v63 }
 0x448   :  { %v7232_v13 = vsub.f32 %v2503_v15, %v7209_v53  ;;  %v3611_v35 = vsub.f32 %v7223_v62, %v3610_v17  ;;  %v3629_v15 = vsub.f32 %v7257_v40, %v3628_v24  ;;  %v7313_v60 = vand.u32 4294901760, %v2494_v8 }
 0x449   :  { %v2507_v52 = vmax.f32 %v2439_v11, 0.0  ;;  %v3599_v31 = vsub.f32 %v7204_v21, %v3598_v46  ;;  %v3605_v12 = vsub.f32 %v7212_v30, %v3604_v33  ;;  %v3624_v6 = vand.u32 4294901760, %v3623_v51 }
 0x44a   :  { %v3616_v36 = vand.u32 4294901760, %v7232_v13  ;;  %v3612_v25 = vand.u32 4294901760, %v3611_v35  ;;  %v3646_v49 = vand.u32 4294901760, %v7292_v4  ;;  %v3652_v42 = vand.u32 4294901760, %v7306_v54 }
 0x44b   :  { %v7191_v3 = vand.u32 4294901760, %v2507_v52  ;;  %v3600_v47 = vand.u32 4294901760, %v3599_v31  ;;  %v3606_v18 = vand.u32 4294901760, %v3605_v12 }
 0x44c   :  { %v3617_v28 = vsub.f32 %v7232_v13, %v3616_v36  ;;  %v3647_v45 = vsub.f32 %v7292_v4, %v3646_v49 }
 0x44d   :  { %v7199_v39 = vsub.f32 %v2507_v52, %v7191_v3  ;;  %v2495_v52 = vmax.f32 %v6993_v44, 0.0  ;;  %v7289_v44 = vand.u32 4294901760, %v2496_v7 }
 0x44e   :  { %v2442_v55 = vpop.f32.mrf.mxu1 }
 0x44f   :  { %v2443_v43 = vadd.f32 %v2442_v55, %v2165_v20  ;;  %v3592_v14 = vand.u32 4294901760, %v7199_v39  ;;  %v3634_v20 = vand.u32 4294901760, %v7268_v29  ;;  %v2493_v55 = vmax.f32 %v6875_v59, 0.0 }
 0x450   :  { %v7300_v5 = vand.u32 4294901760, %v2495_v52  ;;  %v7316_v59 = vsub.f32 %v2496_v7, %v7289_v44 }
 0x451   :  { %v2508_v23 = vmax.f32 %v2443_v43, 0.0  ;;  %v3593_v50 = vsub.f32 %v7199_v39, %v3592_v14  ;;  %v3618_v43 = vand.u32 4294901760, %v3617_v28  ;;  %v3635_v34 = vsub.f32 %v7268_v29, %v3634_v20 }
 0x452   :  { %v7327_v32 = vsub.f32 %v2495_v52, %v7300_v5  ;;  %v3658_v7 = vand.u32 4294901760, %v7316_v59 }
 0x453   :  { %v7206_v48 = vand.u32 4294901760, %v2508_v23  ;;  %v3594_v11 = vand.u32 4294901760, %v3593_v50  ;;  %v3577_v50 = vand.u32 4294901760, %v7303_v0  ;;  %v3636_v12 = vand.u32 4294901760, %v3635_v34 }
 0x454   :  { %v3664_v28 = vand.u32 4294901760, %v7327_v32 }
 0x455   :  { %v7215_v2 = vsub.f32 %v2508_v23, %v7206_v48  ;;  %3544 = vmatpush.msrb.mxu2 %v7206_v48  ;;  %v3640_v23 = vand.u32 4294901760, %v7281_v9 }
 0x457   :  { %v3586_v10 = vand.u32 4294901760, %v7215_v2  ;;  %3546 = vmatpush.msrb.mxu2 %v7191_v3  ;;  %v3641_v31 = vsub.f32 %v7281_v9, %v3640_v23 }
 0x459   :  { %v3587_v16 = vsub.f32 %v7215_v2, %v3586_v10  ;;  %3548 = vmatpush.msrb.mxu2 %v7194_v27  ;;  %v3642_v52 = vand.u32 4294901760, %v3641_v31 }
 0x45b   :  { %3550 = vmatpush.msrb.mxu2 %v7196_v57  ;;  %v3588_v56 = vand.u32 4294901760, %v3587_v16  ;;  %v7323_v16 = vand.u32 4294901760, %v2493_v55 }
 0x45d   :  { %3552 = vmatpush.msrb.mxu2 %v7201_v37  ;;  %3589 = vmatpush.msrb.mxu3 %v3588_v56  ;;  %v3630_v56 = vand.u32 4294901760, %v3629_v15  ;;  %v7346_v35 = vsub.f32 %v2493_v55, %v7323_v16  ;;  %v3665_v15 = vsub.f32 %v7327_v32, %v3664_v28 }
 0x45f   :  { %3554 = vmatpush.msrb.mxu2 %v7209_v53  ;;  %3595 = vmatpush.msrb.mxu3 %v3594_v11  ;;  %v7335_v11 = vsub.f32 %v2494_v8, %v7313_v60  ;;  %v3648_v8 = vand.u32 4294901760, %v3647_v45  ;;  %v3666_v31 = vand.u32 4294901760, %v3665_v15 }
 0x461   :  { %3556 = vmatpush.msrb.mxu2 %v7220_v61  ;;  %3601 = vmatpush.msrb.mxu3 %v3600_v47  ;;  %v3578_v47 = vsub.f32 %v7303_v0, %v3577_v50  ;;  %v3670_v51 = vand.u32 4294901760, %v7335_v11 }
 0x463   :  { %3558 = vmatpush.msrb.mxu2 %v7229_v38  ;;  %3607 = vmatpush.msrb.mxu3 %v3606_v18  ;;  %v3653_v18 = vsub.f32 %v7306_v54, %v3652_v42  ;;  %v3579_v55 = vand.u32 4294901760, %v3578_v47 }
 0x465   :  { %3560 = vmatpush.msrb.mxu2 %v7243_v58  ;;  %3613 = vmatpush.msrb.mxu3 %v3612_v25  ;;  %v3659_v25 = vsub.f32 %v7316_v59, %v3658_v7 }
 0x467   :  { %3562 = vmatpush.msrb.mxu2 %v7254_v22  ;;  %3619 = vmatpush.msrb.mxu3 %v3618_v43  ;;  %v3654_v43 = vand.u32 4294901760, %v3653_v18  ;;  %v3660_v34 = vand.u32 4294901760, %v3659_v25 }
 0x469   :  { %3564 = vmatpush.msrb.mxu2 %v7265_v1  ;;  %3625 = vmatpush.msrb.mxu3 %v3624_v6  ;;  %v3676_v6 = vand.u32 4294901760, %v7346_v35 }
 0x46b   :  { %3566 = vmatpush.msrb.mxu2 %v7276_v26  ;;  %3631 = vmatpush.msrb.mxu3 %v3630_v56  ;;  %v3671_v56 = vsub.f32 %v7335_v11, %v3670_v51 }
 0x46d   :  { %3568 = vmatpush.msrb.mxu2 %v7289_v44  ;;  %3637 = vmatpush.msrb.mxu3 %v3636_v12  ;;  %v3677_v12 = vsub.f32 %v7346_v35, %v3676_v6  ;;  %v3672_v45 = vand.u32 4294901760, %v3671_v56 }
 0x46f   :  { %3570 = vmatpush.msrb.mxu2 %v7300_v5  ;;  %3643 = vmatpush.msrb.mxu3 %v3642_v52  ;;  %v3678_v47 = vand.u32 4294901760, %v3677_v12 }
 0x471   :  { %3572 = vmatpush.msrb.mxu2 %v7313_v60  ;;  %3649 = vmatpush.msrb.mxu3 %v3648_v8 }
 0x473   :  { %3574 = vmatpush.msrb.mxu2 %v7323_v16  ;;  %3655 = vmatpush.msrb.mxu3 %v3654_v43 }
 0x474   :  { %3580 = vmatmul.f32.vlgmr.msrb.gmra.mxu2 %v3579_v55 }
 0x475   :  { %3687 = vmatpush.msra.mxu2 %v7215_v2  ;;  %3661 = vmatpush.msrb.mxu3 %v3660_v34 }
 0x477   :  { %3690 = vmatpush.msra.mxu2 %v7199_v39  ;;  %3667 = vmatpush.msrb.mxu3 %v3666_v31 }
 0x479   :  { %3693 = vmatpush.msra.mxu2 %v7204_v21  ;;  %3673 = vmatpush.msrb.mxu3 %v3672_v45 }
 0x47b   :  { %3696 = vmatpush.msra.mxu2 %v7212_v30  ;;  %3679 = vmatpush.msrb.mxu3 %v3678_v47 }
 0x47c   :  { %3681 = vmatmul.f32.vlgmr.msrb.gmra.mxu3 %v7278_v19 }
 0x47d   :  { %3699 = vmatpush.msra.mxu2 %v7223_v62  ;;  %3740 = vmatpush.msra.mxu3 %v7206_v48 }
 0x47f   :  { %3702 = vmatpush.msra.mxu2 %v7232_v13  ;;  %3742 = vmatpush.msra.mxu3 %v7191_v3 }
 0x481   :  { %3705 = vmatpush.msra.mxu2 %v7246_v41  ;;  %3744 = vmatpush.msra.mxu3 %v7194_v27  ;;  %v3886_v41 = vld [vmem:[%s7533_s4 + $0x10] sm:$0xff] }
 0x483   :  { %3708 = vmatpush.msra.mxu2 %v7257_v40  ;;  %3746 = vmatpush.msra.mxu3 %v7196_v57 }
 0x485   :  { %3711 = vmatpush.msra.mxu2 %v7268_v29  ;;  %3748 = vmatpush.msra.mxu3 %v7201_v37 }
 0x487   :  { %3714 = vmatpush.msra.mxu2 %v7281_v9  ;;  %3750 = vmatpush.msra.mxu3 %v7209_v53 }
 0x489   :  { %3717 = vmatpush.msra.mxu2 %v7292_v4  ;;  %3752 = vmatpush.msra.mxu3 %v7220_v61 }
 0x48b   :  { %3720 = vmatpush.msra.mxu2 %v7306_v54  ;;  %3754 = vmatpush.msra.mxu3 %v7229_v38 }
 0x48d   :  { %3723 = vmatpush.msra.mxu2 %v7316_v59  ;;  %3756 = vmatpush.msra.mxu3 %v7243_v58 }
 0x48f   :  { %3726 = vmatpush.msra.mxu2 %v7327_v32  ;;  %3758 = vmatpush.msra.mxu3 %v7254_v22 }
 0x491   :  { %3729 = vmatpush.msra.mxu2 %v7335_v11  ;;  %3760 = vmatpush.msra.mxu3 %v7265_v1 }
 0x493   :  { %3732 = vmatpush.msra.mxu2 %v7346_v35  ;;  %3762 = vmatpush.msra.mxu3 %v7276_v26 }
 0x494   :  { %3735 = vmatmul.f32.vlgmr.msra.gmra.mxu2 %v7303_v0 }
 0x495   :  { %3781 = vmatpush.msrb.mxu2 %v3586_v10  ;;  %3764 = vmatpush.msra.mxu3 %v7289_v44 }
 0x497   :  { %3785 = vmatpush.msrb.mxu2 %v3592_v14  ;;  %3766 = vmatpush.msra.mxu3 %v7300_v5 }
 0x499   :  { %3789 = vmatpush.msrb.mxu2 %v3598_v46  ;;  %3768 = vmatpush.msra.mxu3 %v7313_v60 }
 0x49b   :  { %3793 = vmatpush.msrb.mxu2 %v3604_v33  ;;  %3770 = vmatpush.msra.mxu3 %v7323_v16  ;;  %v3887_v33 = vld [vmem:[%s7533_s4 + $0x18] sm:$0xff] }
 0x49c   :  { %3774 = vmatmul.f32.vlgmr.msra.gmra.mxu3 %v3577_v50 }
 0x49d   :  { %3797 = vmatpush.msrb.mxu2 %v3610_v17  ;;  %3848 = vmatpush.msrb.mxu3 %v7206_v48 }
 0x49f   :  { %3801 = vmatpush.msrb.mxu2 %v3616_v36  ;;  %3850 = vmatpush.msrb.mxu3 %v7191_v3  ;;  %v2558_v3 = vpop.f32.mrf.mxu2 }
 0x4a1   :  { %3805 = vmatpush.msrb.mxu2 %v3622_v63  ;;  %3852 = vmatpush.msrb.mxu3 %v7194_v27  ;;  %v2659_v27 = vpop.f32.mrf.mxu3 }
 0x4a2   :  { %v2660_v2 = vadd.f32 %v2659_v27, %v2558_v3 }
 0x4a3   :  { %3809 = vmatpush.msrb.mxu2 %v3628_v24  ;;  %3854 = vmatpush.msrb.mxu3 %v7196_v57 }
 0x4a5   :  { %3813 = vmatpush.msrb.mxu2 %v3634_v20  ;;  %3856 = vmatpush.msrb.mxu3 %v7201_v37 }
 0x4a7   :  { %3817 = vmatpush.msrb.mxu2 %v3640_v23  ;;  %3858 = vmatpush.msrb.mxu3 %v7209_v53  ;;  %v2713_v57 = vpop.f32.mrf.mxu2 }
 0x4a9   :  { %3821 = vmatpush.msrb.mxu2 %v3646_v49  ;;  %3860 = vmatpush.msrb.mxu3 %v7220_v61  ;;  %v2752_v39 = vpop.f32.mrf.mxu3  ;;  %v2714_v61 = vadd.f32 %v2713_v57, %v2660_v2 }
 0x4ab   :  { %3825 = vmatpush.msrb.mxu2 %v3652_v42  ;;  %3862 = vmatpush.msrb.mxu3 %v7229_v38  ;;  %v2753_v10 = vadd.f32 %v2752_v39, %v2714_v61 }
 0x4ad   :  { %3829 = vmatpush.msrb.mxu2 %v3658_v7  ;;  %3864 = vmatpush.msrb.mxu3 %v7243_v58  ;;  %v7459_v58 = vand.u32 4294901760, %v3887_v33 }
 0x4af   :  { %3833 = vmatpush.msrb.mxu2 %v3664_v28  ;;  %3866 = vmatpush.msrb.mxu3 %v7254_v22  ;;  %v2821_v37 = vpop.f32.mrf.mxu2  ;;  %v7465_v17 = vsub.f32 %v3887_v33, %v7459_v58  ;;  %v7467_v22 = vand.u32 4294901760, %v3886_v41 }
 0x4b0   :  { %v2822_v38 = vadd.f32 %v2821_v37, %v2753_v10 }
 0x4b1   :  { %3837 = vmatpush.msrb.mxu2 %v3670_v51  ;;  %3868 = vmatpush.msrb.mxu3 %v7265_v1  ;;  %v2858_v21 = vpop.f32.mrf.mxu3  ;;  %v3885_v1 = vld [vmem:[%s7533_s4 + $0x8] sm:$0xff]  ;;  %v3939_v29 = vand.u32 4294901760, %v7465_v17  ;;  %v7475_v63 = vsub.f32 %v3886_v41, %v7467_v22 }
 0x4b2   :  { %v2859_v40 = vadd.f32 %v2858_v21, %v2822_v38  ;;  %v4135_v38 = vld [vmem:[%s7534_s5] ss:$0 sm:$0xff]  ;;  %s4168_s5 = smov [#allocation2]  }
 0x4b3   :  { %3841 = vmatpush.msrb.mxu2 %v3676_v6  ;;  %3870 = vmatpush.msrb.mxu3 %v7276_v26  ;;  %v7477_v26 = vand.u32 4294901760, %v3885_v1  ;;  %v3940_v9 = vsub.f32 %v7465_v17, %v3939_v29  ;;  %v3945_v24 = vand.u32 4294901760, %v7475_v63  ;;  %s4112_s23 = sshll.u32 %s4168_s5, 4  ;;  %s4113_s23 = int_to_ptr.vmem [resolvable:$true] %s4112_s23 }
 0x4b4   :  { %3843 = vmatmul.f32.vlgmr.msrb.gmra.mxu2 %v7278_v19 }
 0x4b5   :  { %3872 = vmatpush.msrb.mxu3 %v7289_v44  ;;  %3909 = vmatpush.msra.mxu2 %v7459_v58  ;;  %v7488_v44 = vsub.f32 %v3885_v1, %v7477_v26  ;;  %v3941_v0 = vand.u32 4294901760, %v3940_v9  ;;  %v3946_v54 = vsub.f32 %v7475_v63, %v3945_v24 }
 0x4b7   :  { %3874 = vmatpush.msrb.mxu3 %v7300_v5  ;;  %v2899_v48 = vpop.f32.mrf.mxu2  ;;  %3911 = vmatpush.msra.mxu2 %v7467_v22  ;;  %v3951_v23 = vand.u32 4294901760, %v7488_v44  ;;  %v3947_v59 = vand.u32 4294901760, %v3946_v54 }
 0x4b8   :  { %v2900_v20 = vadd.f32 %v2899_v48, %v2859_v40 }
 0x4b9   :  { %3876 = vmatpush.msrb.mxu3 %v7313_v60  ;;  %v3000_v53 = vpop.f32.mrf.mxu3  ;;  %3913 = vmatpush.msra.mxu2 %v7477_v26  ;;  %v3952_v49 = vsub.f32 %v7488_v44, %v3951_v23 }
 0x4ba   :  { %v3001_v32 = vadd.f32 %v3000_v53, %v2900_v20 }
 0x4bb   :  { %3878 = vmatpush.msrb.mxu3 %v7323_v16  ;;  %v3953_v42 = vand.u32 4294901760, %v3952_v49 }
 0x4bc   :  { %3880 = vmatmul.f32.vlgmr.msrb.gmra.mxu3 %v7278_v19  ;;  %v3884_v19 = vld [vmem:[%s7533_s4] sm:$0xff] }
 0x4bd   :  { %v7490_v4 = vand.u32 4294901760, %v3884_v19  ;;  %3942 = vmatpush.msra.mxu3 %v3941_v0 }
 0x4bf   :  { %v3054_v30 = vpop.f32.mrf.mxu2  ;;  %v7498_v60 = vsub.f32 %v3884_v19, %v7490_v4  ;;  %3915 = vmatpush.msra.mxu2 %v7490_v4  ;;  %3948 = vmatpush.msra.mxu3 %v3947_v59 }
 0x4c0   :  { %v3055_v7 = vadd.f32 %v3054_v30, %v3001_v32 }
 0x4c1   :  { %v3093_v14 = vpop.f32.mrf.mxu3  ;;  %3980 = vmatpush.msrb.mxu2 %v7465_v17  ;;  %v3957_v16 = vand.u32 4294901760, %v7498_v60  ;;  %3954 = vmatpush.msra.mxu3 %v3953_v42 }
 0x4c2   :  { %v3094_v18 = vadd.f32 %v3093_v14, %v3055_v7 }
 0x4c3   :  { %3983 = vmatpush.msrb.mxu2 %v7475_v63  ;;  %v3958_v11 = vsub.f32 %v7498_v60, %v3957_v16 }
 0x4c5   :  { %3986 = vmatpush.msrb.mxu2 %v7488_v44  ;;  %v3959_v35 = vand.u32 4294901760, %v3958_v11 }
 0x4c7   :  { %v3162_v62 = vpop.f32.mrf.mxu2  ;;  %3989 = vmatpush.msrb.mxu2 %v7498_v60  ;;  %3960 = vmatpush.msra.mxu3 %v3959_v35 }
 0x4c8   :  { %v3163_v28 = vadd.f32 %v3162_v62, %v3094_v18 }
 0x4c9   :  { %v3199_v46 = vpop.f32.mrf.mxu3  ;;  %4009 = vmatpush.msrb.mxu3 %v7459_v58 }
 0x4ca   :  { %v3200_v25 = vadd.f32 %v3199_v46, %v3163_v28 }
 0x4cb   :  { %4011 = vmatpush.msrb.mxu3 %v7467_v22 }
 0x4cd   :  { %4013 = vmatpush.msrb.mxu3 %v7477_v26 }
 0x4cf   :  { %v3240_v13 = vpop.f32.mrf.mxu2  ;;  %4015 = vmatpush.msrb.mxu3 %v7490_v4 }
 0x4d0   :  { %v3241_v51 = vadd.f32 %v3240_v13, %v3200_v25 }
 0x4d1   :  { %v3341_v36 = vpop.f32.mrf.mxu3 }
 0x4d2   :  { %v3342_v43 = vadd.f32 %v3341_v36, %v3241_v51 }
 0x4d7   :  { %v3395_v5 = vpop.f32.mrf.mxu2 }
 0x4d8   :  { %v3396_v15 = vadd.f32 %v3395_v5, %v3342_v43 }
 0x4d9   :  { %v3434_v50 = vpop.f32.mrf.mxu3 }
 0x4da   :  { %v3435_v34 = vadd.f32 %v3434_v50, %v3396_v15 }
 0x4df   :  { %v3503_v52 = vpop.f32.mrf.mxu2 }
 0x4e0   :  { %v3504_v56 = vadd.f32 %v3503_v52, %v3435_v34 }
 0x4e1   :  { %v3540_v8 = vpop.f32.mrf.mxu3 }
 0x4e2   :  { %v3541_v12 = vadd.f32 %v3540_v8, %v3504_v56 }
 0x4f7   :  { %v3581_v55 = vpop.f32.mrf.mxu2 }
 0x4f8   :  { %v3582_v45 = vadd.f32 %v3581_v55, %v3541_v12 }
 0x4ff   :  { %v3682_v6 = vpop.f32.mrf.mxu3 }
 0x500   :  { %v3683_v3 = vadd.f32 %v3682_v6, %v3582_v45 }
 0x517   :  { %v3736_v31 = vpop.f32.mrf.mxu2 }
 0x518   :  { %v3737_v27 = vadd.f32 %v3736_v31, %v3683_v3 }
 0x51f   :  { %v3775_v47 = vpop.f32.mrf.mxu3 }
 0x520   :  { %v3776_v39 = vadd.f32 %v3775_v47, %v3737_v27 }
 0x537   :  { %v3844_v57 = vpop.f32.mrf.mxu2 }
 0x538   :  { %v3845_v37 = vadd.f32 %v3844_v57, %v3776_v39 }
 0x53f   :  { %v3881_v21 = vpop.f32.mrf.mxu3 }
 0x540   :  { %v3882_v48 = vadd.f32 %v3881_v21, %v3845_v37 }
 0x542   :  { %v3894_v53 = vsel %vm3892_vm2, %v3882_v48, 0 }
 0x543   :  { %v3916_v30 = vand.u32 4294901760, %v3894_v53 }
 0x545   :  { %v3917_v2 = vsub.f32 %v3894_v53, %v3916_v30  ;;  %3962 = vmatmul.f32.vlgmr.msra.gmra.mxu3 %v3916_v30 }
 0x546   :  { %4069 = vmatpush.msra.mxu3 %v7459_v58 }
 0x547   :  { %v3918_v14 = vand.u32 4294901760, %v3917_v2 }
 0x548   :  { %4071 = vmatpush.msra.mxu3 %v7467_v22 }
 0x549   :  { %v3919_v61 = vsub.f32 %v3917_v2, %v3918_v14 }
 0x54a   :  { %4073 = vmatpush.msra.mxu3 %v7477_v26 }
 0x54b   :  { %v3920_v62 = vand.u32 4294901760, %v3919_v61 }
 0x54c   :  { %4075 = vmatpush.msra.mxu3 %v7490_v4 }
 0x54d   :  { %3921 = vmatmul.f32.vlgmr.msra.gmra.mxu2 %v3920_v62  ;;  %4019 = vmatmul.f32.vlgmr.msrb.gmra.mxu3 %v3918_v14 }
 0x54e   :  { %4038 = vmatpush.msra.mxu2 %v3939_v29 }
 0x550   :  { %4042 = vmatpush.msra.mxu2 %v3945_v24 }
 0x552   :  { %4046 = vmatpush.msra.mxu2 %v3951_v23 }
 0x554   :  { %4050 = vmatpush.msra.mxu2 %v3957_v16 }
 0x555   :  { %3992 = vmatmul.f32.vlgmr.msrb.gmra.mxu2 %v3917_v2  ;;  %4077 = vmatmul.f32.vlgmr.msra.gmra.mxu3 %v3916_v30 }
 0x55d   :  { %4052 = vmatmul.f32.vlgmr.msra.gmra.mxu2 %v3916_v30 }
 0x5c8   :  { %v3963_v10 = vpop.f32.mrf.mxu3 }
 0x5d0   :  { %v3922_v46 = vpop.f32.mrf.mxu2  ;;  %v4020_v33 = vpop.f32.mrf.mxu3 }
 0x5d1   :  { %v3923_v13 = vadd.f32 %v4135_v38, %v3922_v46 }
 0x5d3   :  { %v3964_v41 = vadd.f32 %v3963_v10, %v3923_v13 }
 0x5d8   :  { %v3993_v58 = vpop.f32.mrf.mxu2  ;;  %v4078_v1 = vpop.f32.mrf.mxu3 }
 0x5d9   :  { %v3994_v17 = vadd.f32 %v3993_v58, %v3964_v41 }
 0x5db   :  { %v4021_v22 = vadd.f32 %v4020_v33, %v3994_v17 }
 0x5e0   :  { %v4053_v40 = vpop.f32.mrf.mxu2 }
 0x5e1   :  { %v4054_v36 = vadd.f32 %v4053_v40, %v4021_v22 }
 0x5e3   :  { %v4079_v29 = vadd.f32 %v4078_v1, %v4054_v36 }
 0x5e5   :  { %v4082_v63 = vsel %vm4081_vm3, %v4079_v29, -inf }
 0x5e6   :  { %4083 = vmax.xlane.f32.xlu0 %v4082_v63 }
 0x659   :  { %v4084_v26 = vpop.xlane.xlu0 %4083 }
 0x65a   :  { %v4085_v19 = vsub.f32 %v4079_v29, %v4084_v26 }
 0x65c   :  { %v4086_v9 = vmul.f32 1.442695, %v4085_v19 }
 0x65e   :  { %4136 = vpow2.f32 %v4086_v9 }
 0x664   :  { %v4137_v24 = vpop.eup %4136 }
 0x665   :  { %v4088_v44 = vsel %vm4081_vm3, %v4137_v24, 0.0 }
 0x666   :  { %4089 = vadd.xlane.f32.xlu0 %v4088_v44 }
 0x6d9   :  { %v4090_v4 = vpop.xlane.xlu0 %4089 }
 0x6da   :  { %4138 = vrcp.f32 %v4090_v4  ;;  %v4102_v54 = vand.u32 2147483648, %v4090_v4  ;;  %v4100_v60 = vand.u32 2147483647, %v4090_v4  ;;  %vm4096_vm5 = vweird.f32 %v4090_v4 }
 0x6dc   :  { %v4103_v49 = vor.u32 1.1754944e-38, %v4102_v54  ;;  %vm4101_vm7 = vcmp.eq.f32.partialorder %v4100_v60, 8.507059e+37 }
 0x6e0   :  { %v4139_v20 = vpop.eup %4138 }
 0x6e1   :  { %v4092_v5 = vmul.f32 %v4139_v20, %v4090_v4  ;;  %vm4097_vm4 = vweird.f32 %v4139_v20 }
 0x6e2   :  { %vm4098_vm6 = vmor %vm4096_vm5, %vm4097_vm4 }
 0x6e3   :  { %v4093_v0 = vsub.f32 1.0, %v4092_v5 }
 0x6e5   :  { %v4094_v23 = vmul.f32 %v4139_v20, %v4093_v0 }
 0x6e7   :  { %v4095_v59 = vadd.f32 %v4139_v20, %v4094_v23 }
 0x6e9   :  { %v4099_v16 = vsel %vm4098_vm6, %v4139_v20, %v4095_v59 }
 0x6ea   :  { %v4104_v50 = vsel %vm4101_vm7, %v4103_v49, %v4099_v16 }
 0x6eb   :  { %v4105_v32 = vmul.f32 %v4137_v24, %v4104_v50 }
 0x6ed   :  { %4106 = vst.msk [vmem:[#allocation2] sm:$0x3] %vm4081_vm3, %v4105_v32 }
 0x6ee   :  { %4117 = dma.vmem_to_hbm [thread:$0]  %s4113_s23, 32, %s4115_s26, [#allocation3]  }
 0x6ef   :  { %4166 = dma.done.wait [#allocation3], 32  }
 0x6f0   :  { %4167 = vsyncadd [#allocation3], 4294967264 }
 0x6f1   :  { %4122 = vsyncpa [#allocation3], 1 }

</bundles_post_ra>
